<compile_context>
chip_gen: v7x
topology: tpu7x:2x2x1
jax: 0.10.0
libtpu: 0.0.40
codegen_flags: <defaults>
</compile_context>

<pallas_src>
import math
import functools

import jax
import jax.numpy as jnp
from jax import lax
from jax.experimental import pallas as pl
from jax.experimental.pallas import tpu as pltpu


# ----------------------------------------------------------------------------
# Kernel 1: multi-head attention message, grid = (batch, query-length tiles).
#   K/V projections of `source` are invariant along the tile axis: computed at
#   tile 0 and kept resident in VMEM scratch. Q is projected per tile.
#   Per head h (head-major row slices), scores -> softmax -> P@V written into
#   its row slice of the o_scr slab; a single merge matmul produces the tile.
# Weights are pre-permuted head-major in the wrapper so row order matches
# torch's .view(B, hd, H, L) channel interleave (c == d*H + h); the softmax
# scale 1/sqrt(hd) is folded into Wq/bq.
# ----------------------------------------------------------------------------
def _attn_message_kernel(x_ref, s_ref, wq_ref, bq_ref, wk_ref, bk_ref,
                         wv_ref, bv_ref, wm_ref, bm_ref, out_ref,
                         k_scr, v_scr, o_scr, *, num_heads, head_dim):
    # K/V are resident across the query-tile axis; (re)compute once per batch.
    @pl.when(pl.program_id(1) == 0)
    def _():
        s = s_ref[...]                                            # (D, M)
        k_scr[...] = (jnp.dot(wk_ref[...], s,
                              preferred_element_type=jnp.float32) + bk_ref[...])
        v_scr[...] = (jnp.dot(wv_ref[...], s,
                              preferred_element_type=jnp.float32) + bv_ref[...])

    # Q projection for this query tile (softmax scale already folded in).
    q = (jnp.dot(wq_ref[...], x_ref[...],
                 preferred_element_type=jnp.float32) + bq_ref[...])   # (D, tN)
    k = k_scr[...]                                                    # (D, M)
    v = v_scr[...]                                                    # (D, M)

    # TODO(synk): on v6e/v7x the head_dim-contraction matmuls underfill the
    # 256-deep MXU; bf16 q/k/v here would halve their vreg/VMEM footprint.
    for h in range(num_heads):
        lo = h * head_dim
        hi = lo + head_dim
        qh = q[lo:hi]                                   # (hd, tN)
        kh = k[lo:hi]                                   # (hd, M)
        vh = v[lo:hi]                                   # (hd, M)
        scores = lax.dot_general(qh, kh, (((0,), (0,)), ((), ())),
                                 preferred_element_type=jnp.float32)  # (tN, M)
        scores = scores - jnp.max(scores, axis=-1, keepdims=True)
        e = jnp.exp(scores)
        denom = jnp.sum(e, axis=-1, keepdims=True)
        prob = e * pl.reciprocal(denom, approx=True)
        # Store each head's output into its row slice of the merge-input slab
        # (no concatenate; each head's live range ends here).
        o_scr[lo:hi, :] = lax.dot_general(vh, prob, (((1,), (1,)), ((), ())),
                                          preferred_element_type=jnp.float32)

    out_ref[...] = (jnp.dot(wm_ref[...], o_scr[...],
                            preferred_element_type=jnp.float32)
                    + bm_ref[...]).astype(out_ref.dtype)


# ----------------------------------------------------------------------------
# Kernel 2a: BatchNorm statistics pass over (batch, length-tile) grid.
#   y1 = W1[:, :D] @ x + W1[:, D:] @ message + b1  (concat fused away),
#   emits per-tile (2D, 2) partial [sum, sum-of-squares]; the tiny cross-tile
#   reduction is done in plain JAX so both grid axes stay "parallel".
# ----------------------------------------------------------------------------
def _mlp_stats_kernel(x_ref, m_ref, w1a_ref, w1b_ref, b1_ref, part_ref):
    y1 = (jnp.dot(w1a_ref[...], x_ref[...], preferred_element_type=jnp.float32)
          + jnp.dot(w1b_ref[...], m_ref[...], preferred_element_type=jnp.float32)
          + b1_ref[...])
    s = jnp.sum(y1, axis=1, keepdims=True)            # (2D, 1)
    sq = jnp.sum(y1 * y1, axis=1, keepdims=True)      # (2D, 1)
    part_ref[...] = jnp.concatenate([s, sq], axis=1)  # (2D, 2) -- tiny output


# ----------------------------------------------------------------------------
# Kernel 2b: normalize + ReLU + second conv over (batch, length-tile) grid.
#   y1 is recomputed per tile (cheaper than writing/re-reading a B*2D*N slab).
#   bn_scale / bn_shift are precomputed in the wrapper from the pass-1 stats.
# ----------------------------------------------------------------------------
def _mlp_norm_kernel(x_ref, m_ref, w1a_ref, w1b_ref, b1_ref, scale_ref,
                     shift_ref, w2_ref, b2_ref, out_ref):
    y1 = (jnp.dot(w1a_ref[...], x_ref[...], preferred_element_type=jnp.float32)
          + jnp.dot(w1b_ref[...], m_ref[...], preferred_element_type=jnp.float32)
          + b1_ref[...])
    y = jnp.maximum(y1 * scale_ref[...] + shift_ref[...], 0.0)
    out_ref[...] = (jnp.dot(w2_ref[...], y, preferred_element_type=jnp.float32)
                    + b2_ref[...]).astype(out_ref.dtype)


# ----------------------------------------------------------------------------
# Tile / VMEM-budget helpers (per-generation sizing).
# ----------------------------------------------------------------------------
def _vmem_budget_bytes():
    # ~3/4 of physical VMEM: 96 MiB on v5e/v6e (128 MiB), 48 MiB on v7x (64 MiB).
    try:
        cap = int(pltpu.get_tpu_info().vmem_capacity_bytes)
    except Exception:
        cap = 64 * 1024 * 1024       # conservative fallback (v7x-sized)
    return (cap * 3) // 4


def _choose_tile(n, target):
    """Largest tile <= target dividing n, preferring lane-dense multiples of 128."""
    if n <= target:
        return n
    t = (target // 128) * 128
    while t >= 128:
        if n % t == 0:
            return t
        t -= 128
    for t in range(min(target, n), 0, -1):
        if n % t == 0:
            return t
    return n


def _attn_tile_target(M, budget):
    # Softmax intermediates (~3 * tN * M * 4B) must coexist with resident K/V
    # and double-buffered I/O: cap them at ~40% of the scoped budget.
    cap = max(budget * 2 // 5, 1 << 20)
    return int(min(512, max(128, cap // (12 * max(M, 1)))))


def _mlp_tile_target(D, budget):
    cap = max(budget * 2 // 5, 1 << 20)
    per_col = 4 * (2 * D + 10 * D)   # y1 column + D-wide (double-)buffered columns
    return int(min(512, max(128, cap // max(per_col, 1))))


# ----------------------------------------------------------------------------
# Wrapper: head-major weight permutation, scale folding, W1 split, pallas_calls.
# ----------------------------------------------------------------------------
def attentional_propagation(x, source, params, *, message_dtype=jnp.float32,
                            attn_tile=None, mlp_tile=None):
    # TODO(synk): message_dtype=jnp.bfloat16 halves the attention->MLP HBM
    # round-trip (or fuse the message into MLP pass 1 to eliminate it).
    B, D, N = x.shape
    _, _, M = source.shape
    H = params["num_heads"]
    assert D % H == 0
    hd = D // H
    # f32 sublane alignment for the per-head row slices / head-major layout.
    assert hd % 8 == 0, "head_dim must be a multiple of 8"

    budget = _vmem_budget_bytes()
    tN = attn_tile if attn_tile is not None else _choose_tile(
        N, _attn_tile_target(M, budget))
    tL = mlp_tile if mlp_tile is not None else _choose_tile(
        N, _mlp_tile_target(D, budget))
    assert N % tN == 0 and N % tL == 0
    nt_attn = N // tN
    nt_mlp = N // tL

    # torch channel index c = d*H + h ; head-major position p = h*hd + d.
    p = jnp.arange(D)
    perm = (p % hd) * H + (p // hd)
    scale = 1.0 / math.sqrt(hd)

    def head_major(W, b, s=1.0):
        return W[perm, :] * s, (b[perm] * s).reshape(D, 1)

    # Fold the 1/sqrt(hd) softmax scale into the Q projection weights/bias.
    WqF, bqF = head_major(params["Wq"], params["bq"], scale)
    WkF, bkF = head_major(params["Wk"], params["bk"])
    WvF, bvF = head_major(params["Wv"], params["bv"])
    WmP = params["Wm"][:, perm]                 # permute merge columns
    bm = params["bm"].reshape(D, 1)

    mat_spec = pl.BlockSpec((D, D), lambda b, t: (0, 0))
    vec_spec = pl.BlockSpec((D, 1), lambda b, t: (0, 0))
    xtile_spec = pl.BlockSpec((pl.Squeezed(), D, tN), lambda b, t: (b, 0, t))
    src_spec = pl.BlockSpec((pl.Squeezed(), D, M), lambda b, t: (b, 0, 0))

    attn_call = pl.pallas_call(
        functools.partial(_attn_message_kernel, num_heads=H, head_dim=hd),
        out_shape=jax.ShapeDtypeStruct((B, D, N), message_dtype),
        grid=(B, nt_attn),
        in_specs=[
            xtile_spec, src_spec,
            mat_spec, vec_spec,      # Wq, bq (scaled)
            mat_spec, vec_spec,      # Wk, bk
            mat_spec, vec_spec,      # Wv, bv
            mat_spec, vec_spec,      # Wm, bm
        ],
        out_specs=pl.BlockSpec((pl.Squeezed(), D, tN), lambda b, t: (b, 0, t)),
        scratch_shapes=[
            pltpu.VMEM((D, M), jnp.float32),     # K (resident across tiles)
            pltpu.VMEM((D, M), jnp.float32),     # V
            pltpu.VMEM((D, tN), jnp.float32),    # head-output slab for merge
        ],
        compiler_params=pltpu.CompilerParams(
            dimension_semantics=("parallel", "arbitrary"),
            vmem_limit_bytes=budget),
    )
    message = attn_call(x, source, WqF, bqF, WkF, bkF, WvF, bvF, WmP, bm)

    # MLP weights: split W1 so the concat never materializes anywhere.
    W1a = params["W1"][:, :D]
    W1b = params["W1"][:, D:]
    b1 = params["b1"].reshape(2 * D, 1)
    W2 = params["W2"]
    b2 = params["b2"].reshape(D, 1)

    mlp_x_spec = pl.BlockSpec((pl.Squeezed(), D, tL), lambda b, t: (b, 0, t))
    w1_spec = pl.BlockSpec((2 * D, D), lambda b, t: (0, 0))
    col_spec = pl.BlockSpec((2 * D, 1), lambda b, t: (0, 0))

    # Pass 1: per-tile BN partial statistics (both grid axes parallel).
    # TODO(synk): bump x/message specs to pipeline_mode=pl.Buffered(3) if the
    # input DMAs are exposed in this light-compute pass (keep 2 on v7x).
    stats_call = pl.pallas_call(
        _mlp_stats_kernel,
        out_shape=jax.ShapeDtypeStruct((B, nt_mlp, 2 * D, 2), jnp.float32),
        grid=(B, nt_mlp),
        in_specs=[mlp_x_spec, mlp_x_spec, w1_spec, w1_spec, col_spec],
        out_specs=pl.BlockSpec((pl.Squeezed(), pl.Squeezed(), 2 * D, 2),
                               lambda b, t: (b, t, 0, 0)),
        compiler_params=pltpu.CompilerParams(
            dimension_semantics=("parallel", "parallel"),
            vmem_limit_bytes=budget),
    )
    partials = stats_call(x, message, W1a, W1b, b1)

    # Tiny cross-tile reduction + BN scale/shift in plain JAX.
    count = float(B * N)
    csum = jnp.sum(partials[..., 0], axis=(0, 1))          # (2D,)
    csq = jnp.sum(partials[..., 1], axis=(0, 1))           # (2D,)
    mean = csum / count
    var = jnp.maximum(csq / count - mean * mean, 0.0)       # guard cancellation
    inv_std = lax.rsqrt(var + 1e-5)
    gamma = params["bn_gamma"]
    beta = params["bn_beta"]
    bn_scale = (gamma * inv_std).reshape(2 * D, 1)
    bn_shift = (beta - mean * gamma * inv_std).reshape(2 * D, 1)

    # Pass 2: recompute y1 per tile, normalize, ReLU, second conv.
    norm_call = pl.pallas_call(
        _mlp_norm_kernel,
        out_shape=jax.ShapeDtypeStruct((B, D, N), x.dtype),
        grid=(B, nt_mlp),
        in_specs=[mlp_x_spec, mlp_x_spec, w1_spec, w1_spec, col_spec,
                  col_spec, col_spec,
                  pl.BlockSpec((D, 2 * D), lambda b, t: (0, 0)),
                  pl.BlockSpec((D, 1), lambda b, t: (0, 0))],
        out_specs=pl.BlockSpec((pl.Squeezed(), D, tL), lambda b, t: (b, 0, t)),
        compiler_params=pltpu.CompilerParams(
            dimension_semantics=("parallel", "parallel"),
            vmem_limit_bytes=budget),
    )
    return norm_call(x, message, W1a, W1b, b1, bn_scale, bn_shift, W2, b2)


# ----------------------------------------------------------------------------
# Pure-JAX reference mirroring the PyTorch forward exactly (for verification)
# ----------------------------------------------------------------------------
def ref_forward(x, source, params):
    B, D, N = x.shape
    M = source.shape[2]
    H = params["num_heads"]
    hd = D // H

    def conv1(W, b, inp):
        return jnp.einsum("oc,bcn->bon", W, inp) + b[None, :, None]

    q = conv1(params["Wq"], params["bq"], x).reshape(B, hd, H, N)
    k = conv1(params["Wk"], params["bk"], source).reshape(B, hd, H, M)
    v = conv1(params["Wv"], params["bv"], source).reshape(B, hd, H, M)
    scores = jnp.einsum("bdhn,bdhm->bhnm", q, k) / math.sqrt(hd)
    prob = jax.nn.softmax(scores, axis=-1)
    o = jnp.einsum("bhnm,bdhm->bdhn", prob, v).reshape(B, D, N)
    message = conv1(params["Wm"], params["bm"], o)

    cat = jnp.concatenate([x, message], axis=1)
    y1 = conv1(params["W1"], params["b1"], cat)
    mean = y1.mean(axis=(0, 2), keepdims=True)
    var = ((y1 - mean) ** 2).mean(axis=(0, 2), keepdims=True)
    y = (y1 - mean) / jnp.sqrt(var + 1e-5)
    y = y * params["bn_gamma"][None, :, None] + params["bn_beta"][None, :, None]
    y = jnp.maximum(y, 0.0)
    return conv1(params["W2"], params["b2"], y)


def init_params(key, D, H):
    ks = jax.random.split(key, 12)
    s = 0.15
    return {
        "num_heads": H,
        "Wq": jax.random.normal(ks[0], (D, D), jnp.float32) * s,
        "bq": jax.random.normal(ks[1], (D,), jnp.float32) * s,
        "Wk": jax.random.normal(ks[2], (D, D), jnp.float32) * s,
        "bk": jax.random.normal(ks[3], (D,), jnp.float32) * s,
        "Wv": jax.random.normal(ks[4], (D, D), jnp.float32) * s,
        "bv": jax.random.normal(ks[5], (D,), jnp.float32) * s,
        "Wm": jax.random.normal(ks[6], (D, D), jnp.float32) * s,
        "bm": jax.random.normal(ks[7], (D,), jnp.float32) * s,
        "W1": jax.random.normal(ks[8], (2 * D, 2 * D), jnp.float32) * s,
        "b1": jax.random.normal(ks[9], (2 * D,), jnp.float32) * s,
        "bn_gamma": jnp.ones((2 * D,), jnp.float32),   # BatchNorm1d default init
        "bn_beta": jnp.zeros((2 * D,), jnp.float32),
        "W2": jax.random.normal(ks[10], (D, 2 * D), jnp.float32) * s,
        "b2": jnp.zeros((D,), jnp.float32),            # nn.init.constant_(mlp[-1].bias, 0.0)
    }


if __name__ == "__main__":
    B, D, H, N, M = 2, 32, 4, 256, 192
    key = jax.random.PRNGKey(0)
    kx, ks, kp = jax.random.split(key, 3)
    x = jax.random.normal(kx, (B, D, N), jnp.float32)
    source = jax.random.normal(ks, (B, D, M), jnp.float32)
    params = init_params(kp, D, H)

    # Force multi-tile grids at these small shapes to exercise the tiled paths
    # (128-wide lane-dense tiles -> 2 query tiles and 2 MLP length tiles).
    out = attentional_propagation(x, source, params, attn_tile=128, mlp_tile=128)
    out = jax.block_until_ready(out)

    ref = ref_forward(x, source, params)
    assert out.shape == (B, D, N)
    err = float(jnp.max(jnp.abs(out - ref)))
    # Intentional precision trade: default (single-pass) MXU matmuls on both
    # sides, scale folded into Wq, approx-reciprocal softmax denominator.
    assert jnp.allclose(out, ref, rtol=5e-2, atol=5e-2), f"max abs err {err}"
    print("KERNEL_OK")
</pallas_src>

<mosaic_0001>
module attributes {stable_mosaic.version = 11 : i64} {
  func.func @_attn_message_kernel(%arg0: i32, %arg1: i32, %arg2: memref<1x32x128xf32, #tpu.memory_space<vmem>>, %arg3: memref<1x32x192xf32, #tpu.memory_space<vmem>>, %arg4: memref<32x32xf32, #tpu.memory_space<vmem>>, %arg5: memref<32x1xf32, #tpu.memory_space<vmem>>, %arg6: memref<32x32xf32, #tpu.memory_space<vmem>>, %arg7: memref<32x1xf32, #tpu.memory_space<vmem>>, %arg8: memref<32x32xf32, #tpu.memory_space<vmem>>, %arg9: memref<32x1xf32, #tpu.memory_space<vmem>>, %arg10: memref<32x32xf32, #tpu.memory_space<vmem>>, %arg11: memref<32x1xf32, #tpu.memory_space<vmem>>, %arg12: memref<1x32x128xf32, #tpu.memory_space<vmem>>, %arg13: memref<32x192xf32, #tpu.memory_space<vmem>>, %arg14: memref<32x192xf32, #tpu.memory_space<vmem>>, %arg15: memref<32x128xf32, #tpu.memory_space<vmem>>) attributes {dimension_semantics = [#tpu.dimension_semantics<parallel>, #tpu.dimension_semantics<arbitrary>], iteration_bounds = array<i64: 2, 2>, scalar_prefetch = 0 : i64, scratch_operands = 3 : i64, tpu.core_type = #tpu.core_type<tc>, window_params = [{transform_indices = @transform_0, window_bounds = array<i64: 1, 32, 128>}, {transform_indices = @transform_1, window_bounds = array<i64: 1, 32, 192>}, {pipeline_mode = #tpu.pipeline_mode<synchronous>, transform_indices = @transform_2, window_bounds = array<i64: 32, 32>}, {pipeline_mode = #tpu.pipeline_mode<synchronous>, transform_indices = @transform_3, window_bounds = array<i64: 32, 1>}, {pipeline_mode = #tpu.pipeline_mode<synchronous>, transform_indices = @transform_4, window_bounds = array<i64: 32, 32>}, {pipeline_mode = #tpu.pipeline_mode<synchronous>, transform_indices = @transform_5, window_bounds = array<i64: 32, 1>}, {pipeline_mode = #tpu.pipeline_mode<synchronous>, transform_indices = @transform_6, window_bounds = array<i64: 32, 32>}, {pipeline_mode = #tpu.pipeline_mode<synchronous>, transform_indices = @transform_7, window_bounds = array<i64: 32, 1>}, {pipeline_mode = #tpu.pipeline_mode<synchronous>, transform_indices = @transform_8, window_bounds = array<i64: 32, 32>}, {pipeline_mode = #tpu.pipeline_mode<synchronous>, transform_indices = @transform_9, window_bounds = array<i64: 32, 1>}, {transform_indices = @transform_10, window_bounds = array<i64: 1, 32, 128>}]} {
    %c0_i32 = arith.constant 0 : i32
    %0 = arith.cmpi eq, %arg1, %c0_i32 : i32
    %1 = arith.extui %0 : i1 to i32
    %c0_i32_0 = arith.constant 0 : i32
    %2 = arith.cmpi ne, %1, %c0_i32_0 : i32
    scf.if %2 {
      %c0_42 = arith.constant 0 : index
      %c0_43 = arith.constant 0 : index
      %c0_44 = arith.constant 0 : index
      %85 = vector.load %arg3[%c0_42, %c0_43, %c0_44] : memref<1x32x192xf32, #tpu.memory_space<vmem>>, vector<1x32x192xf32>
      %86 = vector.shape_cast %85 : vector<1x32x192xf32> to vector<32x192xf32>
      %c0_45 = arith.constant 0 : index
      %c0_46 = arith.constant 0 : index
      %87 = vector.load %arg6[%c0_45, %c0_46] : memref<32x32xf32, #tpu.memory_space<vmem>>, vector<32x32xf32>
      %cst_47 = arith.constant dense<0.000000e+00> : vector<32x192xf32>
      %88 = tpu.matmul %87, %86, %cst_47 {dimension_numbers = #tpu.dot_dimension_numbers<[1], [0], [0], [1], [0, 0, 1, 1], [], []>} : vector<32x32xf32>, vector<32x192xf32>, vector<32x192xf32> -> vector<32x192xf32>
      %c0_48 = arith.constant 0 : index
      %c0_49 = arith.constant 0 : index
      %89 = vector.load %arg7[%c0_48, %c0_49] : memref<32x1xf32, #tpu.memory_space<vmem>>, vector<32x1xf32>
      %90 = vector.broadcast %89 : vector<32x1xf32> to vector<32x192xf32>
      %91 = arith.addf %88, %90 : vector<32x192xf32>
      %c0_50 = arith.constant 0 : index
      %c0_51 = arith.constant 0 : index
      %92 = vector.load %arg13[%c0_50, %c0_51] : memref<32x192xf32, #tpu.memory_space<vmem>>, vector<32x192xf32>
      tpu.vector_store %arg13[%c0_50, %c0_51], %91 {strides = array<i32>} : memref<32x192xf32, #tpu.memory_space<vmem>>, vector<32x192xf32>,
      %c0_52 = arith.constant 0 : index
      %c0_53 = arith.constant 0 : index
      %93 = vector.load %arg8[%c0_52, %c0_53] : memref<32x32xf32, #tpu.memory_space<vmem>>, vector<32x32xf32>
      %cst_54 = arith.constant dense<0.000000e+00> : vector<32x192xf32>
      %94 = tpu.matmul %93, %86, %cst_54 {dimension_numbers = #tpu.dot_dimension_numbers<[1], [0], [0], [1], [0, 0, 1, 1], [], []>} : vector<32x32xf32>, vector<32x192xf32>, vector<32x192xf32> -> vector<32x192xf32>
      %c0_55 = arith.constant 0 : index
      %c0_56 = arith.constant 0 : index
      %95 = vector.load %arg9[%c0_55, %c0_56] : memref<32x1xf32, #tpu.memory_space<vmem>>, vector<32x1xf32>
      %96 = vector.broadcast %95 : vector<32x1xf32> to vector<32x192xf32>
      %97 = arith.addf %94, %96 : vector<32x192xf32>
      %c0_57 = arith.constant 0 : index
      %c0_58 = arith.constant 0 : index
      %98 = vector.load %arg14[%c0_57, %c0_58] : memref<32x192xf32, #tpu.memory_space<vmem>>, vector<32x192xf32>
      tpu.vector_store %arg14[%c0_57, %c0_58], %97 {strides = array<i32>} : memref<32x192xf32, #tpu.memory_space<vmem>>, vector<32x192xf32>,
    } else {
    }
    %c0 = arith.constant 0 : index
    %c0_1 = arith.constant 0 : index
    %3 = vector.load %arg4[%c0, %c0_1] : memref<32x32xf32, #tpu.memory_space<vmem>>, vector<32x32xf32>
    %c0_2 = arith.constant 0 : index
    %c0_3 = arith.constant 0 : index
    %c0_4 = arith.constant 0 : index
    %4 = vector.load %arg2[%c0_2, %c0_3, %c0_4] : memref<1x32x128xf32, #tpu.memory_space<vmem>>, vector<1x32x128xf32>
    %5 = vector.shape_cast %4 : vector<1x32x128xf32> to vector<32x128xf32>
    %cst = arith.constant dense<0.000000e+00> : vector<32x128xf32>
    %6 = tpu.matmul %3, %5, %cst {dimension_numbers = #tpu.dot_dimension_numbers<[1], [0], [0], [1], [0, 0, 1, 1], [], []>} : vector<32x32xf32>, vector<32x128xf32>, vector<32x128xf32> -> vector<32x128xf32>
    %c0_5 = arith.constant 0 : index
    %c0_6 = arith.constant 0 : index
    %7 = vector.load %arg5[%c0_5, %c0_6] : memref<32x1xf32, #tpu.memory_space<vmem>>, vector<32x1xf32>
    %8 = vector.broadcast %7 : vector<32x1xf32> to vector<32x128xf32>
    %9 = arith.addf %6, %8 : vector<32x128xf32>
    %c0_7 = arith.constant 0 : index
    %c0_8 = arith.constant 0 : index
    %10 = vector.load %arg13[%c0_7, %c0_8] : memref<32x192xf32, #tpu.memory_space<vmem>>, vector<32x192xf32>
    %c0_9 = arith.constant 0 : index
    %c0_10 = arith.constant 0 : index
    %11 = vector.load %arg14[%c0_9, %c0_10] : memref<32x192xf32, #tpu.memory_space<vmem>>, vector<32x192xf32>
    %12 = vector.extract_strided_slice %9 {offsets = [0, 0], sizes = [8, 128], strides = [1, 1]} : vector<32x128xf32> to vector<8x128xf32>
    %13 = vector.extract_strided_slice %10 {offsets = [0, 0], sizes = [8, 192], strides = [1, 1]} : vector<32x192xf32> to vector<8x192xf32>
    %14 = vector.extract_strided_slice %11 {offsets = [0, 0], sizes = [8, 192], strides = [1, 1]} : vector<32x192xf32> to vector<8x192xf32>
    %cst_11 = arith.constant dense<0.000000e+00> : vector<128x192xf32>
    %15 = tpu.matmul %12, %13, %cst_11 {dimension_numbers = #tpu.dot_dimension_numbers<[0], [0], [1], [1], [0, 1, 1, 1], [], []>} : vector<8x128xf32>, vector<8x192xf32>, vector<128x192xf32> -> vector<128x192xf32>
    %cst_12 = arith.constant dense<0xFF800000> : vector<128xf32>
    %16 = vector.multi_reduction <maximumf>, %15, %cst_12 [1] : vector<128x192xf32> to vector<128xf32>
    %17 = vector.shape_cast %16 : vector<128xf32> to vector<128x1xf32>
    %18 = vector.broadcast %17 : vector<128x1xf32> to vector<128x192xf32>
    %19 = arith.subf %15, %18 : vector<128x192xf32>
    %20 = math.exp %19 : vector<128x192xf32>
    %cst_13 = arith.constant dense<0.000000e+00> : vector<128xf32>
    %21 = vector.multi_reduction <add>, %20, %cst_13 [1] : vector<128x192xf32> to vector<128xf32>
    %22 = vector.shape_cast %21 : vector<128xf32> to vector<128x1xf32>
    %23 = tpu.reciprocal %22 {approx = true} : vector<128x1xf32> -> vector<128x1xf32>
    %24 = vector.broadcast %23 : vector<128x1xf32> to vector<128x192xf32>
    %25 = arith.mulf %20, %24 : vector<128x192xf32>
    %cst_14 = arith.constant dense<0.000000e+00> : vector<8x128xf32>
    %26 = tpu.matmul %14, %25, %cst_14 {dimension_numbers = #tpu.dot_dimension_numbers<[1], [1], [0], [0], [0, 0, 1, 0], [], []>} : vector<8x192xf32>, vector<128x192xf32>, vector<8x128xf32> -> vector<8x128xf32>
    %c0_15 = arith.constant 0 : index
    %c0_16 = arith.constant 0 : index
    %27 = vector.load %arg15[%c0_15, %c0_16] : memref<32x128xf32, #tpu.memory_space<vmem>>, vector<8x128xf32>
    tpu.vector_store %arg15[%c0_15, %c0_16], %26 {strides = array<i32>} : memref<32x128xf32, #tpu.memory_space<vmem>>, vector<8x128xf32>,
    %28 = vector.extract_strided_slice %9 {offsets = [8, 0], sizes = [8, 128], strides = [1, 1]} : vector<32x128xf32> to vector<8x128xf32>
    %29 = vector.extract_strided_slice %10 {offsets = [8, 0], sizes = [8, 192], strides = [1, 1]} : vector<32x192xf32> to vector<8x192xf32>
    %30 = vector.extract_strided_slice %11 {offsets = [8, 0], sizes = [8, 192], strides = [1, 1]} : vector<32x192xf32> to vector<8x192xf32>
    %cst_17 = arith.constant dense<0.000000e+00> : vector<128x192xf32>
    %31 = tpu.matmul %28, %29, %cst_17 {dimension_numbers = #tpu.dot_dimension_numbers<[0], [0], [1], [1], [0, 1, 1, 1], [], []>} : vector<8x128xf32>, vector<8x192xf32>, vector<128x192xf32> -> vector<128x192xf32>
    %cst_18 = arith.constant dense<0xFF800000> : vector<128xf32>
    %32 = vector.multi_reduction <maximumf>, %31, %cst_18 [1] : vector<128x192xf32> to vector<128xf32>
    %33 = vector.shape_cast %32 : vector<128xf32> to vector<128x1xf32>
    %34 = vector.broadcast %33 : vector<128x1xf32> to vector<128x192xf32>
    %35 = arith.subf %31, %34 : vector<128x192xf32>
    %36 = math.exp %35 : vector<128x192xf32>
    %cst_19 = arith.constant dense<0.000000e+00> : vector<128xf32>
    %37 = vector.multi_reduction <add>, %36, %cst_19 [1] : vector<128x192xf32> to vector<128xf32>
    %38 = vector.shape_cast %37 : vector<128xf32> to vector<128x1xf32>
    %39 = tpu.reciprocal %38 {approx = true} : vector<128x1xf32> -> vector<128x1xf32>
    %40 = vector.broadcast %39 : vector<128x1xf32> to vector<128x192xf32>
    %41 = arith.mulf %36, %40 : vector<128x192xf32>
    %cst_20 = arith.constant dense<0.000000e+00> : vector<8x128xf32>
    %42 = tpu.matmul %30, %41, %cst_20 {dimension_numbers = #tpu.dot_dimension_numbers<[1], [1], [0], [0], [0, 0, 1, 0], [], []>} : vector<8x192xf32>, vector<128x192xf32>, vector<8x128xf32> -> vector<8x128xf32>
    %c8 = arith.constant 8 : index
    %c0_21 = arith.constant 0 : index
    %43 = vector.load %arg15[%c8, %c0_21] : memref<32x128xf32, #tpu.memory_space<vmem>>, vector<8x128xf32>
    tpu.vector_store %arg15[%c8, %c0_21], %42 {strides = array<i32>} : memref<32x128xf32, #tpu.memory_space<vmem>>, vector<8x128xf32>,
    %44 = vector.extract_strided_slice %9 {offsets = [16, 0], sizes = [8, 128], strides = [1, 1]} : vector<32x128xf32> to vector<8x128xf32>
    %45 = vector.extract_strided_slice %10 {offsets = [16, 0], sizes = [8, 192], strides = [1, 1]} : vector<32x192xf32> to vector<8x192xf32>
    %46 = vector.extract_strided_slice %11 {offsets = [16, 0], sizes = [8, 192], strides = [1, 1]} : vector<32x192xf32> to vector<8x192xf32>
    %cst_22 = arith.constant dense<0.000000e+00> : vector<128x192xf32>
    %47 = tpu.matmul %44, %45, %cst_22 {dimension_numbers = #tpu.dot_dimension_numbers<[0], [0], [1], [1], [0, 1, 1, 1], [], []>} : vector<8x128xf32>, vector<8x192xf32>, vector<128x192xf32> -> vector<128x192xf32>
    %cst_23 = arith.constant dense<0xFF800000> : vector<128xf32>
    %48 = vector.multi_reduction <maximumf>, %47, %cst_23 [1] : vector<128x192xf32> to vector<128xf32>
    %49 = vector.shape_cast %48 : vector<128xf32> to vector<128x1xf32>
    %50 = vector.broadcast %49 : vector<128x1xf32> to vector<128x192xf32>
    %51 = arith.subf %47, %50 : vector<128x192xf32>
    %52 = math.exp %51 : vector<128x192xf32>
    %cst_24 = arith.constant dense<0.000000e+00> : vector<128xf32>
    %53 = vector.multi_reduction <add>, %52, %cst_24 [1] : vector<128x192xf32> to vector<128xf32>
    %54 = vector.shape_cast %53 : vector<128xf32> to vector<128x1xf32>
    %55 = tpu.reciprocal %54 {approx = true} : vector<128x1xf32> -> vector<128x1xf32>
    %56 = vector.broadcast %55 : vector<128x1xf32> to vector<128x192xf32>
    %57 = arith.mulf %52, %56 : vector<128x192xf32>
    %cst_25 = arith.constant dense<0.000000e+00> : vector<8x128xf32>
    %58 = tpu.matmul %46, %57, %cst_25 {dimension_numbers = #tpu.dot_dimension_numbers<[1], [1], [0], [0], [0, 0, 1, 0], [], []>} : vector<8x192xf32>, vector<128x192xf32>, vector<8x128xf32> -> vector<8x128xf32>
    %c16 = arith.constant 16 : index
    %c0_26 = arith.constant 0 : index
    %59 = vector.load %arg15[%c16, %c0_26] : memref<32x128xf32, #tpu.memory_space<vmem>>, vector<8x128xf32>
    tpu.vector_store %arg15[%c16, %c0_26], %58 {strides = array<i32>} : memref<32x128xf32, #tpu.memory_space<vmem>>, vector<8x128xf32>,
    %60 = vector.extract_strided_slice %9 {offsets = [24, 0], sizes = [8, 128], strides = [1, 1]} : vector<32x128xf32> to vector<8x128xf32>
    %61 = vector.extract_strided_slice %10 {offsets = [24, 0], sizes = [8, 192], strides = [1, 1]} : vector<32x192xf32> to vector<8x192xf32>
    %62 = vector.extract_strided_slice %11 {offsets = [24, 0], sizes = [8, 192], strides = [1, 1]} : vector<32x192xf32> to vector<8x192xf32>
    %cst_27 = arith.constant dense<0.000000e+00> : vector<128x192xf32>
    %63 = tpu.matmul %60, %61, %cst_27 {dimension_numbers = #tpu.dot_dimension_numbers<[0], [0], [1], [1], [0, 1, 1, 1], [], []>} : vector<8x128xf32>, vector<8x192xf32>, vector<128x192xf32> -> vector<128x192xf32>
    %cst_28 = arith.constant dense<0xFF800000> : vector<128xf32>
    %64 = vector.multi_reduction <maximumf>, %63, %cst_28 [1] : vector<128x192xf32> to vector<128xf32>
    %65 = vector.shape_cast %64 : vector<128xf32> to vector<128x1xf32>
    %66 = vector.broadcast %65 : vector<128x1xf32> to vector<128x192xf32>
    %67 = arith.subf %63, %66 : vector<128x192xf32>
    %68 = math.exp %67 : vector<128x192xf32>
    %cst_29 = arith.constant dense<0.000000e+00> : vector<128xf32>
    %69 = vector.multi_reduction <add>, %68, %cst_29 [1] : vector<128x192xf32> to vector<128xf32>
    %70 = vector.shape_cast %69 : vector<128xf32> to vector<128x1xf32>
    %71 = tpu.reciprocal %70 {approx = true} : vector<128x1xf32> -> vector<128x1xf32>
    %72 = vector.broadcast %71 : vector<128x1xf32> to vector<128x192xf32>
    %73 = arith.mulf %68, %72 : vector<128x192xf32>
    %cst_30 = arith.constant dense<0.000000e+00> : vector<8x128xf32>
    %74 = tpu.matmul %62, %73, %cst_30 {dimension_numbers = #tpu.dot_dimension_numbers<[1], [1], [0], [0], [0, 0, 1, 0], [], []>} : vector<8x192xf32>, vector<128x192xf32>, vector<8x128xf32> -> vector<8x128xf32>
    %c24 = arith.constant 24 : index
    %c0_31 = arith.constant 0 : index
    %75 = vector.load %arg15[%c24, %c0_31] : memref<32x128xf32, #tpu.memory_space<vmem>>, vector<8x128xf32>
    tpu.vector_store %arg15[%c24, %c0_31], %74 {strides = array<i32>} : memref<32x128xf32, #tpu.memory_space<vmem>>, vector<8x128xf32>,
    %c0_32 = arith.constant 0 : index
    %c0_33 = arith.constant 0 : index
    %76 = vector.load %arg10[%c0_32, %c0_33] : memref<32x32xf32, #tpu.memory_space<vmem>>, vector<32x32xf32>
    %c0_34 = arith.constant 0 : index
    %c0_35 = arith.constant 0 : index
    %77 = vector.load %arg15[%c0_34, %c0_35] : memref<32x128xf32, #tpu.memory_space<vmem>>, vector<32x128xf32>
    %cst_36 = arith.constant dense<0.000000e+00> : vector<32x128xf32>
    %78 = tpu.matmul %76, %77, %cst_36 {dimension_numbers = #tpu.dot_dimension_numbers<[1], [0], [0], [1], [0, 0, 1, 1], [], []>} : vector<32x32xf32>, vector<32x128xf32>, vector<32x128xf32> -> vector<32x128xf32>
    %c0_37 = arith.constant 0 : index
    %c0_38 = arith.constant 0 : index
    %79 = vector.load %arg11[%c0_37, %c0_38] : memref<32x1xf32, #tpu.memory_space<vmem>>, vector<32x1xf32>
    %80 = vector.broadcast %79 : vector<32x1xf32> to vector<32x128xf32>
    %81 = arith.addf %78, %80 : vector<32x128xf32>
    %c0_39 = arith.constant 0 : index
    %c0_40 = arith.constant 0 : index
    %c0_41 = arith.constant 0 : index
    %82 = vector.load %arg12[%c0_39, %c0_40, %c0_41] : memref<1x32x128xf32, #tpu.memory_space<vmem>>, vector<1x32x128xf32>
    %83 = vector.shape_cast %82 : vector<1x32x128xf32> to vector<32x128xf32>
    %84 = vector.shape_cast %81 : vector<32x128xf32> to vector<1x32x128xf32>
    tpu.vector_store %arg12[%c0_39, %c0_40, %c0_41], %84 {strides = array<i32>} : memref<1x32x128xf32, #tpu.memory_space<vmem>>, vector<1x32x128xf32>,
    return
  }
  func.func @transform_0(%arg0: i32, %arg1: i32) -> (i32, i32, i32) {
    %c0_i32 = arith.constant 0 : i32
    %c0_i32_0 = arith.constant 0 : i32
    return %arg0, %c0_i32, %arg1 : i32, i32, i32
  }
  func.func @transform_1(%arg0: i32, %arg1: i32) -> (i32, i32, i32) {
    %c0_i32 = arith.constant 0 : i32
    %c0_i32_0 = arith.constant 0 : i32
    %c0_i32_1 = arith.constant 0 : i32
    return %arg0, %c0_i32, %c0_i32_0 : i32, i32, i32
  }
  func.func @transform_2(%arg0: i32, %arg1: i32) -> (i32, i32) {
    %c0_i32 = arith.constant 0 : i32
    %c0_i32_0 = arith.constant 0 : i32
    %c0_i32_1 = arith.constant 0 : i32
    return %c0_i32, %c0_i32_0 : i32, i32
  }
  func.func @transform_3(%arg0: i32, %arg1: i32) -> (i32, i32) {
    %c0_i32 = arith.constant 0 : i32
    %c0_i32_0 = arith.constant 0 : i32
    %c0_i32_1 = arith.constant 0 : i32
    return %c0_i32, %c0_i32_0 : i32, i32
  }
  func.func @transform_4(%arg0: i32, %arg1: i32) -> (i32, i32) {
    %c0_i32 = arith.constant 0 : i32
    %c0_i32_0 = arith.constant 0 : i32
    %c0_i32_1 = arith.constant 0 : i32
    return %c0_i32, %c0_i32_0 : i32, i32
  }
  func.func @transform_5(%arg0: i32, %arg1: i32) -> (i32, i32) {
    %c0_i32 = arith.constant 0 : i32
    %c0_i32_0 = arith.constant 0 : i32
    %c0_i32_1 = arith.constant 0 : i32
    return %c0_i32, %c0_i32_0 : i32, i32
  }
  func.func @transform_6(%arg0: i32, %arg1: i32) -> (i32, i32) {
    %c0_i32 = arith.constant 0 : i32
    %c0_i32_0 = arith.constant 0 : i32
    %c0_i32_1 = arith.constant 0 : i32
    return %c0_i32, %c0_i32_0 : i32, i32
  }
  func.func @transform_7(%arg0: i32, %arg1: i32) -> (i32, i32) {
    %c0_i32 = arith.constant 0 : i32
    %c0_i32_0 = arith.constant 0 : i32
    %c0_i32_1 = arith.constant 0 : i32
    return %c0_i32, %c0_i32_0 : i32, i32
  }
  func.func @transform_8(%arg0: i32, %arg1: i32) -> (i32, i32) {
    %c0_i32 = arith.constant 0 : i32
    %c0_i32_0 = arith.constant 0 : i32
    %c0_i32_1 = arith.constant 0 : i32
    return %c0_i32, %c0_i32_0 : i32, i32
  }
  func.func @transform_9(%arg0: i32, %arg1: i32) -> (i32, i32) {
    %c0_i32 = arith.constant 0 : i32
    %c0_i32_0 = arith.constant 0 : i32
    %c0_i32_1 = arith.constant 0 : i32
    return %c0_i32, %c0_i32_0 : i32, i32
  }
  func.func @transform_10(%arg0: i32, %arg1: i32) -> (i32, i32, i32) {
    %c0_i32 = arith.constant 0 : i32
    %c0_i32_0 = arith.constant 0 : i32
    return %arg0, %c0_i32, %arg1 : i32, i32, i32
  }
}

</mosaic_0001>

<bundles_post_ra>
// kernel: tpu_custom_call.1
= control target key start
LH: loop header
LB: loop body
LE: loop exit
PB: predicated region body
PF: predicated region fallthrough
CT: control target
= control target key end

     0   :  { %s6923_s0 = inlined_call_operand.vmem [shape: f32[2,32,256], index: 0, kind: input, shape index: {}]   ;;  %s6924_s1 = inlined_call_operand.hbm [shape: f32[2,32,192], index: 1, kind: input, shape index: {}]   ;;  %s6925_s2 = inlined_call_operand.hbm [shape: f32[32,32], index: 2, kind: input, shape index: {}]   ;;  %s6926_s3 = inlined_call_operand.vmem [shape: f32[32,1], index: 3, kind: input, shape index: {}]   ;;  %s6927_s4 = inlined_call_operand.hbm [shape: f32[32,32], index: 4, kind: input, shape index: {}]   ;;  %s6928_s5 = inlined_call_operand.vmem [shape: f32[32,1], index: 5, kind: input, shape index: {}]   ;;  %s6929_s6 = inlined_call_operand.hbm [shape: f32[32,32], index: 6, kind: input, shape index: {}]   ;;  %s6930_s7 = inlined_call_operand.vmem [shape: f32[32,1], index: 7, kind: input, shape index: {}]   ;;  %s6931_s8 = inlined_call_operand.vmem [shape: f32[32,32], index: 8, kind: input, shape index: {}]   ;;  %s6932_s9 = inlined_call_operand.vmem [shape: f32[32,1], index: 9, kind: input, shape index: {}]   ;;  %s6933_s10 = inlined_call_operand.hbm [shape: f32[2,32,256], index: 10, kind: output, shape index: {}]  }
   0x1   :  { %7028 = sst [smem:[#allocation53_spill]] %s6926_s3 }
   0x2   :  { %7029 = sst [smem:[#allocation54_spill]] %s6928_s5 }
   0x3   :  { %7030 = sst [smem:[#allocation55_spill]] %s6930_s7 }
   0x4   :  { %7031 = sst [smem:[#allocation56_spill]] %s6931_s8 }
   0x5   :  { %7032 = sst [smem:[#allocation57_spill]] %s6932_s9 }
   0x6   :  { %7033 = sst [smem:[#allocation58_spill]] %s6933_s10 }
   0x7   :  { %15 = vsyncpa [#allocation7], 0 }
   0x8   :  { %17 = vsyncpa [#allocation7 + $0x1], 0 }
   0x9   :  { %18 = vsyncpa [#allocation10], 0 }
   0xa   :  { %19 = vsyncpa [#allocation13], 0 }
   0xb   :  { %20 = vsyncpa [#allocation8], 0 }
   0xc   :  { %22 = vsyncpa [#allocation8 + $0x1], 0  ;;  %s5018_s13 = smov 0   ;;  %s5020_s14 = smov 0  }
   0xd   :  { %s5022_s15 = smov 0   ;;  %s5024_s16 = smov 0  }
   0xe   :  { %s5026_s17 = smov 0   ;;  %s5028_s18 = smov 0  }
   0xf   :  { %s5030_s19 = smov 0   ;;  %s5032_s20 = smov 0  }
  0x10   :  { %s5034_s21 = smov 0   ;;  %s5036_s22 = smov 0  }
  0x11   :  { %s5038_s23 = smov 0  }
  0x12 LB: > { %7034 = sst [smem:[#allocation19_spill]] %s4905_s13  ;;  %s3765_s24 = sadd.s32 4294967295, %s4945_s23   ;;  %s4945_s23 = sphi %s5038_s23, %s28_s23   ;;  %s4941_s22 = sphi %s5036_s22, %s7248_s22   ;;  %s4937_s21 = sphi %s5034_s21, %s7247_s21   ;;  %s4933_s20 = sphi %s5032_s20, %s7246_s20   ;;  %s4929_s19 = sphi %s5030_s19, %s7245_s19   ;;  %s4925_s18 = sphi %s5028_s18, %s7244_s18   ;;  %s4921_s17 = sphi %s5026_s17, %s7243_s17   ;;  %s4917_s16 = sphi %s5024_s16, %s7242_s16   ;;  %s4913_s15 = sphi %s5022_s15, %s7241_s15   ;;  %s4909_s14 = sphi %s5020_s14, %s7240_s14   ;;  %s4905_s13 = sphi %s5018_s13, %s7239_s13  }
  0x13   : > { %7035 = sst [smem:[#allocation20_spill]] %s4929_s19  ;;  %s3766_s25 = sadd.s32 4294967294, %s4945_s23  }
  0x14   : > { %7036 = sst [smem:[#allocation21_spill]] %s4933_s20  ;;  %s37_s26 = sadd.s32 1, %s4937_s21 }
  0x15   : > { %s40_s27 = sadd.s32 1, %s4941_s22  ;;  %p38_p0 = scmp.ge.s32.totalorder %s37_s26, 2 }
  0x16   : > { %s49_s28 = sadd.s32 1, %s4925_s18  ;;  %p56_p1 = scmp.ne.s32.totalorder %s4925_s18, %s4921_s17 }
  0x17   : > { %p57_p2 = scmp.eq.s32.totalorder %s4945_s23, 0  ;;  %s7250_s26 = smov (%p38_p0, %s37_s26), 0 }
  0x18   : > { %7037 = sst [smem:[#allocation22_spill]] %s7250_s26  ;;  %s7252_s27 = smov (!%p38_p0, %s40_s27), %s4941_s22 }
  0x19   : > { %s45_s29 = ssub.s32 %s4937_s21, %s7250_s26  ;;  %p5089_p3 = por %p57_p2, %p56_p1 }
  0x1a   : > { %p42_p4 = scmp.ge.s32.totalorder %s7252_s27, 2  ;;  %s75_s11 = sadd.s32 1, %s4917_s16 }
  0x1b   : > { %p82_p5 = scmp.ne.s32.totalorder %s4917_s16, %s4913_s15  ;;  %p88_p6 = scmp.ne.s32.totalorder %s4913_s15, %s4909_s14 }
  0x1c   : > { %s7254_s27 = smov (%p42_p4, %s7252_s27), 0  ;;  %p5104_p8 = scmp.eq.s32.totalorder %s3765_s24, 0 }
  0x1d   : > { %7039 = sst [smem:[#allocation23_spill]] %s7254_s27  ;;  %p5100_p7 = por %p82_p5, %p57_p2 }
  0x1e   : > { %s7041_s26 = scalar_select %p5104_p8, 1, 0 }
  0x1f   : > { %s7040_s12 = scalar_select %p5100_p7, 1, 0 }
  0x20   : > { %7042 = sst [smem:[#allocation24_spill]] %s7041_s26  ;;  %s44_s10 = ssub.s32 %s4941_s22, %s7254_s27 }
  0x21   : > { %p282_p9 = scmp.eq.s32.totalorder %s3765_s24, 3  ;;  %s46_s20 = sor.u32 %s45_s29, %s44_s10 }
  0x22   : > { %p73_p10 = scmp.eq.s32.totalorder %s44_s10, 0  ;;  %p47_p11 = scmp.eq.s32.totalorder %s46_s20, 0 }
  0x23   : > { %p5112_p12 = por %p5104_p8, %p88_p6  ;;  %p5125_p13 = por %p282_p9, %p56_p1 }
  0x24   : > { %s5117_s8 = scalar_select %p73_p10, %s4917_s16, %s75_s11  }
  0x25   : > { %s7043_s14 = scalar_select %p5112_p12, 1, 0 }
  0x26   : > { %7045 = sst [smem:[#allocation26_spill]] %s5117_s8  ;;  %p287_p0 = scmp.ne.s32.totalorder %s4921_s17, %s4905_s13 }
  0x27   : > { %7044 = sst [smem:[#allocation25_spill]] %s7043_s14  ;;  %p288_p2 = scmp.eq.s32.totalorder %s3766_s25, 3 }
  0x28   : > { %s5120_s9 = scalar_select %p47_p11, %s4925_s18, %s49_s28  }
  0x29   : > { %s7047_s3 = scalar_select %p5125_p13, 1, 0 }
  0x2a   : > { %7046 = sst [smem:[#allocation27_spill]] %s5120_s9  ;;  %p3767_p4 = scmp.ge.s32.totalorder %s4945_s23, 1 }
  0x2b   : > { %7048 = sst [smem:[#allocation28_spill]] %s7047_s3  ;;  %p295_p5 = scmp.lt.s32.totalorder %s4945_s23, 5 }
  0x2c   : > { %p5133_p7 = por %p288_p2, %p287_p0  ;;  %s4947_s24 = smov [#allocation9]  }
  0x2d   : > { %p5137_p6 = pnand %p3767_p4, %p295_p5  ;;  %s307_s28 = sshll.u32 %s4947_s24, 4  ;;  %s5141_s28 = int_to_ptr.vmem [resolvable:$true] %s307_s28 }
  0x2e   : > { %s7049_s10 = scalar_select %p5133_p7, 1, 0 }
  0x2f   : > { %p4192_p1 = pneg %p5137_p6  ;;  %s4948_s29 = smov [#allocation11]  }
  0x30   : > { %7050 = sst [smem:[#allocation29_spill]] %s7049_s10  ;;  %s323_s11 = sshll.u32 %s4948_s29, 4  ;;  %s5151_s11 = int_to_ptr.vmem [resolvable:$true] %s323_s11 }
  0x31   : > { %p5147_p9 = pnand %p4192_p1, %p5104_p8  ;;  %s4949_s27 = smov [#allocation12]  }
  0x32   : > { %s339_s9 = sshll.u32 %s4949_s27, 4  ;;  %s4703_s10 = scalar_lea.hbm %s6925_s2, 512  ;;  %s5153_s9 = int_to_ptr.vmem [resolvable:$true] %s339_s9 }
  0x33   : > { %p4704_p10 = scmp.ne.s32.totalorder %s6925_s2, %s4703_s10  ;;  %p5163_p11 = pneg %p5147_p9 }
  0x34   : > { %p4710_p4 = scmp.lt.u32.totalorder %s4703_s10, %s6925_s2 }
  0x35   : > { %p4706_p0 = pnand %p5163_p11, %p4704_p10 }
  0x37   : > { %p4707_p2 = pneg %p4706_p0 }
  0x39   : > { %p4712_p5 = pnand %p4710_p4, %p4707_p2 }
  0x3b   : > { %4715 = shalt.err (!%p4712_p5)
}
  0x3c   : > { %s4716_s3 = scalar_lea.vmem %s5141_s28, 512  ;;  %p4724_p8 = scmp.lt.s32.totalorder %s5141_s28, %s5141_s28 }
  0x3d   : > { %p4717_p1 = scmp.ne.s32.totalorder %s5141_s28, %s4716_s3  ;;  %p4725_p12 = scmp.lt.s32.totalorder %s4716_s3, %s4716_s3 }
  0x3f   : > { %p4719_p7 = pnand %p4717_p1, %p5163_p11  ;;  %p4726_p10 = por %p4725_p12, %p4724_p8 }
  0x41   : > { %p4720_p13 = pneg %p4719_p7 }
  0x43   : > { %p4727_p0 = pnand %p4726_p10, %p4720_p13 }
  0x45   : > { %4730 = shalt.err (!%p4727_p0)
}
  0x46   : > { %s4950_s8 = smov 128   ;;  %s4951_s13 = smov 8  }
  0x47   : > { %4195 = dma.hbm_to_vmem [thread:$0]  (!%p5147_p9), %s6925_s2, 512, %s5141_s28, [#allocation10], %s4950_s8, %s4950_s8, %s4951_s13  }
  0x48   : > { %s4731_s3 = scalar_lea.hbm %s6927_s4, 512 }
  0x49   : > { %p4732_p7 = scmp.ne.s32.totalorder %s6927_s4, %s4731_s3  ;;  %p4738_p13 = scmp.lt.u32.totalorder %s4731_s3, %s6927_s4 }
  0x4b   : > { %p4734_p8 = pnand %p4732_p7, %p5163_p11 }
  0x4d   : > { %p4735_p12 = pneg %p4734_p8 }
  0x4f   : > { %p4740_p2 = pnand %p4738_p13, %p4735_p12 }
  0x51   : > { %4743 = shalt.err (!%p4740_p2)
}
  0x52   : > { %s4744_s28 = scalar_lea.vmem %s5151_s11, 512  ;;  %p4752_p10 = scmp.lt.s32.totalorder %s5151_s11, %s5151_s11 }
  0x53   : > { %p4745_p4 = scmp.ne.s32.totalorder %s5151_s11, %s4744_s28  ;;  %p4753_p0 = scmp.lt.s32.totalorder %s4744_s28, %s4744_s28 }
  0x55   : > { %p4747_p5 = pnand %p4745_p4, %p5163_p11  ;;  %p4754_p7 = por %p4753_p0, %p4752_p10 }
  0x57   : > { %p4748_p1 = pneg %p4747_p5 }
  0x59   : > { %p4755_p8 = pnand %p4754_p7, %p4748_p1 }
  0x5b   : > { %4758 = shalt.err (!%p4755_p8)
}
  0x5c   : > { %4198 = dma.hbm_to_vmem [thread:$0]  (!%p5147_p9), %s6927_s4, 512, %s5151_s11, [#allocation10], %s4950_s8, %s4950_s8, %s4951_s13  }
  0x5d   : > { %s4759_s10 = scalar_lea.hbm %s6929_s6, 512 }
  0x5e   : > { %p4760_p12 = scmp.ne.s32.totalorder %s6929_s6, %s4759_s10  ;;  %p4766_p4 = scmp.lt.u32.totalorder %s4759_s10, %s6929_s6 }
  0x60   : > { %p4762_p13 = pnand %p4760_p12, %p5163_p11 }
  0x62   : > { %p4763_p2 = pneg %p4762_p13 }
  0x64   : > { %p4768_p5 = pnand %p4766_p4, %p4763_p2 }
  0x66   : > { %4771 = shalt.err (!%p4768_p5)
}
  0x67   : > { %s4772_s11 = scalar_lea.vmem %s5153_s9, 512  ;;  %p4780_p7 = scmp.lt.s32.totalorder %s5153_s9, %s5153_s9 }
  0x68   : > { %p4773_p1 = scmp.ne.s32.totalorder %s5153_s9, %s4772_s11  ;;  %p4781_p8 = scmp.lt.s32.totalorder %s4772_s11, %s4772_s11 }
  0x6a   : > { %p4775_p10 = pnand %p4773_p1, %p5163_p11  ;;  %p4782_p12 = por %p4781_p8, %p4780_p7 }
  0x6c   : > { %p4776_p0 = pneg %p4775_p10 }
  0x6e   : > { %p4783_p13 = pnand %p4782_p12, %p4776_p0 }
  0x70   : > { %4786 = shalt.err (!%p4783_p13)
}
  0x71   : > { %4201 = dma.hbm_to_vmem [thread:$0]  (!%p5147_p9), %s6929_s6, 512, %s5153_s9, [#allocation13], %s4950_s8, %s4950_s8, %s4951_s13  }
  0x72   : > { %p3771_p2 = scmp.ge.s32.totalorder %s4945_s23, 4 }
  0x74   : > { %358 = sbr.rel (%p3771_p2) target bundleno = 158 (0x9e), region = 48 }
  0x7b   : > { %361 = sbr.rel (!%p5089_p3) target bundleno = 131 (0x83), region = 52  ;;  %s363_s7 = sand.u32 (%p5089_p3), 1, %s4925_s18  }
  0x7c   : > { %s3773_s19 = sshll.u32 (%p5089_p3), %s4941_s22, 3  ;;  %s3772_s25 = sshll.u32 (%p5089_p3), %s363_s7, 5 }
  0x7d   : > { %s367_s26 = sadd.s32 (%p5089_p3), %s4937_s21, %s3773_s19  ;;  %s365_s9 = scalar_lea.vmem (%p5089_p3), [#allocation5], %s3772_s25 }
  0x7e   : > { %s3774_s14 = sshll.u32 (%p5089_p3), %s367_s26, 3 }
  0x7f   : > { %s369_s27 = scalar_lea.vmem (%p5089_p3), %s6923_s0, %s3774_s14 }
  0x80   : > { %v403_v0 = vld [vmem:[%s369_s27] sm:$0xff] (%p5089_p3)  ;;  %v405_v1 = vld [vmem:[%s369_s27 + $0x10] sm:$0xff] (%p5089_p3) }
  0x81   : > { %v407_v2 = vld [vmem:[%s369_s27 + $0x20] sm:$0xff] (%p5089_p3)  ;;  %404 = vst [vmem:[%s365_s9] sm:$0xff] (%p5089_p3), %v403_v0  ;;  %406 = vst [vmem:[%s365_s9 + $0x8] sm:$0xff] (%p5089_p3), %v405_v1  ;;  %v409_v3 = vld [vmem:[%s369_s27 + $0x30] sm:$0xff] (%p5089_p3) }
  0x82   : > { %408 = vst [vmem:[%s365_s9 + $0x10] sm:$0xff] %v407_v2  ;;  %410 = vst [vmem:[%s365_s9 + $0x18] sm:$0xff] %v409_v3 }
  0x83 PF: > { %s417_s30 = sand.u32 1, %s4917_s16   ;;  %s3939_s8 = sshll.u32 %s4941_s22, 10 }
  0x84   : > { %s3775_s13 = sshll.u32 %s417_s30, 6  ;;  %s5253_s11 = scalar_lea.hbm %s6924_s1, %s3939_s8 }
  0x85   : > { %s421_s28 = scalar_lea.vmem [#allocation6], %s3775_s13  ;;  %s5257_s7 = scalar_lea.sflag [#allocation7], %s417_s30 }
  0x86   : > { %s428_s5 = sshll.u32 %s421_s28, 4  ;;  %s4787_s19 = scalar_lea.hbm %s5253_s11, 1024  ;;  %s5255_s5 = int_to_ptr.vmem [resolvable:$true] %s428_s5 }
  0x87   : > { %p4788_p3 = scmp.ne.s32.totalorder %s5253_s11, %s4787_s19  ;;  %p7054_p9 = scmp.ne.s32.totalorder %s7040_s12, 0 }
  0x88   : > { %s4791_s14 = scalar_lea.hbm %s6924_s1, 2048  ;;  %p4792_p5 = scmp.lt.u32.totalorder %s5253_s11, %s6924_s1 }
  0x89   : > { %p4789_p11 = pnand %p4788_p3, %p7054_p9  ;;  %p4793_p1 = scmp.lt.u32.totalorder %s4791_s14, %s4787_s19 }
  0x8a   : > { %p4795_p0 = scmp.lt.u32.totalorder %s4787_s19, %s5253_s11 }
  0x8b   : > { %p4790_p4 = pneg %p4789_p11  ;;  %p4794_p10 = por %p4793_p1, %p4792_p5 }
  0x8d   : > { %p4796_p7 = por %p4795_p0, %p4794_p10 }
  0x8f   : > { %p4797_p8 = pnand %p4796_p7, %p4790_p4 }
  0x91   : > { %4800 = shalt.err (!%p4797_p8)
}
  0x92   : > { %s4801_s27 = scalar_lea.vmem %s5255_s5, 1024  ;;  %s4952_s9 = smov [#allocation6]  }
  0x93   : > { %p4802_p12 = scmp.ne.s32.totalorder %s5255_s5, %s4801_s27  ;;  %s4805_s30 = sshll.u32 %s4952_s9, 4  ;;  %s4806_s30 = int_to_ptr.vmem [resolvable:$false] %s4805_s30 }
  0x94   : > { %s4807_s8 = scalar_lea.vmem %s4806_s30, 2048  ;;  %p4808_p3 = scmp.lt.s32.totalorder %s5255_s5, %s4806_s30 }
  0x95   : > { %p4803_p13 = pnand %p4802_p12, %p7054_p9  ;;  %p4809_p11 = scmp.lt.s32.totalorder %s4807_s8, %s4801_s27 }
  0x97   : > { %p4804_p2 = pneg %p4803_p13  ;;  %p4810_p5 = por %p4809_p11, %p4808_p3 }
  0x99   : > { %p4811_p1 = pnand %p4810_p5, %p4804_p2 }
  0x9b   : > { %4814 = shalt.err (!%p4811_p1)
}
  0x9c   : > { %s4953_s13 = smov 256   ;;  %s4954_s29 = smov 16  }
  0x9d   : > { %4182 = dma.hbm_to_vmem [thread:$0]  (%p7054_p9), %s5253_s11, 1024, %s5255_s5, %s5257_s7, %s4953_s13, %s4953_s13, %s4954_s29  }
  0x9e PF: > { %440 = sbr.rel (%p5137_p6) target bundleno = 2585 (0xa19), region = 94 }
  0xa5   : > { %s7055_s3 = sld [smem:[#allocation25_spill]]  ;;  %s443_s28 = sand.u32 1, %s4921_s17  }
  0xa6   : > { %s449_s19 = sand.u32 1, %s4913_s15   ;;  %s3779_s25 = sshll.u32 %s443_s28, 5 }
  0xa7   : > { %s3780_s26 = sshll.u32 %s449_s19, 6  ;;  %s5287_s14 = scalar_lea.vmem [#allocation5], %s3779_s25 }
  0xa8   : > { %s450_s10 = scalar_lea.sflag [#allocation7], %s449_s19  ;;  %s453_s24 = scalar_lea.vmem [#allocation6], %s3780_s26 }
  0xab   : > { %p7056_p4 = scmp.ne.s32.totalorder %s7055_s3, 0 }
  0xad   : > { %4888 = dma.done.wait (%p7056_p4), %s450_s10, 1024  }
  0xae   : > { %4890 = vsyncadd (%p7056_p4), %s450_s10, 4294966272  ;;  %s7057_s12 = sld [smem:[#allocation24_spill]] }
  0xb4   : > { %p7058_p6 = scmp.ne.s32.totalorder %s7057_s12, 0 }
  0xb6   : > { %4892 = dma.done.wait (%p7058_p6), [#allocation10], 1024  }
  0xb7   : > { %4894 = vsyncadd (%p7058_p6), [#allocation10], 4294966272 }
  0xb8   : > { %4896 = dma.done.wait (%p7058_p6), [#allocation13], 512  }
  0xb9   : > { %4898 = vsyncadd (%p7058_p6), [#allocation13], 4294966784  ;;  %s5301_s20 = scalar_lea.vmem [#allocation14], %s3779_s25  ;;  %s7059_s11 = sld [smem:[#allocation20_spill]] }
  0xbf   : > { %p3785_p9 = scmp.ne.s32.totalorder %s7059_s11, 0 }
  0xc0   : > { %v511_v4 = vld [vmem:[%s453_s24 + $0x8] sm:$0xff] (!%p3785_p9)  ;;  %v513_v5 = vld [vmem:[%s453_s24 + $0x18] sm:$0xff] (!%p3785_p9)  ;;  %v510_v6 = vld [vmem:[%s453_s24] sm:$0xff] (!%p3785_p9)  ;;  %v4955_v11 = vmov (!%p3785_p9), 0.0   ;;  %v4956_v16 = vmov (!%p3785_p9), 0   ;;  %s7060_s27 = sld [smem:[#allocation54_spill]] (!%p3785_p9) }
  0xc1   : > { %509 = sbr.rel (%p3785_p9) target bundleno = 432 (0x1b0), region = 118  ;;  %v3984_v7 = vpack.c.bf16 (!%p3785_p9), %v513_v5, %v511_v4  ;;  %v512_v8 = vld [vmem:[%s453_s24 + $0x10] sm:$0xff] (!%p3785_p9)  ;;  %v515_v9 = vld [vmem:[%s453_s24 + $0x28] sm:$0xff] (!%p3785_p9)  ;;  %v517_v10 = vld [vmem:[%s453_s24 + $0x38] sm:$0xff] (!%p3785_p9)  ;;  %623 = vmatprep.mubr.f32.mxu0 (!%p3785_p9), %v4955_v11  ;;  %761 = vmatprep.mubr.f32.mxu1 (!%p3785_p9), %v4955_v11  ;;  %vm546_vm0 = vcmask (!%p3785_p9), 261120   ;;  %s7061_s26 = sld [smem:[#allocation55_spill]] (!%p3785_p9) }
  0xc2   : > { %v3986_v12 = vpack.c.bf16 (!%p3785_p9), %v512_v8, %v510_v6  ;;  %v3988_v13 = vpack.c.bf16 (!%p3785_p9), %v517_v10, %v515_v9  ;;  %v514_v14 = vld [vmem:[%s453_s24 + $0x20] sm:$0xff] (!%p3785_p9)  ;;  %v516_v15 = vld [vmem:[%s453_s24 + $0x30] sm:$0xff] (!%p3785_p9)  ;;  %4316 = vset.pattern.permute.xlu1 (!%p3785_p9), %v4956_v16  ;;  %4315 = vset.pattern.permute.xlu0 (!%p3785_p9), %v4956_v16  ;;  %v519_v26 = vld [vmem:[#allocation11 + $0x8] sm:$0xff] (!%p3785_p9)  ;;  %vm649_vm1 = vcmask (!%p3785_p9), 523264  }
  0xc3   : > { %3985 = vmatprep.subr.bf16.mxu0 (!%p3785_p9), %v3984_v7  ;;  %3993 = vmatprep.subr.bf16.mxu1 (!%p3785_p9), %v3984_v7  ;;  %v3990_v17 = vpack.c.bf16 (!%p3785_p9), %v516_v15, %v514_v14  ;;  %v518_v22 = vld [vmem:[#allocation11] sm:$0xff] (!%p3785_p9)  ;;  %v658_v27 = vld [vmem:[#allocation12 + $0x8] sm:$0xff] (!%p3785_p9)  ;;  %v520_v30 = vld [vmem:[#allocation11 + $0x10] sm:$0xff] (!%p3785_p9) }
  0xc4   : > { %3987 = vmatpush1.bf16.msra.mxu0 (!%p3785_p9), %v3986_v12  ;;  %3995 = vmatpush1.bf16.msra.mxu1 (!%p3785_p9), %v3986_v12  ;;  %v657_v23 = vld [vmem:[#allocation12] sm:$0xff] (!%p3785_p9)  ;;  %v659_v31 = vld [vmem:[#allocation12 + $0x10] sm:$0xff] (!%p3785_p9)  ;;  %v521_v32 = vld [vmem:[#allocation11 + $0x18] sm:$0xff] (!%p3785_p9) }
  0xc5   : > { %3989 = vmatprep.subr.bf16.mxu0 (!%p3785_p9), %v3988_v13  ;;  %3997 = vmatprep.subr.bf16.mxu1 (!%p3785_p9), %v3988_v13  ;;  %v660_v33 = vld [vmem:[#allocation12 + $0x18] sm:$0xff] (!%p3785_p9) }
  0xc6   : > { %v524_v18 = vld [vmem:[%s7060_s27 + $0x10] sm:$0xff] (!%p3785_p9)  ;;  %v522_v19 = vld [vmem:[%s7060_s27] sm:$0xff] (!%p3785_p9)  ;;  %v525_v20 = vld [vmem:[%s7060_s27 + $0x18] sm:$0xff] (!%p3785_p9) }
  0xc7   : > { %538 = vperm.xlu1 (!%p3785_p9), %4316, %v524_v18   ;;  %528 = vperm.xlu0 (!%p3785_p9), %4315, %v522_v19   ;;  %v523_v21 = vld [vmem:[%s7060_s27 + $0x8] sm:$0xff] (!%p3785_p9)  ;;  %v661_v25 = vld [vmem:[%s7061_s26] sm:$0xff] (!%p3785_p9)  ;;  %v664_v28 = vld [vmem:[%s7061_s26 + $0x18] sm:$0xff] (!%p3785_p9) }
  0xc8   : > { %3991 = vmatpush1.bf16.msra.mxu0 %v3990_v17  ;;  %3999 = vmatpush1.bf16.msra.mxu1 %v3990_v17  ;;  %v662_v24 = vld [vmem:[%s7061_s26 + $0x8] sm:$0xff]  ;;  %v663_v29 = vld [vmem:[%s7061_s26 + $0x10] sm:$0xff] }
  0xcb   : > { %543 = vperm.xlu1 %4316, %v525_v20   ;;  %533 = vperm.xlu0 %4315, %v523_v21  }
  0xcc   : > { %3786 = vmatmul.mubr.msk.f32.vlgmr.msra.gmra.mrb[0].mxu0 %vm546_vm0, %v518_v22  ;;  %3790 = vmatmul.mubr.msk.f32.vlgmr.msra.gmra.mrb[0].mxu1 %vm546_vm0, %v657_v23 }
  0xcd   : > { %629 = vmatprep.mubr.f32.mxu0 %v4955_v11  ;;  %767 = vmatprep.mubr.f32.mxu1 %v4955_v11 }
  0xcf   : > { %672 = vperm.xlu1 %4316, %v662_v24   ;;  %667 = vperm.xlu0 %4315, %v661_v25  }
  0xd0   : > { %3787 = vmatmul.mubr.msk.f32.gmra.mrb[2].mxu0 %vm546_vm0, %v519_v26  ;;  %3791 = vmatmul.mubr.msk.f32.gmra.mrb[2].mxu1 %vm546_vm0, %v658_v27 }
  0xd1   : > { %635 = vmatprep.mubr.f32.mxu0 %v4955_v11  ;;  %773 = vmatprep.mubr.f32.mxu1 %v4955_v11 }
  0xd3   : > { %682 = vperm.xlu1 %4316, %v664_v28   ;;  %677 = vperm.xlu0 %4315, %v663_v29  }
  0xd4   : > { %3788 = vmatmul.mubr.msk.f32.gmra.mrb[4].mxu0 %vm546_vm0, %v520_v30  ;;  %3792 = vmatmul.mubr.msk.f32.gmra.mrb[4].mxu1 %vm546_vm0, %v659_v31 }
  0xd5   : > { %641 = vmatprep.mubr.f32.mxu0 %v4955_v11  ;;  %779 = vmatprep.mubr.f32.mxu1 %v4955_v11 }
  0xd8   : > { %3789 = vmatmul.mubr.msk.f32.gmra.mrb[6].mxu0 %vm546_vm0, %v521_v32  ;;  %3793 = vmatmul.mubr.msk.f32.gmra.mrb[6].mxu1 %vm546_vm0, %v660_v33 }
 0x146   : > { %v529_v34 = vpop.permute.xlu0 %528  ;;  %v539_v35 = vpop.permute.xlu1 %538 }
 0x14a   : > { %v534_v36 = vpop.permute.xlu0 %533  ;;  %v544_v37 = vpop.permute.xlu1 %543 }
 0x14e   : > { %v668_v38 = vpop.permute.xlu0 %667  ;;  %v673_v47 = vpop.permute.xlu1 %672 }
 0x152   : > { %v678_v56 = vpop.permute.xlu0 %677  ;;  %v683_v1 = vpop.permute.xlu1 %682 }
 0x19f   : > { %v625_v39 = vpop.f32.mrb[0].mxu0  ;;  %v763_v40 = vpop.f32.mrb[0].mxu1 }
 0x1a0   : > { %v626_v41 = vadd.f32 %v625_v39, %v529_v34  ;;  %v764_v42 = vadd.f32 %v763_v40, %v668_v38  ;;  %v627_v43 = vpop.f32.mrb[1].mxu0  ;;  %v765_v44 = vpop.f32.mrb[1].mxu1 }
 0x1a1   : > { %v628_v45 = vadd.f32 %v627_v43, %v529_v34  ;;  %v766_v46 = vadd.f32 %v765_v44, %v668_v38 }
 0x1a2   : > { %648 = vst [vmem:[#allocation2] sm:$0xff] %v626_v41  ;;  %786 = vst [vmem:[#allocation3] sm:$0xff] %v764_v42 }
 0x1a3   : > { %650 = vst.msk [vmem:[#allocation2 + $0x8] sm:$0xff] %vm649_vm1, %v628_v45  ;;  %787 = vst.msk [vmem:[#allocation3 + $0x8] sm:$0xff] %vm649_vm1, %v766_v46  ;;  %v631_v48 = vpop.f32.mrb[2].mxu0  ;;  %v769_v49 = vpop.f32.mrb[2].mxu1 }
 0x1a4   : > { %v632_v50 = vadd.f32 %v631_v48, %v534_v36  ;;  %v770_v51 = vadd.f32 %v769_v49, %v673_v47  ;;  %v633_v52 = vpop.f32.mrb[3].mxu0  ;;  %v771_v53 = vpop.f32.mrb[3].mxu1 }
 0x1a5   : > { %v634_v54 = vadd.f32 %v633_v52, %v534_v36  ;;  %v772_v55 = vadd.f32 %v771_v53, %v673_v47 }
 0x1a6   : > { %651 = vst [vmem:[#allocation2 + $0x10] sm:$0xff] %v632_v50  ;;  %788 = vst [vmem:[#allocation3 + $0x10] sm:$0xff] %v770_v51 }
 0x1a7   : > { %652 = vst.msk [vmem:[#allocation2 + $0x18] sm:$0xff] %vm649_vm1, %v634_v54  ;;  %789 = vst.msk [vmem:[#allocation3 + $0x18] sm:$0xff] %vm649_vm1, %v772_v55  ;;  %v637_v57 = vpop.f32.mrb[4].mxu0  ;;  %v775_v58 = vpop.f32.mrb[4].mxu1 }
 0x1a8   : > { %v638_v59 = vadd.f32 %v637_v57, %v539_v35  ;;  %v776_v60 = vadd.f32 %v775_v58, %v678_v56  ;;  %v639_v61 = vpop.f32.mrb[5].mxu0  ;;  %v777_v62 = vpop.f32.mrb[5].mxu1 }
 0x1a9   : > { %v640_v63 = vadd.f32 %v639_v61, %v539_v35  ;;  %v778_v0 = vadd.f32 %v777_v62, %v678_v56 }
 0x1aa   : > { %653 = vst [vmem:[#allocation2 + $0x20] sm:$0xff] %v638_v59  ;;  %790 = vst [vmem:[#allocation3 + $0x20] sm:$0xff] %v776_v60 }
 0x1ab   : > { %654 = vst.msk [vmem:[#allocation2 + $0x28] sm:$0xff] %vm649_vm1, %v640_v63  ;;  %791 = vst.msk [vmem:[#allocation3 + $0x28] sm:$0xff] %vm649_vm1, %v778_v0  ;;  %v643_v2 = vpop.f32.mrb[6].mxu0  ;;  %v781_v3 = vpop.f32.mrb[6].mxu1 }
 0x1ac   : > { %v644_v4 = vadd.f32 %v643_v2, %v544_v37  ;;  %v782_v5 = vadd.f32 %v781_v3, %v683_v1  ;;  %v645_v6 = vpop.f32.mrb[7].mxu0  ;;  %v783_v7 = vpop.f32.mrb[7].mxu1 }
 0x1ad   : > { %v646_v8 = vadd.f32 %v645_v6, %v544_v37  ;;  %v784_v9 = vadd.f32 %v783_v7, %v683_v1 }
 0x1ae   : > { %655 = vst [vmem:[#allocation2 + $0x30] sm:$0xff] %v644_v4  ;;  %792 = vst [vmem:[#allocation3 + $0x30] sm:$0xff] %v782_v5 }
 0x1af   : > { %656 = vst.msk [vmem:[#allocation2 + $0x38] sm:$0xff] %vm649_vm1, %v646_v8  ;;  %793 = vst.msk [vmem:[#allocation3 + $0x38] sm:$0xff] %vm649_vm1, %v784_v9 }
 0x1b0 PF: > { %v798_v10 = vld [vmem:[%s5287_s14] sm:$0xff]  ;;  %v799_v11 = vld [vmem:[%s5287_s14 + $0x8] sm:$0xff]  ;;  %v800_v12 = vld [vmem:[%s5287_s14 + $0x10] sm:$0xff]  ;;  %vm826_vm2 = vcmask 261120   ;;  %v4957_v16 = vmov 0   ;;  %s7062_s8 = sld [smem:[#allocation53_spill]] }
 0x1b1   : > { %v4000_v13 = vpack.c.bf16 %v799_v11, %v798_v10  ;;  %v801_v14 = vld [vmem:[%s5287_s14 + $0x18] sm:$0xff]  ;;  %v794_v15 = vld [vmem:[#allocation9] sm:$0xff]  ;;  %4317 = vset.pattern.permute.xlu0 %v4957_v16  ;;  %v795_v20 = vld [vmem:[#allocation9 + $0x8] sm:$0xff]  ;;  %v6955_v23 = vmov 0.0   ;;  %vm972_vm3 = vcmask 64512   ;;  %vm1182_vm4 = vcmask 523264  }
 0x1b2   : > { %v4004_v17 = vpack.c.bf16 %v801_v14, %v800_v12  ;;  %3964 = vmatprep.mubr.msk.f32.mxu0 %vm826_vm2, %v794_v15  ;;  %v925_v21 = vld [vmem:[#allocation2 + $0x8] sm:$0xff]  ;;  %v924_v22 = vld [vmem:[#allocation2] sm:$0xff]  ;;  %1085 = vmatprep.mubr.f32.mxu1 %v6955_v23  ;;  %v927_v29 = vld [vmem:[#allocation2 + $0x18] sm:$0xff]  ;;  %s7207_s12 = sld [smem:[#allocation57_spill]]  ;;  %s7225_s3 = sld [smem:[#allocation56_spill]] }
 0x1b3   : > { %4001 = vmatprep.subr.bf16.mxu0 %v4000_v13  ;;  %1021 = vmatprep.subr.mxu1 %v925_v21  ;;  %v926_v30 = vld [vmem:[#allocation2 + $0x10] sm:$0xff]  ;;  %v797_v32 = vld [vmem:[#allocation9 + $0x18] sm:$0xff]  ;;  %vm6044_vm5 = vmpackc.low %vm1182_vm4, %vm1182_vm4  ;;  %s7226_s19 = sld [smem:[#allocation21_spill]]  ;;  %s7227_s25 = sld [smem:[#allocation20_spill]] }
 0x1b4   : > { %4003 = vmatpush3.bf16.msra.mxu0 %v4000_v13  ;;  %1022 = vmatpush1.msra.mxu1 %v924_v22  ;;  %v796_v31 = vld [vmem:[#allocation9 + $0x10] sm:$0xff]  ;;  %s7228_s14 = sld [smem:[#allocation28_spill]]  ;;  %s3630_s10 = sshll.u32 %s5301_s20, 4  ;;  %s6856_s10 = int_to_ptr.vmem [resolvable:$true] %s3630_s10 }
 0x1b5   : > { %4005 = vmatprep.subr.bf16.mxu0 %v4004_v17  ;;  %s4815_s9 = scalar_lea.vmem %s6856_s10, 512 }
 0x1b6   : > { %v802_v18 = vld [vmem:[%s7062_s8] sm:$0xff]  ;;  %v803_v19 = vld [vmem:[%s7062_s8 + $0x8] sm:$0xff]  ;;  %p4816_p10 = scmp.ne.s32.totalorder %s6856_s10, %s4815_s9 }
 0x1b7   : > { %808 = vperm.xlu0 %4317, %v802_v18  }
 0x1b8   : > { %4007 = vmatpush3.bf16.msra.mxu0 %v4004_v17 }
 0x1b9   : > { %1657 = vmatprep.subr.mxu0 %v927_v29  ;;  %s3935_s30 = sshll.u32 %s7226_s19, 3  ;;  %s7229_s19 = sld [smem:[#allocation58_spill]] }
 0x1ba   : > { %s3627_s13 = sadd.s32 %s7227_s25, %s3935_s30  ;;  %s6862_s25 = scalar_lea.sflag [#allocation8], %s443_s28 }
 0x1bb   : > { %813 = vperm.xlu0 %4317, %v803_v19   ;;  %3965 = vmatmul.mubr.msk.f32.vlgmr.msra.gmra.mrb[0].mxu0 %vm826_vm2, %v795_v20  ;;  %s3936_s29 = sshll.u32 %s3627_s13, 7  ;;  %p7231_p0 = scmp.ne.s32.totalorder %s7228_s14, 0 }
 0x1bc   : > { %3967 = vmatprep.mubr.msk.f32.mxu0 %vm826_vm2, %v796_v31  ;;  %1658 = vmatpush1.msra.mxu0 %v926_v30  ;;  %s4959_s30 = smov [#allocation14]  }
 0x1bd   : > { %p4817_p7 = pnand %p4816_p10, %p7231_p0  ;;  %s4819_s13 = sshll.u32 %s4959_s30, 4  ;;  %s4820_s13 = int_to_ptr.vmem [resolvable:$false] %s4819_s13 }
 0x1be   : > { %p4822_p12 = scmp.lt.s32.totalorder %s6856_s10, %s4820_s13 }
 0x1bf   : > { %3968 = vmatmul.mubr.msk.f32.gmra.mrb[2].mxu0 %vm826_vm2, %v797_v32  ;;  %s7230_s5 = smov %s7229_s19  ;;  %s6854_s7 = scalar_lea.hbm %s7229_s19, %s3936_s29 }
 0x1c0   : > { %1721 = vmatprep.mubr.f32.mxu0 %v6955_v23  ;;  %p4818_p8 = pneg %p4817_p7  ;;  %s4821_s29 = scalar_lea.vmem %s4820_s13, 1024 }
 0x1c1   : > { %p4823_p13 = scmp.lt.s32.totalorder %s4821_s29, %s4815_s9 }
 0x1c3   : > { %p4824_p2 = por %p4823_p13, %p4822_p12 }
 0x1c5   : > { %p4825_p3 = pnand %p4824_p2, %p4818_p8 }
 0x236   : > { %v809_v25 = vpop.permute.xlu0 %808 }
 0x23a   : > { %v814_v28 = vpop.permute.xlu0 %813 }
 0x28e   : > { %v3966_v24 = vpop.f32.mrb[0].mxu0 }
 0x28f   : > { %v905_v26 = vpop.f32.mrb[1].mxu0  ;;  %v911_v33 = vadd.f32 %v3966_v24, %v814_v28 }
 0x290   : > { %v906_v27 = vadd.f32 %v905_v26, %v809_v25 }
 0x292   : > { %940 = vxpose.xlu1.b32.start.end [1/1] (short) %v906_v27, 128  ;;  %v5422_v2 = vpop.f32.mrb[2].mxu0 }
 0x293   : > { %7063 = vst [vmem:[#allocation30_spill] sm:$0xff] %v5422_v2  ;;  %v5424_v3 = vpop.f32.mrb[3].mxu0 }
 0x294   : > { %7064 = vst [vmem:[#allocation31_spill] sm:$0xff] %v5424_v3 }
 0x2cf   : > { %1577 = vxpose.xlu1.b32.start.end [1/1] (short) %v911_v33, 128 }
 0x2ed   : > { %4318 = vset.pattern.permute.xlu1 %v4957_v16 }
 0x312   : > { %v956_v34 = vpop.trf.xlu1 }
 0x313   : > { %3798 = vmatmul.mubr.msk.f32.vlgmr.msra.gmra.mrb[0].mxu1 %vm972_vm3, %v956_v34 }
 0x314   : > { %1091 = vmatprep.mubr.f32.mxu1 %v6955_v23 }
 0x316   : > { %v957_v35 = vpop.trf.xlu1 }
 0x317   : > { %3799 = vmatmul.mubr.msk.f32.gmra.mrb[2].mxu1 %vm972_vm3, %v957_v35 }
 0x318   : > { %1097 = vmatprep.mubr.f32.mxu1 %v6955_v23 }
 0x31a   : > { %v958_v36 = vpop.trf.xlu1 }
 0x31b   : > { %3800 = vmatmul.mubr.msk.f32.gmra.mrb[4].mxu1 %vm972_vm3, %v958_v36 }
 0x31c   : > { %1103 = vmatprep.mubr.f32.mxu1 %v6955_v23 }
 0x31e   : > { %v959_v37 = vpop.trf.xlu1 }
 0x31f   : > { %3801 = vmatmul.mubr.msk.f32.gmra.mrb[6].mxu1 %vm972_vm3, %v959_v37 }
 0x320   : > { %1109 = vmatprep.mubr.f32.mxu1 %v6955_v23 }
 0x322   : > { %v960_v38 = vpop.trf.xlu1 }
 0x323   : > { %3802 = vmatmul.mubr.msk.f32.gmra.mrb[8].mxu1 %vm972_vm3, %v960_v38 }
 0x324   : > { %1115 = vmatprep.mubr.f32.mxu1 %v6955_v23 }
 0x326   : > { %v961_v39 = vpop.trf.xlu1 }
 0x327   : > { %3803 = vmatmul.mubr.msk.f32.gmra.mrb[10].mxu1 %vm972_vm3, %v961_v39 }
 0x328   : > { %1121 = vmatprep.mubr.f32.mxu1 %v6955_v23 }
 0x32a   : > { %v962_v40 = vpop.trf.xlu1 }
 0x32b   : > { %3804 = vmatmul.mubr.msk.f32.gmra.mrb[12].mxu1 %vm972_vm3, %v962_v40  ;;  %v804_v40 = vld [vmem:[%s7062_s8 + $0x10] sm:$0xff] }
 0x32c   : > { %1127 = vmatprep.mubr.f32.mxu1 %v6955_v23 }
 0x32e   : > { %v963_v41 = vpop.trf.xlu1 }
 0x32f   : > { %3805 = vmatmul.mubr.msk.f32.gmra.mrb[14].mxu1 %vm972_vm3, %v963_v41 }
 0x330   : > { %1133 = vmatprep.mubr.f32.mxu1 %v6955_v23 }
 0x332   : > { %v964_v42 = vpop.trf.xlu1 }
 0x333   : > { %3806 = vmatmul.mubr.msk.f32.gmra.mrb[16].mxu1 %vm972_vm3, %v964_v42 }
 0x334   : > { %1139 = vmatprep.mubr.f32.mxu1 %v6955_v23 }
 0x336   : > { %v965_v43 = vpop.trf.xlu1 }
 0x337   : > { %3807 = vmatmul.mubr.msk.f32.gmra.mrb[18].mxu1 %vm972_vm3, %v965_v43 }
 0x338   : > { %1145 = vmatprep.mubr.f32.mxu1 %v6955_v23 }
 0x33a   : > { %v966_v44 = vpop.trf.xlu1 }
 0x33b   : > { %3808 = vmatmul.mubr.msk.f32.gmra.mrb[20].mxu1 %vm972_vm3, %v966_v44 }
 0x33c   : > { %1151 = vmatprep.mubr.f32.mxu1 %v6955_v23 }
 0x33e   : > { %v967_v45 = vpop.trf.xlu1 }
 0x33f   : > { %3809 = vmatmul.mubr.msk.f32.gmra.mrb[22].mxu1 %vm972_vm3, %v967_v45 }
 0x340   : > { %1157 = vmatprep.mubr.f32.mxu1 %v6955_v23 }
 0x342   : > { %v968_v46 = vpop.trf.xlu1 }
 0x343   : > { %3810 = vmatmul.mubr.msk.f32.gmra.mrb[24].mxu1 %vm972_vm3, %v968_v46 }
 0x344   : > { %1163 = vmatprep.mubr.f32.mxu1 %v6955_v23 }
 0x346   : > { %v969_v47 = vpop.trf.xlu1 }
 0x347   : > { %3811 = vmatmul.mubr.msk.f32.gmra.mrb[26].mxu1 %vm972_vm3, %v969_v47 }
 0x348   : > { %1169 = vmatprep.mubr.f32.mxu1 %v6955_v23 }
 0x34a   : > { %v970_v48 = vpop.trf.xlu1 }
 0x34b   : > { %3812 = vmatmul.mubr.msk.f32.gmra.mrb[28].mxu1 %vm972_vm3, %v970_v48 }
 0x34c   : > { %1175 = vmatprep.mubr.f32.mxu1 %v6955_v23 }
 0x34e   : > { %v971_v49 = vpop.trf.xlu1 }
 0x34f   : > { %3813 = vmatmul.mubr.msk.f32.gmra.mrb[30].mxu1 %vm972_vm3, %v971_v49 }
 0x352   : > { %v1593_v50 = vpop.trf.xlu1 }
 0x353   : > { %3831 = vmatmul.mubr.msk.f32.vlgmr.msra.gmra.mrb[4].mxu0 %vm972_vm3, %v1593_v50 }
 0x354   : > { %1727 = vmatprep.mubr.f32.mxu0 %v6955_v23 }
 0x356   : > { %v1594_v51 = vpop.trf.xlu1 }
 0x357   : > { %3832 = vmatmul.mubr.msk.f32.gmra.mrb[6].mxu0 %vm972_vm3, %v1594_v51 }
 0x358   : > { %1733 = vmatprep.mubr.f32.mxu0 %v6955_v23 }
 0x35a   : > { %v1595_v52 = vpop.trf.xlu1 }
 0x35b   : > { %3833 = vmatmul.mubr.msk.f32.gmra.mrb[8].mxu0 %vm972_vm3, %v1595_v52 }
 0x35c   : > { %1739 = vmatprep.mubr.f32.mxu0 %v6955_v23 }
 0x35e   : > { %v1596_v53 = vpop.trf.xlu1 }
 0x35f   : > { %3834 = vmatmul.mubr.msk.f32.gmra.mrb[10].mxu0 %vm972_vm3, %v1596_v53 }
 0x360   : > { %1745 = vmatprep.mubr.f32.mxu0 %v6955_v23 }
 0x362   : > { %v1597_v54 = vpop.trf.xlu1 }
 0x363   : > { %3835 = vmatmul.mubr.msk.f32.gmra.mrb[12].mxu0 %vm972_vm3, %v1597_v54 }
 0x364   : > { %1751 = vmatprep.mubr.f32.mxu0 %v6955_v23 }
 0x366   : > { %v1598_v55 = vpop.trf.xlu1 }
 0x367   : > { %3836 = vmatmul.mubr.msk.f32.gmra.mrb[14].mxu0 %vm972_vm3, %v1598_v55 }
 0x368   : > { %1757 = vmatprep.mubr.f32.mxu0 %v6955_v23 }
 0x36a   : > { %v1599_v56 = vpop.trf.xlu1 }
 0x36b   : > { %3837 = vmatmul.mubr.msk.f32.gmra.mrb[16].mxu0 %vm972_vm3, %v1599_v56 }
 0x36c   : > { %1763 = vmatprep.mubr.f32.mxu0 %v6955_v23 }
 0x36e   : > { %v1600_v57 = vpop.trf.xlu1 }
 0x36f   : > { %3838 = vmatmul.mubr.msk.f32.gmra.mrb[18].mxu0 %vm972_vm3, %v1600_v57 }
 0x370   : > { %1769 = vmatprep.mubr.f32.mxu0 %v6955_v23 }
 0x372   : > { %v1601_v58 = vpop.trf.xlu1 }
 0x373   : > { %3839 = vmatmul.mubr.msk.f32.gmra.mrb[20].mxu0 %vm972_vm3, %v1601_v58 }
 0x374   : > { %1775 = vmatprep.mubr.f32.mxu0 %v6955_v23 }
 0x376   : > { %v1602_v59 = vpop.trf.xlu1 }
 0x377   : > { %3840 = vmatmul.mubr.msk.f32.gmra.mrb[22].mxu0 %vm972_vm3, %v1602_v59 }
 0x378   : > { %1781 = vmatprep.mubr.f32.mxu0 %v6955_v23 }
 0x37a   : > { %v1603_v60 = vpop.trf.xlu1 }
 0x37b   : > { %3841 = vmatmul.mubr.msk.f32.gmra.mrb[24].mxu0 %vm972_vm3, %v1603_v60 }
 0x37c   : > { %1787 = vmatprep.mubr.f32.mxu0 %v6955_v23 }
 0x37e   : > { %v1604_v61 = vpop.trf.xlu1 }
 0x37f   : > { %3842 = vmatmul.mubr.msk.f32.gmra.mrb[26].mxu0 %vm972_vm3, %v1604_v61 }
 0x380   : > { %1793 = vmatprep.mubr.f32.mxu0 %v6955_v23 }
 0x382   : > { %v1605_v62 = vpop.trf.xlu1 }
 0x383   : > { %3843 = vmatmul.mubr.msk.f32.gmra.mrb[28].mxu0 %vm972_vm3, %v1605_v62 }
 0x384   : > { %1799 = vmatprep.mubr.f32.mxu0 %v6955_v23 }
 0x386   : > { %v1606_v63 = vpop.trf.xlu1 }
 0x387   : > { %3844 = vmatmul.mubr.msk.f32.gmra.mrb[30].mxu0 %vm972_vm3, %v1606_v63 }
 0x388   : > { %1805 = vmatprep.mubr.f32.mxu0 %v6955_v23 }
 0x38a   : > { %v1607_v0 = vpop.trf.xlu1 }
 0x38b   : > { %3845 = vmatmul.mubr.msk.f32.gmra.mrb[32].mxu0 %vm972_vm3, %v1607_v0 }
 0x38c   : > { %1811 = vmatprep.mubr.f32.mxu0 %v6955_v23 }
 0x38e   : > { %v1608_v1 = vpop.trf.xlu1 }
 0x38f   : > { %3846 = vmatmul.mubr.msk.f32.gmra.mrb[34].mxu0 %vm972_vm3, %v1608_v1 }
 0x3e6   : > { %v5426_v4 = vpop.f32.mrb[0].mxu1 }
 0x3e7   : > { %v5428_v5 = vpop.f32.mrb[1].mxu1 }
 0x3e8   : > { %v5432_v6 = vsel %vm1182_vm4, %v5428_v5, -inf }
 0x3e9   : > { %v1184_v7 = vmax.f32 %v5426_v4, %v5432_v6 }
 0x3ea   : > { %v5436_v8 = vpop.f32.mrb[2].mxu1 }
 0x3eb   : > { %v5438_v9 = vpop.f32.mrb[3].mxu1 }
 0x3ec   : > { %v5442_v10 = vsel %vm1182_vm4, %v5438_v9, -inf }
 0x3ed   : > { %v7074_v6 = vmax.f32 %v5436_v8, %v5442_v10 }
 0x3ee   : > { %v5446_v12 = vpop.f32.mrb[4].mxu1 }
 0x3ef   : > { %v5448_v13 = vpop.f32.mrb[5].mxu1 }
 0x3f0   : > { %v5452_v14 = vsel %vm1182_vm4, %v5448_v13, -inf }
 0x3f1   : > { %v7075_v10 = vmax.f32 %v5446_v12, %v5452_v14 }
 0x3f2   : > { %v5456_v16 = vpop.f32.mrb[6].mxu1 }
 0x3f3   : > { %v5458_v17 = vpop.f32.mrb[7].mxu1 }
 0x3f4   : > { %v5462_v18 = vsel %vm1182_vm4, %v5458_v17, -inf }
 0x3f5   : > { %v7078_v14 = vmax.f32 %v5456_v16, %v5462_v18 }
 0x3f6   : > { %v5466_v20 = vpop.f32.mrb[8].mxu1 }
 0x3f7   : > { %v5468_v21 = vpop.f32.mrb[9].mxu1 }
 0x3f8   : > { %v1199_v22 = vsel %vm1182_vm4, %v5468_v21, -inf }
 0x3f9   : > { %v1200_v24 = vmax.f32 %v5466_v20, %v1199_v22 }
 0x3fa   : > { %v5473_v25 = vpop.f32.mrb[10].mxu1 }
 0x3fb   : > { %1201 = vmax.xlane.f32.xlu1 %v1200_v24  ;;  %v5475_v26 = vpop.f32.mrb[11].mxu1 }
 0x3fc   : > { %v5479_v27 = vsel %vm1182_vm4, %v5475_v26, -inf }
 0x3fe   : > { %v5483_v29 = vpop.f32.mrb[12].mxu1 }
 0x3ff   : > { %v5485_v30 = vpop.f32.mrb[13].mxu1 }
 0x400   : > { %v5489_v31 = vsel %vm1182_vm4, %v5485_v30, -inf }
 0x402   : > { %v5493_v33 = vpop.f32.mrb[14].mxu1 }
 0x403   : > { %v5495_v34 = vpop.f32.mrb[15].mxu1 }
 0x404   : > { %7065 = vst [vmem:[#allocation32_spill] sm:$0xff] %v5495_v34  ;;  %v5499_v35 = vsel %vm1182_vm4, %v5495_v34, -inf }
 0x406   : > { %v5503_v37 = vpop.f32.mrb[16].mxu1 }
 0x407   : > { %v5505_v38 = vpop.f32.mrb[17].mxu1 }
 0x408   : > { %7066 = vst [vmem:[#allocation33_spill] sm:$0xff] %v5505_v38  ;;  %v5509_v39 = vsel %vm1182_vm4, %v5505_v38, -inf }
 0x40a   : > { %v5516_v42 = vpop.f32.mrb[18].mxu1 }
 0x40b   : > { %v5518_v43 = vpop.f32.mrb[19].mxu1 }
 0x40c   : > { %7067 = vst [vmem:[#allocation34_spill] sm:$0xff] %v5518_v43  ;;  %v5522_v44 = vsel %vm1182_vm4, %v5518_v43, -inf  ;;  %818 = vperm.xlu1 %4318, %v804_v40  }
 0x40e   : > { %v5526_v46 = vpop.f32.mrb[20].mxu1 }
 0x40f   : > { %v5528_v47 = vpop.f32.mrb[21].mxu1 }
 0x410   : > { %7068 = vst [vmem:[#allocation35_spill] sm:$0xff] %v5528_v47  ;;  %v5532_v48 = vsel %vm1182_vm4, %v5528_v47, -inf }
 0x412   : > { %v5536_v50 = vpop.f32.mrb[22].mxu1 }
 0x413   : > { %v5538_v51 = vpop.f32.mrb[23].mxu1 }
 0x414   : > { %7069 = vst [vmem:[#allocation36_spill] sm:$0xff] %v5538_v51  ;;  %v5542_v52 = vsel %vm1182_vm4, %v5538_v51, -inf }
 0x416   : > { %v5546_v54 = vpop.f32.mrb[24].mxu1 }
 0x417   : > { %v5548_v55 = vpop.f32.mrb[25].mxu1 }
 0x418   : > { %7070 = vst [vmem:[#allocation37_spill] sm:$0xff] %v5548_v55  ;;  %v5552_v56 = vsel %vm1182_vm4, %v5548_v55, -inf }
 0x41a   : > { %v5556_v58 = vpop.f32.mrb[26].mxu1 }
 0x41b   : > { %v5558_v59 = vpop.f32.mrb[27].mxu1 }
 0x41c   : > { %7071 = vst [vmem:[#allocation38_spill] sm:$0xff] %v5558_v59  ;;  %v5562_v60 = vsel %vm1182_vm4, %v5558_v59, -inf }
 0x41e   : > { %v5566_v62 = vpop.f32.mrb[28].mxu1 }
 0x41f   : > { %v5568_v63 = vpop.f32.mrb[29].mxu1 }
 0x420   : > { %7072 = vst [vmem:[#allocation39_spill] sm:$0xff] %v5568_v63  ;;  %v5572_v0 = vsel %vm1182_vm4, %v5568_v63, -inf }
 0x422   : > { %v5576_v22 = vpop.f32.mrb[30].mxu1 }
 0x423   : > { %v5578_v24 = vpop.f32.mrb[31].mxu1 }
 0x424   : > { %7073 = vst [vmem:[#allocation40_spill] sm:$0xff] %v5578_v24  ;;  %v5582_v40 = vsel %vm1182_vm4, %v5578_v24, -inf }
 0x426   : > { %v5586_v61 = vpop.f32.mrb[4].mxu0 }
 0x427   : > { %v5588_v57 = vpop.f32.mrb[5].mxu0 }
 0x428   : > { %v1818_v53 = vsel %vm1182_vm4, %v5588_v57, -inf }
 0x429   : > { %v1819_v1 = vmax.f32 %v5586_v61, %v1818_v53 }
 0x42a   : > { %v5593_v49 = vpop.f32.mrb[6].mxu0 }
 0x42b   : > { %1820 = vmax.xlane.f32.xlu0 %v1819_v1  ;;  %v5595_v45 = vpop.f32.mrb[7].mxu0 }
 0x42c   : > { %v1822_v41 = vsel %vm1182_vm4, %v5595_v45, -inf }
 0x42d   : > { %v1823_v36 = vmax.f32 %v5593_v49, %v1822_v41 }
 0x42e   : > { %v5600_v23 = vpop.f32.mrb[8].mxu0 }
 0x42f   : > { %1185 = vmax.xlane.f32.xlu0 %v1184_v7  ;;  %v5605_v32 = vpop.f32.mrb[9].mxu0 }
 0x430   : > { %v1826_v53 = vsel %vm1182_vm4, %v5605_v32, -inf }
 0x431   : > { %v1827_v1 = vmax.f32 %v5600_v23, %v1826_v53 }
 0x432   : > { %v5610_v28 = vpop.f32.mrb[10].mxu0 }
 0x433   : > { %1824 = vmax.xlane.f32.xlu0 %v1823_v36  ;;  %v5612_v19 = vpop.f32.mrb[11].mxu0 }
 0x434   : > { %v1830_v41 = vsel %vm1182_vm4, %v5612_v19, -inf }
 0x435   : > { %v1831_v15 = vmax.f32 %v5610_v28, %v1830_v41 }
 0x436   : > { %v5617_v11 = vpop.f32.mrb[12].mxu0 }
 0x437   : > { %1189 = vmax.xlane.f32.xlu0 %v7074_v6  ;;  %v5622_v7 = vpop.f32.mrb[13].mxu0 }
 0x438   : > { %v1834_v53 = vsel %vm1182_vm4, %v5622_v7, -inf }
 0x439   : > { %v1835_v36 = vmax.f32 %v5617_v11, %v1834_v53 }
 0x43a   : > { %v5627_v2 = vpop.f32.mrb[14].mxu0 }
 0x43b   : > { %1828 = vmax.xlane.f32.xlu0 %v1827_v1  ;;  %v5629_v3 = vpop.f32.mrb[15].mxu0 }
 0x43c   : > { %v1838_v41 = vsel %vm1182_vm4, %v5629_v3, -inf }
 0x43d   : > { %v1839_v24 = vmax.f32 %v5627_v2, %v1838_v41 }
 0x43e   : > { %v5634_v63 = vpop.f32.mrb[16].mxu0 }
 0x43f   : > { %1193 = vmax.xlane.f32.xlu0 %v7075_v10  ;;  %v5639_v6 = vpop.f32.mrb[17].mxu0 }
 0x440   : > { %v1842_v53 = vsel %vm1182_vm4, %v5639_v6, -inf }
 0x441   : > { %v1843_v1 = vmax.f32 %v5634_v63, %v1842_v53 }
 0x442   : > { %v5644_v59 = vpop.f32.mrb[18].mxu0 }
 0x443   : > { %1832 = vmax.xlane.f32.xlu0 %v1831_v15  ;;  %v5646_v55 = vpop.f32.mrb[19].mxu0 }
 0x444   : > { %7076 = vst [vmem:[#allocation41_spill] sm:$0xff] %v5646_v55  ;;  %v1846_v41 = vsel %vm1182_vm4, %v5646_v55, -inf }
 0x445   : > { %v1847_v51 = vmax.f32 %v5644_v59, %v1846_v41 }
 0x446   : > { %v5651_v47 = vpop.f32.mrb[20].mxu0 }
 0x447   : > { %7077 = vst [vmem:[#allocation42_spill] sm:$0xff] %v5651_v47  ;;  %1197 = vmax.xlane.f32.xlu0 %v7078_v14  ;;  %v5656_v10 = vpop.f32.mrb[21].mxu0 }
 0x448   : > { %7079 = vst [vmem:[#allocation43_spill] sm:$0xff] %v5656_v10  ;;  %v1850_v53 = vsel %vm1182_vm4, %v5656_v10, -inf }
 0x449   : > { %v1851_v15 = vmax.f32 %v5651_v47, %v1850_v53 }
 0x44a   : > { %v5661_v43 = vpop.f32.mrb[22].mxu0 }
 0x44b   : > { %7080 = vst [vmem:[#allocation44_spill] sm:$0xff] %v5661_v43  ;;  %1836 = vmax.xlane.f32.xlu0 %v1835_v36  ;;  %v5663_v38 = vpop.f32.mrb[23].mxu0  ;;  %v7085_v36 = vmax.f32 %v5473_v25, %v5479_v27  ;;  %v7089_v27 = vmax.f32 %v5483_v29, %v5489_v31  ;;  %v7091_v31 = vmax.f32 %v5493_v33, %v5499_v35 }
 0x44c   : > { %7081 = vst [vmem:[#allocation45_spill] sm:$0xff] %v5663_v38  ;;  %v1854_v41 = vsel %vm1182_vm4, %v5663_v38, -inf  ;;  %v7094_v35 = vmax.f32 %v5526_v46, %v5532_v48  ;;  %v7099_v48 = vmax.f32 %v5576_v22, %v5582_v40 }
 0x44d   : > { %v1855_v34 = vmax.f32 %v5661_v43, %v1854_v41 }
 0x44e   : > { %v5668_v55 = vpop.f32.mrb[24].mxu0 }
 0x44f   : > { %7082 = vst [vmem:[#allocation46_spill] sm:$0xff] %v5668_v55  ;;  %1840 = vmax.xlane.f32.xlu0 %v1839_v24  ;;  %v5670_v18 = vpop.f32.mrb[25].mxu0 }
 0x450   : > { %7083 = vst [vmem:[#allocation47_spill] sm:$0xff] %v5670_v18  ;;  %v1858_v14 = vsel %vm1182_vm4, %v5670_v18, -inf }
 0x451   : > { %v1859_v53 = vmax.f32 %v5668_v55, %v1858_v14 }
 0x452   : > { %v5675_v10 = vpop.f32.mrb[26].mxu0 }
 0x453   : > { %7084 = vst [vmem:[#allocation48_spill] sm:$0xff] %v5675_v10  ;;  %1205 = vmax.xlane.f32.xlu0 %v7085_v36  ;;  %v5680_v47 = vpop.f32.mrb[27].mxu0 }
 0x454   : > { %7086 = vst [vmem:[#allocation49_spill] sm:$0xff] %v5680_v47  ;;  %v1862_v41 = vsel %vm1182_vm4, %v5680_v47, -inf }
 0x455   : > { %v1863_v24 = vmax.f32 %v5675_v10, %v1862_v41 }
 0x456   : > { %v5685_v38 = vpop.f32.mrb[28].mxu0 }
 0x457   : > { %7087 = vst [vmem:[#allocation50_spill] sm:$0xff] %v5685_v38  ;;  %1844 = vmax.xlane.f32.xlu0 %v1843_v1  ;;  %v5687_v43 = vpop.f32.mrb[29].mxu0 }
 0x458   : > { %7088 = vst [vmem:[#allocation51_spill] sm:$0xff] %v5687_v43  ;;  %v1866_v14 = vsel %vm1182_vm4, %v5687_v43, -inf }
 0x459   : > { %v1867_v18 = vmax.f32 %v5685_v38, %v1866_v14 }
 0x45a   : > { %v5692_v55 = vpop.f32.mrb[30].mxu0 }
 0x45b   : > { %1209 = vmax.xlane.f32.xlu0 %v7089_v27  ;;  %v5697_v36 = vpop.f32.mrb[31].mxu0 }
 0x45c   : > { %7090 = vst [vmem:[#allocation52_spill] sm:$0xff] %v5697_v36  ;;  %v1870_v41 = vsel %vm1182_vm4, %v5697_v36, -inf  ;;  %v7092_v36 = vmax.f32 %v5503_v37, %v5509_v39  ;;  %v7096_v39 = vmax.f32 %v5546_v54, %v5552_v56 }
 0x45d   : > { %v1871_v1 = vmax.f32 %v5692_v55, %v1870_v41 }
 0x45e   : > { %v5702_v47 = vpop.f32.mrb[32].mxu0 }
 0x45f   : > { %1848 = vmax.xlane.f32.xlu0 %v1847_v51  ;;  %v5704_v10 = vpop.f32.mrb[33].mxu0 }
 0x460   : > { %v1874_v14 = vsel %vm1182_vm4, %v5704_v10, -inf }
 0x461   : > { %v1875_v43 = vmax.f32 %v5702_v47, %v1874_v14  ;;  %v7093_v14 = vmax.f32 %v5516_v42, %v5522_v44  ;;  %v7098_v44 = vmax.f32 %v5566_v62, %v5572_v0 }
 0x462   : > { %v5709_v38 = vpop.f32.mrb[34].mxu0 }
 0x463   : > { %1213 = vmax.xlane.f32.xlu0 %v7091_v31  ;;  %v5714_v27 = vpop.f32.mrb[35].mxu0  ;;  %v7095_v31 = vmax.f32 %v5536_v50, %v5542_v52  ;;  %v805_v52 = vld [vmem:[%s7062_s8 + $0x18] sm:$0xff] }
 0x464   : > { %v1878_v41 = vsel %vm1182_vm4, %v5714_v27, -inf }
 0x465   : > { %v1879_v51 = vmax.f32 %v5709_v38, %v1878_v41 }
 0x467   : > { %1852 = vmax.xlane.f32.xlu0 %v1851_v15 }
 0x46b   : > { %1217 = vmax.xlane.f32.xlu0 %v7092_v36 }
 0x46f   : > { %1856 = vmax.xlane.f32.xlu0 %v1855_v34  ;;  %v7097_v34 = vmax.f32 %v5556_v58, %v5562_v60 }
 0x473   : > { %1221 = vmax.xlane.f32.xlu0 %v7093_v14 }
 0x477   : > { %1860 = vmax.xlane.f32.xlu0 %v1859_v53 }
 0x47b   : > { %1225 = vmax.xlane.f32.xlu0 %v7094_v35 }
 0x47f   : > { %1864 = vmax.xlane.f32.xlu0 %v1863_v24 }
 0x483   : > { %1229 = vmax.xlane.f32.xlu0 %v7095_v31 }
 0x487   : > { %1868 = vmax.xlane.f32.xlu0 %v1867_v18 }
 0x48b   : > { %1233 = vmax.xlane.f32.xlu0 %v7096_v39 }
 0x48f   : > { %1872 = vmax.xlane.f32.xlu0 %v1871_v1 }
 0x493   : > { %1237 = vmax.xlane.f32.xlu0 %v7097_v34 }
 0x497   : > { %1876 = vmax.xlane.f32.xlu0 %v1875_v43 }
 0x49b   : > { %1241 = vmax.xlane.f32.xlu0 %v7098_v44 }
 0x49f   : > { %1880 = vmax.xlane.f32.xlu0 %v1879_v51 }
 0x4a3   : > { %1245 = vmax.xlane.f32.xlu0 %v7099_v48 }
 0x4b8   : > { %v1821_v56 = vpop.xlane.xlu0 %1820 }
 0x4b9   : > { %v1882_v15 = vsub.f32 %v5586_v61, %v1821_v56  ;;  %v1883_v60 = vsub.f32 %v5588_v57, %v1821_v56  ;;  %823 = vperm.xlu0 %4317, %v805_v52  }
 0x4bb   : > { %v1914_v43 = vmul.f32 1.442695, %v1882_v15  ;;  %v1916_v18 = vmul.f32 1.442695, %v1883_v60 }
 0x4bc   : > { %v1186_v53 = vpop.xlane.xlu0 %1185 }
 0x4bd   : > { %4319 = vpow2.f32 %v1914_v43  ;;  %v1248_v0 = vsub.f32 %v5428_v5, %v1186_v53  ;;  %v1247_v40 = vsub.f32 %v5426_v4, %v1186_v53  ;;  %v1202_v53 = vpop.xlane.xlu1 %1201 }
 0x4be   : > { %4321 = vpow2.f32 %v1916_v18 }
 0x4bf   : > { %v1281_v36 = vmul.f32 1.442695, %v1248_v0  ;;  %v1279_v61 = vmul.f32 1.442695, %v1247_v40 }
 0x4c0   : > { %v1825_v24 = vpop.xlane.xlu0 %1824 }
 0x4c1   : > { %v1885_v1 = vsub.f32 %v5595_v45, %v1825_v24  ;;  %v1884_v41 = vsub.f32 %v5593_v49, %v1825_v24  ;;  %4323 = vpow2.f32 %v1281_v36 }
 0x4c2   : > { %4325 = vpow2.f32 %v1279_v61 }
 0x4c3   : > { %v1920_v14 = vmul.f32 1.442695, %v1885_v1  ;;  %v1918_v31 = vmul.f32 1.442695, %v1884_v41  ;;  %v1256_v41 = vsub.f32 %v5468_v21, %v1202_v53 }
 0x4c4   : > { %v1190_v51 = vpop.xlane.xlu0 %1189 }
 0x4c5   : > { %v1250_v57 = vsub.f32 %v5438_v9, %v1190_v51  ;;  %v1249_v5 = vsub.f32 %v5436_v8, %v1190_v51  ;;  %4327 = vpow2.f32 %v1920_v14 }
 0x4c6   : > { %4329 = vpow2.f32 %v1918_v31 }
 0x4c7   : > { %v5753_v35 = vpop.eup %4319  ;;  %v1285_v34 = vmul.f32 1.442695, %v1250_v57  ;;  %v1283_v56 = vmul.f32 1.442695, %v1249_v5 }
 0x4c8   : > { %v5755_v39 = vpop.eup %4321  ;;  %v1829_v4 = vpop.xlane.xlu0 %1828 }
 0x4c9   : > { %v1886_v45 = vsub.f32 %v5600_v23, %v1829_v4  ;;  %v1887_v49 = vsub.f32 %v5605_v32, %v1829_v4  ;;  %v1978_v44 = vsel %vm1182_vm4, %v5755_v39, 0.0  ;;  %4331 = vpow2.f32 %v1285_v34 }
 0x4ca   : > { %v1979_v9 = vadd.f32 %v5753_v35, %v1978_v44 }
 0x4cb   : > { %v1922_v48 = vmul.f32 1.442695, %v1886_v45  ;;  %v1924_v52 = vmul.f32 1.442695, %v1887_v49  ;;  %v5765_v43 = vpop.eup %4323  ;;  %v1255_v45 = vsub.f32 %v5466_v20, %v1202_v53  ;;  %v1297_v49 = vmul.f32 1.442695, %v1256_v41 }
 0x4cc   : > { %1980 = vadd.xlane.f32.xlu1 %v1979_v9  ;;  %v1194_v8 = vpop.xlane.xlu0 %1193  ;;  %v5769_v40 = vpop.eup %4325 }
 0x4cd   : > { %4333 = vpow2.f32 %v1922_v48  ;;  %v1251_v15 = vsub.f32 %v5446_v12, %v1194_v8  ;;  %v1252_v23 = vsub.f32 %v5448_v13, %v1194_v8  ;;  %v1343_v13 = vsel %vm1182_vm4, %v5765_v43, 0.0 }
 0x4ce   : > { %4335 = vpow2.f32 %v1924_v52  ;;  %v1344_v14 = vadd.f32 %v5769_v40, %v1343_v13 }
 0x4cf   : > { %v1287_v32 = vmul.f32 1.442695, %v1251_v15  ;;  %v1289_v60 = vmul.f32 1.442695, %v1252_v23  ;;  %4337 = vpow2.f32 %v1283_v56  ;;  %v5773_v1 = vpop.eup %4327 }
 0x4d0   : > { %v1833_v18 = vpop.xlane.xlu0 %1832  ;;  %v5776_v61 = vpop.eup %4329  ;;  %v1982_v21 = vsel %vm1182_vm4, %v5773_v1, 0.0 }
 0x4d1   : > { %4339 = vpow2.f32 %v1287_v32  ;;  %v1888_v0 = vsub.f32 %v5610_v28, %v1833_v18  ;;  %v1889_v24 = vsub.f32 %v5612_v19, %v1833_v18  ;;  %v1983_v56 = vadd.f32 %v5776_v61, %v1982_v21 }
 0x4d2   : > { %4341 = vpow2.f32 %v1289_v60 }
 0x4d3   : > { %v1926_v36 = vmul.f32 1.442695, %v1888_v0  ;;  %v1928_v12 = vmul.f32 1.442695, %v1889_v24  ;;  %v5780_v57 = vpop.eup %4331 }
 0x4d4   : > { %v1198_v51 = vpop.xlane.xlu0 %1197  ;;  %v1347_v23 = vsel %vm1182_vm4, %v5780_v57, 0.0 }
 0x4d5   : > { %4343 = vpow2.f32 %v1926_v36  ;;  %v1253_v28 = vsub.f32 %v5456_v16, %v1198_v51  ;;  %v1254_v19 = vsub.f32 %v5458_v17, %v1198_v51 }
 0x4d6   : > { %4345 = vpow2.f32 %v1928_v12 }
 0x4d7   : > { %v5783_v31 = vpop.eup %4333  ;;  %v1291_v5 = vmul.f32 1.442695, %v1253_v28  ;;  %v1293_v34 = vmul.f32 1.442695, %v1254_v19 }
 0x4d8   : > { %v5787_v4 = vpop.eup %4335  ;;  %v1837_v16 = vpop.xlane.xlu0 %1836  ;;  %1345 = vadd.xlane.f32.xlu0 %v1344_v14 }
 0x4d9   : > { %4347 = vpow2.f32 %v1291_v5  ;;  %v1890_v17 = vsub.f32 %v5617_v11, %v1837_v16  ;;  %v1891_v44 = vsub.f32 %v5622_v7, %v1837_v16  ;;  %v1986_v9 = vsel %vm1182_vm4, %v5787_v4, 0.0  ;;  %v5794_v48 = vpop.eup %4337 }
 0x4da   : > { %4349 = vpow2.f32 %v1293_v34  ;;  %v1987_v52 = vadd.f32 %v5783_v31, %v1986_v9  ;;  %v1295_v7 = vmul.f32 1.442695, %v1255_v45  ;;  %v1348_v24 = vadd.f32 %v5794_v48, %v1347_v23 }
 0x4db   : > { %v5798_v8 = vpop.eup %4339  ;;  %v1930_v20 = vmul.f32 1.442695, %v1890_v17  ;;  %v1932_v15 = vmul.f32 1.442695, %v1891_v44  ;;  %4351 = vpow2.f32 %v1297_v49 }
 0x4dc   : > { %v5802_v11 = vpop.eup %4341  ;;  %1988 = vadd.xlane.f32.xlu1 %v1987_v52  ;;  %v1841_v32 = vpop.xlane.xlu0 %1840  ;;  %1984 = vadd.xlane.f32.xlu0 %v1983_v56 }
 0x4dd   : > { %4353 = vpow2.f32 %v1930_v20  ;;  %v1892_v60 = vsub.f32 %v5627_v2, %v1841_v32  ;;  %v1893_v18 = vsub.f32 %v5629_v3, %v1841_v32  ;;  %v1351_v53 = vsel %vm1182_vm4, %v5802_v11, 0.0 }
 0x4de   : > { %4355 = vpow2.f32 %v1932_v15  ;;  %v1352_v0 = vadd.f32 %v5798_v8, %v1351_v53 }
 0x4df   : > { %v5810_v36 = vpop.eup %4343  ;;  %v1934_v12 = vmul.f32 1.442695, %v1892_v60  ;;  %v1936_v13 = vmul.f32 1.442695, %v1893_v18  ;;  %4357 = vpow2.f32 %v1295_v7 }
 0x4e0   : > { %v5812_v41 = vpop.eup %4345  ;;  %1353 = vadd.xlane.f32.xlu1 %v1352_v0  ;;  %v1206_v51 = vpop.xlane.xlu0 %1205  ;;  %1349 = vadd.xlane.f32.xlu0 %v1348_v24  ;;  %v7100_v24 = vld [vmem:[#allocation41_spill] sm:$0xff] }
 0x4e1   : > { %4359 = vpow2.f32 %v1934_v12  ;;  %v1257_v2 = vsub.f32 %v5473_v25, %v1206_v51  ;;  %v1258_v3 = vsub.f32 %v5475_v26, %v1206_v51  ;;  %v1990_v28 = vsel %vm1182_vm4, %v5812_v41, 0.0 }
 0x4e2   : > { %4361 = vpow2.f32 %v1936_v13  ;;  %v1991_v19 = vadd.f32 %v5810_v36, %v1990_v28 }
 0x4e3   : > { %v5819_v14 = vpop.eup %4347  ;;  %v1299_v5 = vmul.f32 1.442695, %v1257_v2  ;;  %v1301_v34 = vmul.f32 1.442695, %v1258_v3 }
 0x4e4   : > { %v5821_v21 = vpop.eup %4349  ;;  %v1845_v45 = vpop.xlane.xlu0 %1844  ;;  %1992 = vadd.xlane.f32.xlu0 %v1991_v19 }
 0x4e5   : > { %4363 = vpow2.f32 %v1299_v5  ;;  %v1894_v49 = vsub.f32 %v5634_v63, %v1845_v45  ;;  %v1895_v25 = vsub.f32 %v5639_v6, %v1845_v45  ;;  %v1355_v26 = vsel %vm1182_vm4, %v5821_v21, 0.0  ;;  %v5827_v16 = vpop.eup %4351  ;;  %v7101_v45 = vld [vmem:[#allocation32_spill] sm:$0xff] }
 0x4e6   : > { %4365 = vpow2.f32 %v1301_v34  ;;  %v1356_v17 = vadd.f32 %v5819_v14, %v1355_v26  ;;  %v1359_v53 = vsel %vm1182_vm4, %v5827_v16, 0.0 }
 0x4e7   : > { %v5830_v44 = vpop.eup %4353  ;;  %v1938_v9 = vmul.f32 1.442695, %v1894_v49  ;;  %v1940_v52 = vmul.f32 1.442695, %v1895_v25 }
 0x4e8   : > { %v5832_v56 = vpop.eup %4355  ;;  %v1210_v20 = vpop.xlane.xlu0 %1209  ;;  %1357 = vadd.xlane.f32.xlu0 %v1356_v17 }
 0x4e9   : > { %4367 = vpow2.f32 %v1938_v9  ;;  %v1259_v63 = vsub.f32 %v5483_v29, %v1210_v20  ;;  %v1260_v6 = vsub.f32 %v5485_v30, %v1210_v20  ;;  %v1994_v15 = vsel %vm1182_vm4, %v5832_v56, 0.0  ;;  %v5838_v23 = vpop.eup %4357 }
 0x4ea   : > { %4369 = vpow2.f32 %v1940_v52  ;;  %v1995_v7 = vadd.f32 %v5830_v44, %v1994_v15  ;;  %v1360_v2 = vadd.f32 %v5838_v23, %v1359_v53 }
 0x4eb   : > { %v5841_v32 = vpop.eup %4359  ;;  %v1303_v60 = vmul.f32 1.442695, %v1259_v63  ;;  %v1305_v18 = vmul.f32 1.442695, %v1260_v6  ;;  %v7102_v6 = vld [vmem:[#allocation42_spill] sm:$0xff] }
 0x4ec   : > { %v5845_v0 = vpop.eup %4361  ;;  %1996 = vadd.xlane.f32.xlu1 %v1995_v7  ;;  %v1849_v29 = vpop.xlane.xlu0 %1848 }
 0x4ed   : > { %4371 = vpow2.f32 %v1303_v60  ;;  %v1896_v30 = vsub.f32 %v5644_v59, %v1849_v29  ;;  %v1897_v12 = vsub.f32 %v7100_v24, %v1849_v29  ;;  %v1998_v13 = vsel %vm1182_vm4, %v5845_v0, 0.0 }
 0x4ee   : > { %4373 = vpow2.f32 %v1305_v18  ;;  %v1999_v51 = vadd.f32 %v5841_v32, %v1998_v13 }
 0x4ef   : > { %v5853_v3 = vpop.eup %4363  ;;  %v1942_v28 = vmul.f32 1.442695, %v1896_v30  ;;  %v1944_v19 = vmul.f32 1.442695, %v1897_v12 }
 0x4f0   : > { %v5855_v5 = vpop.eup %4365  ;;  %2000 = vadd.xlane.f32.xlu0 %v1999_v51  ;;  %1361 = vadd.xlane.f32.xlu1 %v1360_v2  ;;  %v1214_v34 = vpop.xlane.xlu0 %1213  ;;  %v7104_v51 = vld [vmem:[#allocation33_spill] sm:$0xff] }
 0x4f1   : > { %4375 = vpow2.f32 %v1942_v28  ;;  %v1261_v59 = vsub.f32 %v5493_v33, %v1214_v34  ;;  %v1262_v49 = vsub.f32 %v7101_v45, %v1214_v34  ;;  %v1363_v25 = vsel %vm1182_vm4, %v5855_v5, 0.0  ;;  %v7103_v33 = vld [vmem:[#allocation43_spill] sm:$0xff] }
 0x4f2   : > { %4377 = vpow2.f32 %v1944_v19  ;;  %v1364_v26 = vadd.f32 %v5853_v3, %v1363_v25 }
 0x4f3   : > { %v5862_v17 = vpop.eup %4367  ;;  %v1307_v9 = vmul.f32 1.442695, %v1261_v59  ;;  %v1309_v52 = vmul.f32 1.442695, %v1262_v49 }
 0x4f4   : > { %v5864_v20 = vpop.eup %4369  ;;  %1365 = vadd.xlane.f32.xlu0 %v1364_v26  ;;  %v1853_v63 = vpop.xlane.xlu0 %1852  ;;  %v7105_v26 = vld [vmem:[#allocation44_spill] sm:$0xff] }
 0x4f5   : > { %4379 = vpow2.f32 %v1307_v9  ;;  %v1898_v15 = vsub.f32 %v7102_v6, %v1853_v63  ;;  %v1899_v7 = vsub.f32 %v7103_v33, %v1853_v63  ;;  %v2002_v60 = vsel %vm1182_vm4, %v5864_v20, 0.0 }
 0x4f6   : > { %4381 = vpow2.f32 %v1309_v52  ;;  %v2003_v18 = vadd.f32 %v5862_v17, %v2002_v60 }
 0x4f7   : > { %v5871_v53 = vpop.eup %4371  ;;  %v1946_v29 = vmul.f32 1.442695, %v1898_v15  ;;  %v1948_v30 = vmul.f32 1.442695, %v1899_v7 }
 0x4f8   : > { %v5873_v24 = vpop.eup %4373  ;;  %2004 = vadd.xlane.f32.xlu1 %v2003_v18  ;;  %v1218_v12 = vpop.xlane.xlu0 %1217 }
 0x4f9   : > { %4383 = vpow2.f32 %v1946_v29  ;;  %v1263_v13 = vsub.f32 %v5503_v37, %v1218_v12  ;;  %v1264_v2 = vsub.f32 %v7104_v51, %v1218_v12  ;;  %v1367_v28 = vsel %vm1182_vm4, %v5873_v24, 0.0  ;;  %v7106_v37 = vld [vmem:[#allocation45_spill] sm:$0xff] }
 0x4fa   : > { %4385 = vpow2.f32 %v1948_v30  ;;  %v1368_v19 = vadd.f32 %v5871_v53, %v1367_v28  ;;  %v7107_v30 = vld [vmem:[#allocation34_spill] sm:$0xff] }
 0x4fb   : > { %v5880_v34 = vpop.eup %4375  ;;  %v1311_v59 = vmul.f32 1.442695, %v1263_v13  ;;  %v1313_v45 = vmul.f32 1.442695, %v1264_v2 }
 0x4fc   : > { %v5882_v49 = vpop.eup %4377  ;;  %1369 = vadd.xlane.f32.xlu1 %v1368_v19  ;;  %v1857_v25 = vpop.xlane.xlu0 %1856 }
 0x4fd   : > { %4387 = vpow2.f32 %v1311_v59  ;;  %v1900_v9 = vsub.f32 %v7105_v26, %v1857_v25  ;;  %v1901_v52 = vsub.f32 %v7106_v37, %v1857_v25  ;;  %v2006_v63 = vsel %vm1182_vm4, %v5882_v49, 0.0  ;;  %v7108_v25 = vld [vmem:[#allocation46_spill] sm:$0xff] }
 0x4fe   : > { %4389 = vpow2.f32 %v1313_v45  ;;  %v2007_v6 = vadd.f32 %v5880_v34, %v2006_v63 }
 0x4ff   : > { %v5889_v15 = vpop.eup %4379  ;;  %v1950_v33 = vmul.f32 1.442695, %v1900_v9  ;;  %v1952_v7 = vmul.f32 1.442695, %v1901_v52 }
 0x500   : > { %v5891_v60 = vpop.eup %4381  ;;  %2008 = vadd.xlane.f32.xlu0 %v2007_v6  ;;  %v1222_v18 = vpop.xlane.xlu0 %1221 }
 0x501   : > { %4391 = vpow2.f32 %v1950_v33  ;;  %v1265_v29 = vsub.f32 %v5516_v42, %v1222_v18  ;;  %v1266_v12 = vsub.f32 %v7107_v30, %v1222_v18  ;;  %v1371_v13 = vsel %vm1182_vm4, %v5891_v60, 0.0  ;;  %v7109_v42 = vld [vmem:[#allocation47_spill] sm:$0xff] }
 0x502   : > { %4393 = vpow2.f32 %v1952_v7  ;;  %v1372_v51 = vadd.f32 %v5889_v15, %v1371_v13  ;;  %v7111_v30 = vld [vmem:[#allocation35_spill] sm:$0xff] }
 0x503   : > { %v5898_v2 = vpop.eup %4383  ;;  %v1315_v28 = vmul.f32 1.442695, %v1265_v29  ;;  %v1317_v19 = vmul.f32 1.442695, %v1266_v12 }
 0x504   : > { %v5900_v59 = vpop.eup %4385  ;;  %1373 = vadd.xlane.f32.xlu0 %v1372_v51  ;;  %v1861_v45 = vpop.xlane.xlu0 %1860 }
 0x505   : > { %4395 = vpow2.f32 %v1315_v28  ;;  %v1902_v26 = vsub.f32 %v7108_v25, %v1861_v45  ;;  %v1903_v9 = vsub.f32 %v7109_v42, %v1861_v45  ;;  %v2010_v37 = vsel %vm1182_vm4, %v5900_v59, 0.0  ;;  %v7112_v42 = vld [vmem:[#allocation48_spill] sm:$0xff] }
 0x506   : > { %4397 = vpow2.f32 %v1317_v19  ;;  %v2011_v52 = vadd.f32 %v5898_v2, %v2010_v37 }
 0x507   : > { %v5907_v63 = vpop.eup %4387  ;;  %v1954_v6 = vmul.f32 1.442695, %v1902_v26  ;;  %v1956_v33 = vmul.f32 1.442695, %v1903_v9 }
 0x508   : > { %7110 = vst [vmem:[#allocation41_spill] sm:$0xff] %v5907_v63  ;;  %v5909_v7 = vpop.eup %4389  ;;  %2012 = vadd.xlane.f32.xlu1 %v2011_v52  ;;  %v1226_v18 = vpop.xlane.xlu0 %1225 }
 0x509   : > { %4399 = vpow2.f32 %v1954_v6  ;;  %v1267_v29 = vsub.f32 %v5526_v46, %v1226_v18  ;;  %v1268_v12 = vsub.f32 %v7111_v30, %v1226_v18  ;;  %v1375_v13 = vsel %vm1182_vm4, %v5909_v7, 0.0  ;;  %v7113_v46 = vld [vmem:[#allocation49_spill] sm:$0xff] }
 0x50a   : > { %4401 = vpow2.f32 %v1956_v33  ;;  %v1376_v51 = vadd.f32 %v5907_v63, %v1375_v13 }
 0x50b   : > { %v5916_v28 = vpop.eup %4391  ;;  %v1319_v19 = vmul.f32 1.442695, %v1267_v29  ;;  %v1321_v45 = vmul.f32 1.442695, %v1268_v12 }
 0x50c   : > { %v5918_v25 = vpop.eup %4393  ;;  %1377 = vadd.xlane.f32.xlu1 %v1376_v51  ;;  %v1865_v26 = vpop.xlane.xlu0 %1864  ;;  %v7115_v51 = vld [vmem:[#allocation36_spill] sm:$0xff] }
 0x50d   : > { %4403 = vpow2.f32 %v1319_v19  ;;  %v1904_v9 = vsub.f32 %v7112_v42, %v1865_v26  ;;  %v1905_v37 = vsub.f32 %v7113_v46, %v1865_v26  ;;  %v2014_v52 = vsel %vm1182_vm4, %v5918_v25, 0.0 }
 0x50e   : > { %4405 = vpow2.f32 %v1321_v45  ;;  %v2015_v6 = vadd.f32 %v5916_v28, %v2014_v52 }
 0x50f   : > { %v5925_v33 = vpop.eup %4395  ;;  %v1958_v18 = vmul.f32 1.442695, %v1904_v9  ;;  %v1960_v29 = vmul.f32 1.442695, %v1905_v37 }
 0x510   : > { %7114 = vst [vmem:[#allocation32_spill] sm:$0xff] %v5925_v33  ;;  %v5927_v30 = vpop.eup %4397  ;;  %2016 = vadd.xlane.f32.xlu0 %v2015_v6  ;;  %v1230_v12 = vpop.xlane.xlu0 %1229  ;;  %v7117_v6 = vld [vmem:[#allocation50_spill] sm:$0xff] }
 0x511   : > { %4407 = vpow2.f32 %v1958_v18  ;;  %v1269_v13 = vsub.f32 %v5536_v50, %v1230_v12  ;;  %v1270_v19 = vsub.f32 %v7115_v51, %v1230_v12  ;;  %v1379_v26 = vsel %vm1182_vm4, %v5927_v30, 0.0  ;;  %v7118_v50 = vld [vmem:[#allocation51_spill] sm:$0xff] }
 0x512   : > { %4409 = vpow2.f32 %v1960_v29  ;;  %v1380_v45 = vadd.f32 %v5925_v33, %v1379_v26 }
 0x513   : > { %v5934_v42 = vpop.eup %4399  ;;  %v1323_v46 = vmul.f32 1.442695, %v1269_v13  ;;  %v1325_v9 = vmul.f32 1.442695, %v1270_v19 }
 0x514   : > { %7116 = vst [vmem:[#allocation42_spill] sm:$0xff] %v5934_v42  ;;  %v5936_v37 = vpop.eup %4401  ;;  %1381 = vadd.xlane.f32.xlu0 %v1380_v45  ;;  %v1869_v52 = vpop.xlane.xlu0 %1868 }
 0x515   : > { %4411 = vpow2.f32 %v1323_v46  ;;  %v1906_v18 = vsub.f32 %v7117_v6, %v1869_v52  ;;  %v1907_v63 = vsub.f32 %v7118_v50, %v1869_v52  ;;  %v2018_v12 = vsel %vm1182_vm4, %v5936_v37, 0.0  ;;  %v7121_v6 = vld [vmem:[#allocation37_spill] sm:$0xff] }
 0x516   : > { %4413 = vpow2.f32 %v1325_v9  ;;  %v2019_v29 = vadd.f32 %v5934_v42, %v2018_v12 }
 0x517   : > { %v5943_v51 = vpop.eup %4403  ;;  %v1962_v26 = vmul.f32 1.442695, %v1906_v18  ;;  %v1964_v13 = vmul.f32 1.442695, %v1907_v63 }
 0x518   : > { %7119 = vst [vmem:[#allocation43_spill] sm:$0xff] %v5943_v51  ;;  %v5945_v19 = vpop.eup %4405  ;;  %2020 = vadd.xlane.f32.xlu1 %v2019_v29  ;;  %v1234_v45 = vpop.xlane.xlu0 %1233 }
 0x519   : > { %7120 = vst [vmem:[#allocation33_spill] sm:$0xff] %v5945_v19  ;;  %4415 = vpow2.f32 %v1962_v26  ;;  %v1271_v46 = vsub.f32 %v5546_v54, %v1234_v45  ;;  %v1272_v33 = vsub.f32 %v7121_v6, %v1234_v45  ;;  %v1383_v52 = vsel %vm1182_vm4, %v5945_v19, 0.0  ;;  %v7122_v54 = vld [vmem:[#allocation52_spill] sm:$0xff] }
 0x51a   : > { %4417 = vpow2.f32 %v1964_v13  ;;  %v1384_v9 = vadd.f32 %v5943_v51, %v1383_v52 }
 0x51b   : > { %v5952_v50 = vpop.eup %4407  ;;  %v1327_v12 = vmul.f32 1.442695, %v1271_v46  ;;  %v1329_v18 = vmul.f32 1.442695, %v1272_v33 }
 0x51c   : > { %v5954_v63 = vpop.eup %4409  ;;  %1385 = vadd.xlane.f32.xlu1 %v1384_v9  ;;  %v1873_v29 = vpop.xlane.xlu0 %1872 }
 0x51d   : > { %4419 = vpow2.f32 %v1327_v12  ;;  %v1908_v26 = vsub.f32 %v5692_v55, %v1873_v29  ;;  %v1909_v42 = vsub.f32 %v7122_v54, %v1873_v29  ;;  %v2022_v45 = vsel %vm1182_vm4, %v5954_v63, 0.0  ;;  %v7125_v55 = vld [vmem:[#allocation38_spill] sm:$0xff] }
 0x51e   : > { %4421 = vpow2.f32 %v1329_v18  ;;  %v2023_v13 = vadd.f32 %v5952_v50, %v2022_v45 }
 0x51f   : > { %v5961_v6 = vpop.eup %4411  ;;  %v1966_v52 = vmul.f32 1.442695, %v1908_v26  ;;  %v1968_v46 = vmul.f32 1.442695, %v1909_v42 }
 0x520   : > { %7123 = vst [vmem:[#allocation44_spill] sm:$0xff] %v5961_v6  ;;  %v5963_v33 = vpop.eup %4413  ;;  %2024 = vadd.xlane.f32.xlu0 %v2023_v13  ;;  %v1238_v9 = vpop.xlane.xlu0 %1237 }
 0x521   : > { %7124 = vst [vmem:[#allocation45_spill] sm:$0xff] %v5963_v33  ;;  %4423 = vpow2.f32 %v1966_v52  ;;  %v1273_v12 = vsub.f32 %v5556_v58, %v1238_v9  ;;  %v1274_v51 = vsub.f32 %v7125_v55, %v1238_v9  ;;  %v1387_v29 = vsel %vm1182_vm4, %v5963_v33, 0.0 }
 0x522   : > { %4425 = vpow2.f32 %v1968_v46  ;;  %v1388_v18 = vadd.f32 %v5961_v6, %v1387_v29 }
 0x523   : > { %v5970_v54 = vpop.eup %4415  ;;  %v1331_v45 = vmul.f32 1.442695, %v1273_v12  ;;  %v1333_v26 = vmul.f32 1.442695, %v1274_v51 }
 0x524   : > { %7126 = vst [vmem:[#allocation34_spill] sm:$0xff] %v5970_v54  ;;  %v5972_v42 = vpop.eup %4417  ;;  %1389 = vadd.xlane.f32.xlu0 %v1388_v18  ;;  %v1877_v13 = vpop.xlane.xlu0 %1876 }
 0x525   : > { %7127 = vst [vmem:[#allocation46_spill] sm:$0xff] %v5972_v42  ;;  %4427 = vpow2.f32 %v1331_v45  ;;  %v1911_v52 = vsub.f32 %v5704_v10, %v1877_v13  ;;  %v2026_v58 = vsel %vm1182_vm4, %v5972_v42, 0.0  ;;  %v1910_v12 = vsub.f32 %v5702_v47, %v1877_v13  ;;  %v7128_v45 = vld [vmem:[#allocation39_spill] sm:$0xff] }
 0x526   : > { %4429 = vpow2.f32 %v1333_v26  ;;  %v2027_v9 = vadd.f32 %v5970_v54, %v2026_v58 }
 0x527   : > { %v5978_v46 = vpop.eup %4419  ;;  %v1972_v51 = vmul.f32 1.442695, %v1911_v52  ;;  %v1970_v19 = vmul.f32 1.442695, %v1910_v12 }
 0x528   : > { %v5980_v55 = vpop.eup %4421  ;;  %2028 = vadd.xlane.f32.xlu1 %v2027_v9  ;;  %v1242_v29 = vpop.xlane.xlu0 %1241 }
 0x529   : > { %v1275_v18 = vsub.f32 %v5566_v62, %v1242_v29  ;;  %v1276_v6 = vsub.f32 %v7128_v45, %v1242_v29  ;;  %v1391_v10 = vsel %vm1182_vm4, %v5980_v55, 0.0  ;;  %4431 = vpow2.f32 %v1972_v51  ;;  %v7129_v45 = vld [vmem:[#allocation40_spill] sm:$0xff] }
 0x52a   : > { %v1392_v26 = vadd.f32 %v5978_v46, %v1391_v10 }
 0x52b   : > { %v5988_v42 = vpop.eup %4423  ;;  %v1335_v58 = vmul.f32 1.442695, %v1275_v18  ;;  %v1337_v54 = vmul.f32 1.442695, %v1276_v6 }
 0x52c   : > { %v5990_v33 = vpop.eup %4425  ;;  %1393 = vadd.xlane.f32.xlu1 %v1392_v26  ;;  %v1881_v47 = vpop.xlane.xlu0 %1880 }
 0x52d   : > { %4433 = vpow2.f32 %v1335_v58  ;;  %v1913_v62 = vsub.f32 %v5714_v27, %v1881_v47  ;;  %v2030_v13 = vsel %vm1182_vm4, %v5990_v33, 0.0  ;;  %v1912_v51 = vsub.f32 %v5709_v38, %v1881_v47 }
 0x52e   : > { %4435 = vpow2.f32 %v1337_v54  ;;  %v2031_v52 = vadd.f32 %v5988_v42, %v2030_v13 }
 0x52f   : > { %v5996_v9 = vpop.eup %4427  ;;  %4437 = vpow2.f32 %v1970_v19  ;;  %v1976_v6 = vmul.f32 1.442695, %v1913_v62  ;;  %v1974_v13 = vmul.f32 1.442695, %v1912_v51 }
 0x530   : > { %v5998_v29 = vpop.eup %4429  ;;  %2032 = vadd.xlane.f32.xlu0 %v2031_v52  ;;  %v1246_v12 = vpop.xlane.xlu0 %1245 }
 0x531   : > { %v1277_v18 = vsub.f32 %v5576_v22, %v1246_v12  ;;  %v1278_v27 = vsub.f32 %v7129_v45, %v1246_v12  ;;  %v1395_v10 = vsel %vm1182_vm4, %v5998_v29, 0.0  ;;  %4439 = vpow2.f32 %v1976_v6 }
 0x532   : > { %v1396_v54 = vadd.f32 %v5996_v9, %v1395_v10 }
 0x533   : > { %v1339_v26 = vmul.f32 1.442695, %v1277_v18  ;;  %v1341_v58 = vmul.f32 1.442695, %v1278_v27  ;;  %v6006_v19 = vpop.eup %4431 }
 0x534   : > { %1397 = vadd.xlane.f32.xlu0 %v1396_v54  ;;  %7130 = vst [vmem:[#allocation47_spill] sm:$0xff] %v6006_v19  ;;  %v2034_v6 = vsel %vm1182_vm4, %v6006_v19, 0.0  ;;  %v935_v19 = vld [vmem:[#allocation3 + $0x18] sm:$0xff] }
 0x535   : > { %4441 = vpow2.f32 %v1339_v26  ;;  %3863 = vmatprep.mubr.msk.f32.mxu0 %vm1182_vm4, %v935_v19 }
 0x536   : > { %4443 = vpow2.f32 %v1341_v58 }
 0x537   : > { %v6008_v62 = vpop.eup %4433  ;;  %4445 = vpow2.f32 %v1974_v13  ;;  %v819_v13 = vpop.permute.xlu1 %818 }
 0x538   : > { %7131 = vst [vmem:[#allocation35_spill] sm:$0xff] %v6008_v62  ;;  %v6010_v38 = vpop.eup %4435 }
 0x539   : > { %v1399_v22 = vsel %vm1182_vm4, %v6010_v38, 0.0  ;;  %v6014_v47 = vpop.eup %4437 }
 0x53a   : > { %7132 = vst [vmem:[#allocation48_spill] sm:$0xff] %v6014_v47  ;;  %v1400_v52 = vadd.f32 %v6008_v62, %v1399_v22  ;;  %v2035_v51 = vadd.f32 %v6014_v47, %v2034_v6  ;;  %v824_v22 = vpop.permute.xlu0 %823  ;;  %v933_v47 = vld [vmem:[#allocation3 + $0x8] sm:$0xff]  ;;  %v7138_v62 = vld [vmem:[#allocation30_spill] sm:$0xff] }
 0x53b   : > { %v6019_v12 = vpop.eup %4439  ;;  %3830 = vmatprep.mubr.msk.f32.mxu1 %vm1182_vm4, %v933_v47 }
 0x53c   : > { %1401 = vadd.xlane.f32.xlu1 %v1400_v52  ;;  %7133 = vst [vmem:[#allocation49_spill] sm:$0xff] %v6019_v12  ;;  %v2038_v26 = vsel %vm1182_vm4, %v6019_v12, 0.0 }
 0x53f   : > { %v6022_v18 = vpop.eup %4441 }
 0x540   : > { %7134 = vst [vmem:[#allocation36_spill] sm:$0xff] %v6022_v18  ;;  %v6024_v45 = vpop.eup %4443  ;;  %2036 = vadd.xlane.f32.xlu1 %v2035_v51 }
 0x541   : > { %7135 = vst [vmem:[#allocation50_spill] sm:$0xff] %v6024_v45  ;;  %v1403_v27 = vsel %vm1182_vm4, %v6024_v45, 0.0  ;;  %v6029_v54 = vpop.eup %4445  ;;  %v921_v45 = vadd.f32 %v7138_v62, %v824_v22 }
 0x542   : > { %v1404_v10 = vadd.f32 %v6022_v18, %v1403_v27  ;;  %7136 = vst [vmem:[#allocation51_spill] sm:$0xff] %v6029_v54  ;;  %v2039_v58 = vadd.f32 %v6029_v54, %v2038_v26 }
 0x544   : > { %1405 = vadd.xlane.f32.xlu0 %v1404_v10  ;;  %v7137_v10 = vld [vmem:[#allocation31_spill] sm:$0xff] }
 0x545   : > { %v916_v26 = vadd.f32 %v7137_v10, %v819_v13 }
 0x548   : > { %2040 = vadd.xlane.f32.xlu0 %v2039_v58 }
 0x559   : > { %v1981_v52 = vpop.xlane.xlu1 %1980 }
 0x55a   : > { %4447 = vrcp.f32 %v1981_v52 }
 0x564   : > { %v4448_v18 = vpop.eup %4447 }
 0x565   : > { %v1346_v6 = vpop.xlane.xlu0 %1345  ;;  %v2059_v19 = vmul.f32 %v4448_v18, %v5755_v39 }
 0x569   : > { %v1985_v51 = vpop.xlane.xlu0 %1984  ;;  %v1989_v27 = vpop.xlane.xlu1 %1988 }
 0x56a   : > { %4449 = vrcp.f32 %v1985_v51 }
 0x56b   : > { %4451 = vrcp.f32 %v1346_v6 }
 0x56d   : > { %v1350_v12 = vpop.xlane.xlu0 %1349  ;;  %v1354_v58 = vpop.xlane.xlu1 %1353 }
 0x56e   : > { %4453 = vrcp.f32 %v1350_v12  ;;  %v2058_v12 = vmul.f32 %v4448_v18, %v5753_v35 }
 0x56f   : > { %4455 = vrcp.f32 %v1989_v27 }
 0x571   : > { %v1993_v54 = vpop.xlane.xlu0 %1992 }
 0x572   : > { %4457 = vrcp.f32 %v1993_v54  ;;  %v7139_v54 = vmov 0 }
 0x573   : > { %2212 = vxpose.xlu1.b32.start.end [1/1] (short) %v916_v26, 128  ;;  %4459 = vrcp.f32 %v1354_v58  ;;  %v7140_v54 = vsel %vm6044_vm5, 4294967295, %v7139_v54 }
 0x574   : > { %v4450_v47 = vpop.eup %4449  ;;  %7141 = vst [vmem:[#allocation37_spill] sm:$0xff] %v7140_v54 }
 0x575   : > { %2847 = vxpose.xlu0.b32.start.end [1/1] (short) %v921_v45, 128  ;;  %v1358_v52 = vpop.xlane.xlu0 %1357  ;;  %v2061_v6 = vmul.f32 %v4450_v47, %v5773_v1  ;;  %v2060_v13 = vmul.f32 %v4450_v47, %v5776_v61  ;;  %v4452_v51 = vpop.eup %4451 }
 0x576   : > { %4461 = vrcp.f32 %v1358_v52  ;;  %v1424_v39 = vmul.f32 %v4452_v51, %v5765_v43  ;;  %v1423_v1 = vmul.f32 %v4452_v51, %v5769_v40 }
 0x577   : > { %v4048_v62 = vpack.c.bf16 %v2061_v6, %v2059_v19  ;;  %v4051_v22 = vpack.c.bf16 %v2060_v13, %v2058_v12 }
 0x578   : > { %v4454_v45 = vpop.eup %4453 }
 0x579   : > { %v1997_v27 = vpop.xlane.xlu1 %1996  ;;  %v4456_v10 = vpop.eup %4455  ;;  %4050 = vmatprep.subr.msk.bf16.mxu0 %vm6044_vm5, %v4048_v62  ;;  %v1426_v35 = vmul.f32 %v4454_v45, %v5780_v57  ;;  %v1425_v61 = vmul.f32 %v4454_v45, %v5794_v48 }
 0x57a   : > { %4052 = vmatpush1.bf16.xpose.msra.mxu0 %v4051_v22  ;;  %4463 = vrcp.f32 %v1997_v27  ;;  %v2063_v19 = vmul.f32 %v4456_v10, %v5787_v4  ;;  %v2062_v12 = vmul.f32 %v4456_v10, %v5783_v31 }
 0x57b   : > { %v4008_v26 = vpack.c.bf16 %v1426_v35, %v1424_v39  ;;  %v4011_v58 = vpack.c.bf16 %v1425_v61, %v1423_v1 }
 0x57c   : > { %v4458_v18 = vpop.eup %4457 }
 0x57d   : > { %v2001_v47 = vpop.xlane.xlu0 %2000  ;;  %v1362_v52 = vpop.xlane.xlu1 %1361  ;;  %v2065_v6 = vmul.f32 %v4458_v18, %v5812_v41  ;;  %v2064_v43 = vmul.f32 %v4458_v18, %v5810_v36  ;;  %4010 = vmatprep.subr.msk.bf16.mxu1 %vm6044_vm5, %v4008_v26 }
 0x57e   : > { %v4460_v57 = vpop.eup %4459  ;;  %4465 = vrcp.f32 %v2001_v47  ;;  %4012 = vmatpush1.bf16.xpose.msra.mxu1 %v4011_v58 }
 0x57f   : > { %v4053_v40 = vpack.c.bf16 %v2065_v6, %v2063_v19  ;;  %v4056_v48 = vpack.c.bf16 %v2064_v43, %v2062_v12  ;;  %4467 = vrcp.f32 %v1362_v52  ;;  %v1428_v4 = vmul.f32 %v4460_v57, %v5802_v11 }
 0x580   : > { %v4462_v13 = vpop.eup %4461  ;;  %v1427_v36 = vmul.f32 %v4460_v57, %v5798_v8 }
 0x581   : > { %v1366_v51 = vpop.xlane.xlu0 %1365  ;;  %4055 = vmatprep.subr.msk.bf16.mxu0 %vm6044_vm5, %v4053_v40  ;;  %v1430_v31 = vmul.f32 %v4462_v13, %v5821_v21  ;;  %v1429_v41 = vmul.f32 %v4462_v13, %v5819_v14 }
 0x582   : > { %4469 = vrcp.f32 %v1366_v51  ;;  %4057 = vmatpush1.bf16.xpose.msra.mxu0 %v4056_v48 }
 0x583   : > { %v4013_v62 = vpack.c.bf16 %v1430_v31, %v1428_v4  ;;  %v4016_v22 = vpack.c.bf16 %v1429_v41, %v1427_v36 }
 0x584   : > { %v4464_v45 = vpop.eup %4463 }
 0x585   : > { %4015 = vmatprep.subr.msk.bf16.mxu1 %vm6044_vm5, %v4013_v62  ;;  %v2005_v27 = vpop.xlane.xlu1 %2004  ;;  %v2067_v39 = vmul.f32 %v4464_v45, %v5832_v56  ;;  %v2066_v21 = vmul.f32 %v4464_v45, %v5830_v44 }
 0x586   : > { %4017 = vmatpush1.bf16.xpose.msra.mxu1 %v4016_v22  ;;  %4471 = vrcp.f32 %v2005_v27 }
 0x588   : > { %v4466_v10 = vpop.eup %4465 }
 0x589   : > { %v2069_v11 = vmul.f32 %v4466_v10, %v5845_v0  ;;  %v2068_v8 = vmul.f32 %v4466_v10, %v5841_v32  ;;  %v4468_v14 = vpop.eup %4467  ;;  %v1370_v18 = vpop.xlane.xlu1 %1369 }
 0x58a   : > { %v1432_v58 = vmul.f32 %v4468_v14, %v5827_v16  ;;  %v1431_v0 = vmul.f32 %v4468_v14, %v5838_v23  ;;  %v7142_v14 = vld [vmem:[#allocation41_spill] sm:$0xff] }
 0x58b   : > { %v4058_v35 = vpack.c.bf16 %v2069_v11, %v2067_v39  ;;  %v4061_v1 = vpack.c.bf16 %v2068_v8, %v2066_v21 }
 0x58c   : > { %v4470_v61 = vpop.eup %4469 }
 0x58d   : > { %v2009_v26 = vpop.xlane.xlu0 %2008  ;;  %4060 = vmatprep.subr.msk.bf16.mxu0 %vm6044_vm5, %v4058_v35  ;;  %v1434_v56 = vmul.f32 %v4470_v61, %v5855_v5  ;;  %v1433_v44 = vmul.f32 %v4470_v61, %v5853_v3  ;;  %v7143_v35 = vld [vmem:[#allocation32_spill] sm:$0xff] }
 0x58e   : > { %4473 = vrcp.f32 %v2009_v26  ;;  %4062 = vmatpush1.bf16.xpose.msra.mxu0 %v4061_v1 }
 0x58f   : > { %v4018_v32 = vpack.c.bf16 %v1434_v56, %v1432_v58  ;;  %v4021_v47 = vpack.c.bf16 %v1433_v44, %v1431_v0  ;;  %4475 = vrcp.f32 %v1370_v18  ;;  %v7144_v56 = vld [vmem:[#allocation42_spill] sm:$0xff] }
 0x590   : > { %v4472_v19 = vpop.eup %4471 }
 0x591   : > { %v1374_v52 = vpop.xlane.xlu0 %1373  ;;  %4020 = vmatprep.subr.msk.bf16.mxu1 %vm6044_vm5, %v4018_v32  ;;  %v2071_v5 = vmul.f32 %v4472_v19, %v5864_v20  ;;  %v2070_v3 = vmul.f32 %v4472_v19, %v5862_v17 }
 0x592   : > { %4477 = vrcp.f32 %v1374_v52  ;;  %4022 = vmatpush1.bf16.xpose.msra.mxu1 %v4021_v47 }
 0x595   : > { %v2013_v6 = vpop.xlane.xlu1 %2012 }
 0x596   : > { %4479 = vrcp.f32 %v2013_v6 }
 0x598   : > { %v4474_v16 = vpop.eup %4473 }
 0x599   : > { %v2073_v23 = vmul.f32 %v4474_v16, %v5882_v49  ;;  %v2072_v12 = vmul.f32 %v4474_v16, %v5880_v34  ;;  %v4476_v43 = vpop.eup %4475  ;;  %v1378_v13 = vpop.xlane.xlu1 %1377 }
 0x59a   : > { %v1436_v4 = vmul.f32 %v4476_v43, %v5873_v24  ;;  %v1435_v49 = vmul.f32 %v4476_v43, %v5871_v53  ;;  %v7148_v43 = vld [vmem:[#allocation44_spill] sm:$0xff] }
 0x59b   : > { %v4063_v57 = vpack.c.bf16 %v2073_v23, %v2071_v5  ;;  %v4066_v40 = vpack.c.bf16 %v2072_v12, %v2070_v3  ;;  %v7145_v5 = vld [vmem:[#allocation33_spill] sm:$0xff]  ;;  %v7147_v12 = vld [vmem:[#allocation43_spill] sm:$0xff] }
 0x59c   : > { %v4478_v48 = vpop.eup %4477  ;;  %v7146_v3 = vld [vmem:[#allocation45_spill] sm:$0xff] }
 0x59d   : > { %v2017_v51 = vpop.xlane.xlu0 %2016  ;;  %4065 = vmatprep.subr.msk.bf16.mxu0 %vm6044_vm5, %v4063_v57  ;;  %v1438_v20 = vmul.f32 %v4478_v48, %v5891_v60  ;;  %v1437_v17 = vmul.f32 %v4478_v48, %v5889_v15 }
 0x59e   : > { %4481 = vrcp.f32 %v2017_v51  ;;  %4067 = vmatpush1.bf16.xpose.msra.mxu0 %v4066_v40 }
 0x59f   : > { %v4023_v34 = vpack.c.bf16 %v1438_v20, %v1436_v4  ;;  %v4026_v31 = vpack.c.bf16 %v1437_v17, %v1435_v49  ;;  %4483 = vrcp.f32 %v1378_v13  ;;  %v7149_v4 = vld [vmem:[#allocation46_spill] sm:$0xff] }
 0x5a0   : > { %v4480_v41 = vpop.eup %4479  ;;  %v7150_v17 = vld [vmem:[#allocation34_spill] sm:$0xff] }
 0x5a1   : > { %v1382_v36 = vpop.xlane.xlu0 %1381  ;;  %4025 = vmatprep.subr.msk.bf16.mxu1 %vm6044_vm5, %v4023_v34  ;;  %v2075_v60 = vmul.f32 %v4480_v41, %v5900_v59  ;;  %v2074_v15 = vmul.f32 %v4480_v41, %v5898_v2 }
 0x5a2   : > { %4485 = vrcp.f32 %v1382_v36  ;;  %4027 = vmatpush1.bf16.xpose.msra.mxu1 %v4026_v31 }
 0x5a5   : > { %v2021_v62 = vpop.xlane.xlu1 %2020 }
 0x5a6   : > { %4487 = vrcp.f32 %v2021_v62 }
 0x5a8   : > { %v4482_v24 = vpop.eup %4481 }
 0x5a9   : > { %v2077_v53 = vmul.f32 %v4482_v24, %v5918_v25  ;;  %v2076_v22 = vmul.f32 %v4482_v24, %v5916_v28  ;;  %v4484_v45 = vpop.eup %4483  ;;  %v1386_v11 = vpop.xlane.xlu1 %1385 }
 0x5aa   : > { %v1440_v8 = vmul.f32 %v4484_v45, %v5909_v7  ;;  %v1439_v25 = vmul.f32 %v4484_v45, %v7142_v14 }
 0x5ab   : > { %v4068_v27 = vpack.c.bf16 %v2077_v53, %v2075_v60  ;;  %v4071_v10 = vpack.c.bf16 %v2076_v22, %v2074_v15 }
 0x5ac   : > { %v4486_v39 = vpop.eup %4485 }
 0x5ad   : > { %v2025_v21 = vpop.xlane.xlu0 %2024  ;;  %4070 = vmatprep.subr.msk.bf16.mxu0 %vm6044_vm5, %v4068_v27  ;;  %v1442_v59 = vmul.f32 %v4486_v39, %v5927_v30  ;;  %v1441_v2 = vmul.f32 %v4486_v39, %v7143_v35 }
 0x5ae   : > { %4489 = vrcp.f32 %v2025_v21  ;;  %4072 = vmatpush1.bf16.xpose.msra.mxu0 %v4071_v10  ;;  %v7152_v21 = vld [vmem:[#allocation35_spill] sm:$0xff] }
 0x5af   : > { %v4028_v28 = vpack.c.bf16 %v1442_v59, %v1440_v8  ;;  %v4031_v1 = vpack.c.bf16 %v1441_v2, %v1439_v25  ;;  %4491 = vrcp.f32 %v1386_v11  ;;  %v7151_v11 = vld [vmem:[#allocation50_spill] sm:$0xff]  ;;  %v7153_v59 = vld [vmem:[#allocation36_spill] sm:$0xff] }
 0x5b0   : > { %v4488_v18 = vpop.eup %4487 }
 0x5b1   : > { %v1390_v61 = vpop.xlane.xlu0 %1389  ;;  %4030 = vmatprep.subr.msk.bf16.mxu1 %vm6044_vm5, %v4028_v28  ;;  %v2079_v30 = vmul.f32 %v4488_v18, %v5936_v37  ;;  %v2078_v0 = vmul.f32 %v4488_v18, %v7144_v56 }
 0x5b2   : > { %4493 = vrcp.f32 %v1390_v61  ;;  %4032 = vmatpush1.bf16.xpose.msra.mxu1 %v4031_v1  ;;  %v929_v1 = vld [vmem:[#allocation2 + $0x28] sm:$0xff] }
 0x5b3   : > { %v7154_v61 = vld [vmem:[#allocation47_spill] sm:$0xff] }
 0x5b5   : > { %v2029_v26 = vpop.xlane.xlu1 %2028 }
 0x5b6   : > { %4495 = vrcp.f32 %v2029_v26  ;;  %v7155_v26 = vld [vmem:[#allocation49_spill] sm:$0xff] }
 0x5b8   : > { %v4490_v7 = vpop.eup %4489 }
 0x5b9   : > { %v2081_v58 = vmul.f32 %v4490_v7, %v5954_v63  ;;  %v2080_v44 = vmul.f32 %v4490_v7, %v5952_v50  ;;  %v4492_v32 = vpop.eup %4491  ;;  %v1394_v6 = vpop.xlane.xlu1 %1393 }
 0x5ba   : > { %v1444_v23 = vmul.f32 %v4492_v32, %v7145_v5  ;;  %v1443_v63 = vmul.f32 %v4492_v32, %v7147_v12  ;;  %v931_v32 = vld [vmem:[#allocation2 + $0x38] sm:$0xff] }
 0x5bb   : > { %v4073_v47 = vpack.c.bf16 %v2081_v58, %v2079_v30  ;;  %v4076_v52 = vpack.c.bf16 %v2080_v44, %v2078_v0  ;;  %v7156_v30 = vld [vmem:[#allocation48_spill] sm:$0xff]  ;;  %v7157_v58 = vld [vmem:[#allocation51_spill] sm:$0xff] }
 0x5bc   : > { %v4494_v19 = vpop.eup %4493 }
 0x5bd   : > { %v2033_v16 = vpop.xlane.xlu0 %2032  ;;  %4075 = vmatprep.subr.msk.bf16.mxu0 %vm6044_vm5, %v4073_v47  ;;  %v1446_v37 = vmul.f32 %v4494_v19, %v7146_v3  ;;  %v1445_v57 = vmul.f32 %v4494_v19, %v7148_v43  ;;  %v932_v47 = vld [vmem:[#allocation3] sm:$0xff]  ;;  %v934_v19 = vld [vmem:[#allocation3 + $0x10] sm:$0xff] }
 0x5be   : > { %4497 = vrcp.f32 %v2033_v16  ;;  %4077 = vmatpush1.bf16.xpose.msra.mxu0 %v4076_v52  ;;  %v928_v52 = vld [vmem:[#allocation2 + $0x20] sm:$0xff]  ;;  %v930_v16 = vld [vmem:[#allocation2 + $0x30] sm:$0xff] }
 0x5bf   : > { %v4033_v50 = vpack.c.bf16 %v1446_v37, %v1444_v23  ;;  %v4036_v40 = vpack.c.bf16 %v1445_v57, %v1443_v63  ;;  %4499 = vrcp.f32 %v1394_v6  ;;  %v7158_v6 = vmov 0.0  }
 0x5c0   : > { %v4496_v13 = vpop.eup %4495 }
 0x5c1   : > { %v1398_v48 = vpop.xlane.xlu0 %1397  ;;  %4035 = vmatprep.subr.msk.bf16.mxu1 %vm6044_vm5, %v4033_v50  ;;  %v2083_v20 = vmul.f32 %v4496_v13, %v7149_v4  ;;  %v2082_v34 = vmul.f32 %v4496_v13, %v7150_v17 }
 0x5c2   : > { %4501 = vrcp.f32 %v1398_v48  ;;  %4037 = vmatpush1.bf16.xpose.msra.mxu1 %v4036_v40 }
 0x5c8   : > { %v4498_v51 = vpop.eup %4497 }
 0x5c9   : > { %v2085_v49 = vmul.f32 %v4498_v51, %v5990_v33  ;;  %v2084_v31 = vmul.f32 %v4498_v51, %v5988_v42  ;;  %v4500_v36 = vpop.eup %4499  ;;  %v1402_v41 = vpop.xlane.xlu1 %1401 }
 0x5ca   : > { %v1448_v53 = vmul.f32 %v4500_v36, %v5980_v55  ;;  %v1447_v22 = vmul.f32 %v4500_v36, %v5978_v46  ;;  %4503 = vrcp.f32 %v1402_v41 }
 0x5cb   : > { %v4078_v62 = vpack.c.bf16 %v2085_v49, %v2083_v20  ;;  %v4081_v24 = vpack.c.bf16 %v2084_v31, %v2082_v34 }
 0x5cc   : > { %v4502_v60 = vpop.eup %4501 }
 0x5cd   : > { %4080 = vmatprep.subr.msk.bf16.mxu0 %vm6044_vm5, %v4078_v62  ;;  %v1450_v15 = vmul.f32 %v4502_v60, %v5998_v29  ;;  %v1449_v33 = vmul.f32 %v4502_v60, %v5996_v9  ;;  %v2037_v42 = vpop.xlane.xlu1 %2036 }
 0x5ce   : > { %4082 = vmatpush1.bf16.xpose.msra.mxu0 %v4081_v24 }
 0x5cf   : > { %v4038_v45 = vpack.c.bf16 %v1450_v15, %v1448_v53  ;;  %v4041_v27 = vpack.c.bf16 %v1449_v33, %v1447_v22 }
 0x5d1   : > { %v1406_v10 = vpop.xlane.xlu0 %1405  ;;  %4040 = vmatprep.subr.msk.bf16.mxu1 %vm6044_vm5, %v4038_v45 }
 0x5d2   : > { %4505 = vrcp.f32 %v1406_v10  ;;  %4042 = vmatpush1.bf16.xpose.msra.mxu1 %v4041_v27 }
 0x5d3   : > { %4507 = vrcp.f32 %v2037_v42 }
 0x5d4   : > { %v4504_v55 = vpop.eup %4503 }
 0x5d5   : > { %v2041_v39 = vpop.xlane.xlu0 %2040  ;;  %v1452_v46 = vmul.f32 %v4504_v55, %v6010_v38  ;;  %v1451_v8 = vmul.f32 %v4504_v55, %v7152_v21 }
 0x5d6   : > { %4509 = vrcp.f32 %v2041_v39 }
 0x5dc   : > { %v4506_v29 = vpop.eup %4505 }
 0x5dd   : > { %v1454_v9 = vmul.f32 %v4506_v29, %v7151_v11  ;;  %v1453_v14 = vmul.f32 %v4506_v29, %v7153_v59  ;;  %v4508_v25 = vpop.eup %4507 }
 0x5de   : > { %v2087_v18 = vmul.f32 %v4508_v25, %v7154_v61  ;;  %v2086_v38 = vmul.f32 %v4508_v25, %v7156_v30 }
 0x5df   : > { %v4043_v35 = vpack.c.bf16 %v1454_v9, %v1452_v46  ;;  %v4046_v2 = vpack.c.bf16 %v1453_v14, %v1451_v8 }
 0x5e0   : > { %v4510_v28 = vpop.eup %4509 }
 0x5e1   : > { %4045 = vmatprep.subr.msk.bf16.mxu1 %vm6044_vm5, %v4043_v35  ;;  %v2089_v7 = vmul.f32 %v4510_v28, %v7155_v26  ;;  %v2088_v56 = vmul.f32 %v4510_v28, %v7157_v58 }
 0x5e2   : > { %4047 = vmatpush1.bf16.xpose.msra.mxu1 %v4046_v2 }
 0x5e3   : > { %v4083_v0 = vpack.c.bf16 %v2089_v7, %v2087_v18  ;;  %v4086_v44 = vpack.c.bf16 %v2088_v56, %v2086_v38  ;;  %2292 = vmatprep.subr.mxu1 %v929_v1 }
 0x5e5   : > { %4085 = vmatprep.subr.msk.bf16.mxu0 %vm6044_vm5, %v4083_v0 }
 0x5e6   : > { %4087 = vmatpush1.bf16.xpose.msra.mxu0 %v4086_v44 }
 0x5e7   : > { %2927 = vmatprep.subr.mxu0 %v931_v32 }
 0x5e9   : > { %1571 = vmatmul.mubr.f32.vlgmr.msra.gmra.mrb[32].mxu1 %v932_v47 }
 0x5ea   : > { %2293 = vmatpush1.msra.mxu1 %v928_v52  ;;  %2356 = vmatprep.mubr.f32.mxu1 %v7158_v6 }
 0x5ed   : > { %2206 = vmatmul.mubr.f32.vlgmr.msra.gmra.mrb[36].mxu0 %v934_v19 }
 0x5ee   : > { %2928 = vmatpush1.msra.mxu0 %v930_v16  ;;  %2991 = vmatprep.mubr.f32.mxu0 %v7158_v6 }
 0x5f3   : > { %v2228_v5 = vpop.trf.xlu1 }
 0x5f4   : > { %3864 = vmatmul.mubr.msk.f32.vlgmr.msra.gmra.mrb[34].mxu1 %vm972_vm3, %v2228_v5 }
 0x5f5   : > { %v2863_v23 = vpop.trf.xlu0  ;;  %2362 = vmatprep.mubr.f32.mxu1 %v7158_v6 }
 0x5f6   : > { %3897 = vmatmul.mubr.msk.f32.vlgmr.msra.gmra.mrb[38].mxu0 %vm972_vm3, %v2863_v23 }
 0x5f7   : > { %v2229_v3 = vpop.trf.xlu1  ;;  %2997 = vmatprep.mubr.f32.mxu0 %v7158_v6 }
 0x5f8   : > { %3865 = vmatmul.mubr.msk.f32.gmra.mrb[36].mxu1 %vm972_vm3, %v2229_v3 }
 0x5f9   : > { %v2864_v37 = vpop.trf.xlu0  ;;  %2368 = vmatprep.mubr.f32.mxu1 %v7158_v6 }
 0x5fa   : > { %3898 = vmatmul.mubr.msk.f32.gmra.mrb[40].mxu0 %vm972_vm3, %v2864_v37 }
 0x5fb   : > { %v2230_v12 = vpop.trf.xlu1  ;;  %3003 = vmatprep.mubr.f32.mxu0 %v7158_v6 }
 0x5fc   : > { %3866 = vmatmul.mubr.msk.f32.gmra.mrb[38].mxu1 %vm972_vm3, %v2230_v12 }
 0x5fd   : > { %v2865_v63 = vpop.trf.xlu0  ;;  %2374 = vmatprep.mubr.f32.mxu1 %v7158_v6 }
 0x5fe   : > { %3899 = vmatmul.mubr.msk.f32.gmra.mrb[42].mxu0 %vm972_vm3, %v2865_v63 }
 0x5ff   : > { %v2231_v43 = vpop.trf.xlu1  ;;  %3009 = vmatprep.mubr.f32.mxu0 %v7158_v6 }
 0x600   : > { %3867 = vmatmul.mubr.msk.f32.gmra.mrb[40].mxu1 %vm972_vm3, %v2231_v43 }
 0x601   : > { %v2866_v57 = vpop.trf.xlu0  ;;  %2380 = vmatprep.mubr.f32.mxu1 %v7158_v6 }
 0x602   : > { %3900 = vmatmul.mubr.msk.f32.gmra.mrb[44].mxu0 %vm972_vm3, %v2866_v57 }
 0x603   : > { %v2232_v50 = vpop.trf.xlu1  ;;  %3015 = vmatprep.mubr.f32.mxu0 %v7158_v6 }
 0x604   : > { %3868 = vmatmul.mubr.msk.f32.gmra.mrb[42].mxu1 %vm972_vm3, %v2232_v50 }
 0x605   : > { %v2867_v40 = vpop.trf.xlu0  ;;  %2386 = vmatprep.mubr.f32.mxu1 %v7158_v6 }
 0x606   : > { %3901 = vmatmul.mubr.msk.f32.gmra.mrb[46].mxu0 %vm972_vm3, %v2867_v40 }
 0x607   : > { %v2233_v48 = vpop.trf.xlu1  ;;  %3021 = vmatprep.mubr.f32.mxu0 %v7158_v6 }
 0x608   : > { %3869 = vmatmul.mubr.msk.f32.gmra.mrb[44].mxu1 %vm972_vm3, %v2233_v48 }
 0x609   : > { %v2868_v13 = vpop.trf.xlu0  ;;  %2392 = vmatprep.mubr.f32.mxu1 %v7158_v6 }
 0x60a   : > { %3902 = vmatmul.mubr.msk.f32.gmra.mrb[48].mxu0 %vm972_vm3, %v2868_v13 }
 0x60b   : > { %v2234_v51 = vpop.trf.xlu1  ;;  %3027 = vmatprep.mubr.f32.mxu0 %v7158_v6 }
 0x60c   : > { %3870 = vmatmul.mubr.msk.f32.gmra.mrb[46].mxu1 %vm972_vm3, %v2234_v51 }
 0x60d   : > { %v2869_v4 = vpop.trf.xlu0  ;;  %2398 = vmatprep.mubr.f32.mxu1 %v7158_v6 }
 0x60e   : > { %3903 = vmatmul.mubr.msk.f32.gmra.mrb[50].mxu0 %vm972_vm3, %v2869_v4 }
 0x60f   : > { %v2235_v20 = vpop.trf.xlu1  ;;  %3033 = vmatprep.mubr.f32.mxu0 %v7158_v6 }
 0x610   : > { %3871 = vmatmul.mubr.msk.f32.gmra.mrb[48].mxu1 %vm972_vm3, %v2235_v20 }
 0x611   : > { %v2870_v49 = vpop.trf.xlu0  ;;  %2404 = vmatprep.mubr.f32.mxu1 %v7158_v6 }
 0x612   : > { %3904 = vmatmul.mubr.msk.f32.gmra.mrb[52].mxu0 %vm972_vm3, %v2870_v49 }
 0x613   : > { %v2236_v17 = vpop.trf.xlu1  ;;  %3039 = vmatprep.mubr.f32.mxu0 %v7158_v6 }
 0x614   : > { %3872 = vmatmul.mubr.msk.f32.gmra.mrb[50].mxu1 %vm972_vm3, %v2236_v17 }
 0x615   : > { %v2871_v34 = vpop.trf.xlu0  ;;  %2410 = vmatprep.mubr.f32.mxu1 %v7158_v6 }
 0x616   : > { %3905 = vmatmul.mubr.msk.f32.gmra.mrb[54].mxu0 %vm972_vm3, %v2871_v34 }
 0x617   : > { %v2237_v31 = vpop.trf.xlu1  ;;  %3045 = vmatprep.mubr.f32.mxu0 %v7158_v6 }
 0x618   : > { %3873 = vmatmul.mubr.msk.f32.gmra.mrb[52].mxu1 %vm972_vm3, %v2237_v31 }
 0x619   : > { %v2872_v36 = vpop.trf.xlu0  ;;  %2416 = vmatprep.mubr.f32.mxu1 %v7158_v6 }
 0x61a   : > { %3906 = vmatmul.mubr.msk.f32.gmra.mrb[56].mxu0 %vm972_vm3, %v2872_v36 }
 0x61b   : > { %v2238_v41 = vpop.trf.xlu1  ;;  %3051 = vmatprep.mubr.f32.mxu0 %v7158_v6 }
 0x61c   : > { %3874 = vmatmul.mubr.msk.f32.gmra.mrb[54].mxu1 %vm972_vm3, %v2238_v41 }
 0x61d   : > { %v2873_v62 = vpop.trf.xlu0  ;;  %2422 = vmatprep.mubr.f32.mxu1 %v7158_v6 }
 0x61e   : > { %3907 = vmatmul.mubr.msk.f32.gmra.mrb[58].mxu0 %vm972_vm3, %v2873_v62 }
 0x61f   : > { %v2239_v24 = vpop.trf.xlu1  ;;  %3057 = vmatprep.mubr.f32.mxu0 %v7158_v6 }
 0x620   : > { %3875 = vmatmul.mubr.msk.f32.gmra.mrb[56].mxu1 %vm972_vm3, %v2239_v24 }
 0x621   : > { %v2874_v60 = vpop.trf.xlu0  ;;  %2428 = vmatprep.mubr.f32.mxu1 %v7158_v6 }
 0x622   : > { %3908 = vmatmul.mubr.msk.f32.gmra.mrb[60].mxu0 %vm972_vm3, %v2874_v60 }
 0x623   : > { %v2240_v53 = vpop.trf.xlu1  ;;  %3063 = vmatprep.mubr.f32.mxu0 %v7158_v6 }
 0x624   : > { %3876 = vmatmul.mubr.msk.f32.gmra.mrb[58].mxu1 %vm972_vm3, %v2240_v53 }
 0x625   : > { %v2875_v15 = vpop.trf.xlu0  ;;  %2434 = vmatprep.mubr.f32.mxu1 %v7158_v6 }
 0x626   : > { %3909 = vmatmul.mubr.msk.f32.gmra.mrb[62].mxu0 %vm972_vm3, %v2875_v15 }
 0x627   : > { %v2241_v22 = vpop.trf.xlu1  ;;  %3069 = vmatprep.mubr.f32.mxu0 %v7158_v6 }
 0x628   : > { %3877 = vmatmul.mubr.msk.f32.gmra.mrb[60].mxu1 %vm972_vm3, %v2241_v22 }
 0x629   : > { %v2876_v33 = vpop.trf.xlu0  ;;  %2440 = vmatprep.mubr.f32.mxu1 %v7158_v6 }
 0x62a   : > { %3910 = vmatmul.mubr.msk.f32.gmra.mrb[64].mxu0 %vm972_vm3, %v2876_v33 }
 0x62b   : > { %v2242_v45 = vpop.trf.xlu1  ;;  %3075 = vmatprep.mubr.f32.mxu0 %v7158_v6 }
 0x62c   : > { %3878 = vmatmul.mubr.msk.f32.gmra.mrb[62].mxu1 %vm972_vm3, %v2242_v45 }
 0x62d   : > { %v2877_v27 = vpop.trf.xlu0  ;;  %2446 = vmatprep.mubr.f32.mxu1 %v7158_v6 }
 0x62e   : > { %3911 = vmatmul.mubr.msk.f32.gmra.mrb[66].mxu0 %vm972_vm3, %v2877_v27 }
 0x62f   : > { %v2243_v42 = vpop.trf.xlu1  ;;  %3081 = vmatprep.mubr.f32.mxu0 %v7158_v6 }
 0x630   : > { %3879 = vmatmul.mubr.msk.f32.gmra.mrb[64].mxu1 %vm972_vm3, %v2243_v42 }
 0x631   : > { %v2878_v10 = vpop.trf.xlu0 }
 0x632   : > { %3912 = vmatmul.mubr.msk.f32.gmra.mrb[68].mxu0 %vm972_vm3, %v2878_v10 }
 0x6bc   : > { %v1572_v39 = vpop.f32.mrb[32].mxu1 }
 0x6bd   : > { %v1574_v55 = vpop.f32.mrb[33].mxu1 }
 0x6c0   : > { %v2207_v29 = vpop.f32.mrb[36].mxu0 }
 0x6c1   : > { %v6204_v46 = vpack.c.bf16 %v2207_v29, %v1572_v39  ;;  %v2209_v11 = vpop.f32.mrb[37].mxu0 }
 0x6c3   : > { %7159 = vst [vmem:[#allocation52_spill] sm:$0xff] %v6204_v46 }
 0x6c7   : > { %v6206_v9 = vpop.f32.mrb[34].mxu1 }
 0x6c8   : > { %v6208_v21 = vpop.f32.mrb[35].mxu1 }
 0x6c9   : > { %v2453_v8 = vsel %vm1182_vm4, %v6208_v21, -inf  ;;  %v6212_v59 = vpop.f32.mrb[38].mxu0 }
 0x6ca   : > { %v2454_v14 = vmax.f32 %v6206_v9, %v2453_v8  ;;  %v6215_v25 = vpop.f32.mrb[39].mxu0 }
 0x6cb   : > { %v3088_v35 = vsel %vm1182_vm4, %v6215_v25, -inf  ;;  %v6219_v2 = vpop.f32.mrb[36].mxu1 }
 0x6cc   : > { %v3089_v28 = vmax.f32 %v6212_v59, %v3088_v35  ;;  %2455 = vmax.xlane.f32.xlu0 %v2454_v14  ;;  %v6222_v1 = vpop.f32.mrb[37].mxu1 }
 0x6cd   : > { %v2457_v61 = vsel %vm1182_vm4, %v6222_v1, -inf  ;;  %v6226_v18 = vpop.f32.mrb[40].mxu0 }
 0x6ce   : > { %v2458_v26 = vmax.f32 %v6219_v2, %v2457_v61  ;;  %3090 = vmax.xlane.f32.xlu1 %v3089_v28  ;;  %v6229_v7 = vpop.f32.mrb[41].mxu0 }
 0x6cf   : > { %v3092_v30 = vsel %vm1182_vm4, %v6229_v7, -inf  ;;  %v6233_v38 = vpop.f32.mrb[38].mxu1 }
 0x6d0   : > { %v3093_v58 = vmax.f32 %v6226_v18, %v3092_v30  ;;  %v6236_v56 = vpop.f32.mrb[39].mxu1 }
 0x6d1   : > { %v2461_v0 = vsel %vm1182_vm4, %v6236_v56, -inf  ;;  %v6240_v44 = vpop.f32.mrb[42].mxu0 }
 0x6d2   : > { %v2462_v32 = vmax.f32 %v6233_v38, %v2461_v0  ;;  %v6243_v47 = vpop.f32.mrb[43].mxu0  ;;  %3094 = vmax.xlane.f32.xlu0 %v3093_v58  ;;  %2459 = vmax.xlane.f32.xlu1 %v2458_v26 }
 0x6d3   : > { %v3096_v52 = vsel %vm1182_vm4, %v6243_v47, -inf  ;;  %v6247_v19 = vpop.f32.mrb[40].mxu1 }
 0x6d4   : > { %v3097_v6 = vmax.f32 %v6240_v44, %v3096_v52  ;;  %v6250_v16 = vpop.f32.mrb[41].mxu1 }
 0x6d5   : > { %v2465_v5 = vsel %vm1182_vm4, %v6250_v16, -inf  ;;  %v6254_v23 = vpop.f32.mrb[44].mxu0 }
 0x6d6   : > { %v2466_v3 = vmax.f32 %v6247_v19, %v2465_v5  ;;  %v6257_v37 = vpop.f32.mrb[45].mxu0  ;;  %3098 = vmax.xlane.f32.xlu1 %v3097_v6 }
 0x6d7   : > { %v3100_v12 = vsel %vm1182_vm4, %v6257_v37, -inf  ;;  %v6261_v63 = vpop.f32.mrb[42].mxu1 }
 0x6d8   : > { %v3101_v43 = vmax.f32 %v6254_v23, %v3100_v12  ;;  %v6264_v57 = vpop.f32.mrb[43].mxu1 }
 0x6d9   : > { %v2469_v50 = vsel %vm1182_vm4, %v6264_v57, -inf  ;;  %v6268_v40 = vpop.f32.mrb[46].mxu0 }
 0x6da   : > { %v2470_v48 = vmax.f32 %v6261_v63, %v2469_v50  ;;  %v6271_v13 = vpop.f32.mrb[47].mxu0  ;;  %3102 = vmax.xlane.f32.xlu0 %v3101_v43  ;;  %2463 = vmax.xlane.f32.xlu1 %v2462_v32 }
 0x6db   : > { %v3104_v51 = vsel %vm1182_vm4, %v6271_v13, -inf  ;;  %v6275_v4 = vpop.f32.mrb[44].mxu1 }
 0x6dc   : > { %v3105_v20 = vmax.f32 %v6268_v40, %v3104_v51  ;;  %v6278_v49 = vpop.f32.mrb[45].mxu1 }
 0x6dd   : > { %v2473_v17 = vsel %vm1182_vm4, %v6278_v49, -inf  ;;  %v6282_v34 = vpop.f32.mrb[48].mxu0 }
 0x6de   : > { %v2474_v31 = vmax.f32 %v6275_v4, %v2473_v17  ;;  %v6285_v36 = vpop.f32.mrb[49].mxu0  ;;  %3106 = vmax.xlane.f32.xlu1 %v3105_v20  ;;  %2467 = vmax.xlane.f32.xlu0 %v2466_v3 }
 0x6df   : > { %v3108_v41 = vsel %vm1182_vm4, %v6285_v36, -inf  ;;  %v6289_v62 = vpop.f32.mrb[46].mxu1 }
 0x6e0   : > { %v3109_v24 = vmax.f32 %v6282_v34, %v3108_v41  ;;  %v6292_v60 = vpop.f32.mrb[47].mxu1 }
 0x6e1   : > { %v2477_v53 = vsel %vm1182_vm4, %v6292_v60, -inf  ;;  %v6296_v15 = vpop.f32.mrb[50].mxu0 }
 0x6e2   : > { %v2478_v22 = vmax.f32 %v6289_v62, %v2477_v53  ;;  %v6299_v33 = vpop.f32.mrb[51].mxu0  ;;  %3110 = vmax.xlane.f32.xlu0 %v3109_v24  ;;  %2471 = vmax.xlane.f32.xlu1 %v2470_v48 }
 0x6e3   : > { %v3112_v45 = vsel %vm1182_vm4, %v6299_v33, -inf  ;;  %v6303_v27 = vpop.f32.mrb[48].mxu1 }
 0x6e4   : > { %v3113_v42 = vmax.f32 %v6296_v15, %v3112_v45  ;;  %v6306_v10 = vpop.f32.mrb[49].mxu1 }
 0x6e5   : > { %v2481_v39 = vsel %vm1182_vm4, %v6306_v10, -inf  ;;  %v6310_v55 = vpop.f32.mrb[52].mxu0 }
 0x6e6   : > { %v2482_v29 = vmax.f32 %v6303_v27, %v2481_v39  ;;  %v6313_v11 = vpop.f32.mrb[53].mxu0  ;;  %3114 = vmax.xlane.f32.xlu1 %v3113_v42  ;;  %2475 = vmax.xlane.f32.xlu0 %v2474_v31 }
 0x6e7   : > { %v3116_v8 = vsel %vm1182_vm4, %v6313_v11, -inf  ;;  %v6317_v14 = vpop.f32.mrb[50].mxu1 }
 0x6e8   : > { %v3117_v35 = vmax.f32 %v6310_v55, %v3116_v8  ;;  %v6320_v28 = vpop.f32.mrb[51].mxu1 }
 0x6e9   : > { %v2485_v61 = vsel %vm1182_vm4, %v6320_v28, -inf  ;;  %v6324_v26 = vpop.f32.mrb[54].mxu0 }
 0x6ea   : > { %v2486_v30 = vmax.f32 %v6317_v14, %v2485_v61  ;;  %v6327_v58 = vpop.f32.mrb[55].mxu0  ;;  %3118 = vmax.xlane.f32.xlu0 %v3117_v35  ;;  %2479 = vmax.xlane.f32.xlu1 %v2478_v22 }
 0x6eb   : > { %v3120_v0 = vsel %vm1182_vm4, %v6327_v58, -inf  ;;  %v6331_v32 = vpop.f32.mrb[52].mxu1 }
 0x6ec   : > { %v3121_v52 = vmax.f32 %v6324_v26, %v3120_v0  ;;  %v6334_v6 = vpop.f32.mrb[53].mxu1 }
 0x6ed   : > { %v2489_v5 = vsel %vm1182_vm4, %v6334_v6, -inf  ;;  %v6338_v3 = vpop.f32.mrb[56].mxu0 }
 0x6ee   : > { %v2490_v12 = vmax.f32 %v6331_v32, %v2489_v5  ;;  %v6341_v43 = vpop.f32.mrb[57].mxu0  ;;  %3122 = vmax.xlane.f32.xlu1 %v3121_v52  ;;  %2483 = vmax.xlane.f32.xlu0 %v2482_v29 }
 0x6ef   : > { %v3124_v50 = vsel %vm1182_vm4, %v6341_v43, -inf  ;;  %v6345_v48 = vpop.f32.mrb[54].mxu1 }
 0x6f0   : > { %v3125_v51 = vmax.f32 %v6338_v3, %v3124_v50  ;;  %v6348_v20 = vpop.f32.mrb[55].mxu1 }
 0x6f1   : > { %v2493_v17 = vsel %vm1182_vm4, %v6348_v20, -inf  ;;  %v6352_v31 = vpop.f32.mrb[58].mxu0 }
 0x6f2   : > { %v2494_v41 = vmax.f32 %v6345_v48, %v2493_v17  ;;  %v6355_v24 = vpop.f32.mrb[59].mxu0  ;;  %3126 = vmax.xlane.f32.xlu0 %v3125_v51  ;;  %2487 = vmax.xlane.f32.xlu1 %v2486_v30 }
 0x6f3   : > { %v3128_v53 = vsel %vm1182_vm4, %v6355_v24, -inf  ;;  %v6359_v22 = vpop.f32.mrb[56].mxu1 }
 0x6f4   : > { %v3129_v45 = vmax.f32 %v6352_v31, %v3128_v53  ;;  %v6362_v42 = vpop.f32.mrb[57].mxu1 }
 0x6f5   : > { %7160 = vst [vmem:[#allocation38_spill] sm:$0xff] %v6362_v42  ;;  %v2497_v39 = vsel %vm1182_vm4, %v6362_v42, -inf  ;;  %v6366_v29 = vpop.f32.mrb[60].mxu0 }
 0x6f6   : > { %v2498_v8 = vmax.f32 %v6359_v22, %v2497_v39  ;;  %v6369_v35 = vpop.f32.mrb[61].mxu0  ;;  %3130 = vmax.xlane.f32.xlu1 %v3129_v45  ;;  %2491 = vmax.xlane.f32.xlu0 %v2490_v12 }
 0x6f7   : > { %v3132_v61 = vsel %vm1182_vm4, %v6369_v35, -inf  ;;  %v6373_v30 = vpop.f32.mrb[58].mxu1 }
 0x6f8   : > { %7161 = vst [vmem:[#allocation39_spill] sm:$0xff] %v6373_v30  ;;  %v3133_v0 = vmax.f32 %v6366_v29, %v3132_v61  ;;  %v6376_v52 = vpop.f32.mrb[59].mxu1 }
 0x6f9   : > { %7162 = vst [vmem:[#allocation40_spill] sm:$0xff] %v6376_v52  ;;  %v2501_v5 = vsel %vm1182_vm4, %v6376_v52, -inf  ;;  %v6380_v50 = vpop.f32.mrb[62].mxu0 }
 0x6fa   : > { %7163 = vst [vmem:[#allocation31_spill] sm:$0xff] %v6380_v50  ;;  %v2502_v51 = vmax.f32 %v6373_v30, %v2501_v5  ;;  %v6383_v17 = vpop.f32.mrb[63].mxu0  ;;  %3134 = vmax.xlane.f32.xlu0 %v3133_v0  ;;  %2495 = vmax.xlane.f32.xlu1 %v2494_v41 }
 0x6fb   : > { %7164 = vst [vmem:[#allocation30_spill] sm:$0xff] %v6383_v17  ;;  %v3136_v12 = vsel %vm1182_vm4, %v6383_v17, -inf  ;;  %v6387_v53 = vpop.f32.mrb[60].mxu1 }
 0x6fc   : > { %7165 = vst [vmem:[#allocation41_spill] sm:$0xff] %v6387_v53  ;;  %v3137_v45 = vmax.f32 %v6380_v50, %v3136_v12  ;;  %v6390_v39 = vpop.f32.mrb[61].mxu1 }
 0x6fd   : > { %7166 = vst [vmem:[#allocation32_spill] sm:$0xff] %v6390_v39  ;;  %v2505_v61 = vsel %vm1182_vm4, %v6390_v39, -inf  ;;  %v6394_v46 = vpop.f32.mrb[64].mxu0 }
 0x6fe   : > { %7167 = vst [vmem:[#allocation42_spill] sm:$0xff] %v6394_v46  ;;  %v2506_v5 = vmax.f32 %v6387_v53, %v2505_v61  ;;  %v6397_v54 = vpop.f32.mrb[65].mxu0  ;;  %3138 = vmax.xlane.f32.xlu1 %v3137_v45  ;;  %2499 = vmax.xlane.f32.xlu0 %v2498_v8 }
 0x6ff   : > { %7168 = vst [vmem:[#allocation33_spill] sm:$0xff] %v6397_v54  ;;  %v3140_v41 = vsel %vm1182_vm4, %v6397_v54, -inf  ;;  %v6401_v0 = vpop.f32.mrb[62].mxu1 }
 0x700   : > { %7169 = vst [vmem:[#allocation45_spill] sm:$0xff] %v6401_v0  ;;  %v3141_v12 = vmax.f32 %v6394_v46, %v3140_v41  ;;  %v6404_v52 = vpop.f32.mrb[63].mxu1 }
 0x701   : > { %7170 = vst [vmem:[#allocation43_spill] sm:$0xff] %v6404_v52  ;;  %v2509_v39 = vsel %vm1182_vm4, %v6404_v52, -inf  ;;  %v6408_v30 = vpop.f32.mrb[66].mxu0 }
 0x702   : > { %7171 = vst [vmem:[#allocation44_spill] sm:$0xff] %v6408_v30  ;;  %v2510_v61 = vmax.f32 %v6401_v0, %v2509_v39  ;;  %3142 = vmax.xlane.f32.xlu0 %v3141_v12  ;;  %2503 = vmax.xlane.f32.xlu1 %v2502_v51  ;;  %v6411_v45 = vpop.f32.mrb[67].mxu0 }
 0x703   : > { %7172 = vst [vmem:[#allocation46_spill] sm:$0xff] %v6411_v45  ;;  %v6413_v8 = vpop.f32.mrb[64].mxu1  ;;  %v3144_v53 = vsel %vm1182_vm4, %v6411_v45, -inf }
 0x704   : > { %7173 = vst [vmem:[#allocation34_spill] sm:$0xff] %v6413_v8  ;;  %v6417_v54 = vpop.f32.mrb[65].mxu1  ;;  %v3145_v41 = vmax.f32 %v6408_v30, %v3144_v53 }
 0x705   : > { %7174 = vst [vmem:[#allocation50_spill] sm:$0xff] %v6417_v54  ;;  %v2513_v52 = vsel %vm1182_vm4, %v6417_v54, -inf  ;;  %v6422_v46 = vpop.f32.mrb[68].mxu0 }
 0x706   : > { %v2514_v39 = vmax.f32 %v6413_v8, %v2513_v52  ;;  %2507 = vmax.xlane.f32.xlu0 %v2506_v5  ;;  %2511 = vmax.xlane.f32.xlu1 %v2510_v61  ;;  %v6425_v51 = vpop.f32.mrb[69].mxu0 }
 0x707   : > { %7175 = vst [vmem:[#allocation35_spill] sm:$0xff] %v6425_v51  ;;  %v3148_v12 = vsel %vm1182_vm4, %v6425_v51, -inf }
 0x708   : > { %v3149_v45 = vmax.f32 %v6422_v46, %v3148_v12 }
 0x70a   : > { %3146 = vmax.xlane.f32.xlu1 %v3145_v41  ;;  %2515 = vmax.xlane.f32.xlu0 %v2514_v39 }
 0x70e   : > { %3150 = vmax.xlane.f32.xlu0 %v3149_v45 }
 0x759   : > { %v2456_v53 = vpop.xlane.xlu0 %2455 }
 0x75a   : > { %v2518_v30 = vsub.f32 %v6208_v21, %v2456_v53  ;;  %v2517_v54 = vsub.f32 %v6206_v9, %v2456_v53 }
 0x75b   : > { %v3091_v0 = vpop.xlane.xlu1 %3090 }
 0x75c   : > { %v2551_v17 = vmul.f32 1.442695, %v2518_v30  ;;  %v3152_v52 = vsub.f32 %v6212_v59, %v3091_v0  ;;  %v3153_v5 = vsub.f32 %v6215_v25, %v3091_v0  ;;  %v2549_v50 = vmul.f32 1.442695, %v2517_v54 }
 0x75e   : > { %v3184_v61 = vmul.f32 1.442695, %v3152_v52  ;;  %v3186_v8 = vmul.f32 1.442695, %v3153_v5  ;;  %4511 = vpow2.f32 %v2551_v17 }
 0x75f   : > { %v3095_v51 = vpop.xlane.xlu0 %3094  ;;  %v2460_v42 = vpop.xlane.xlu1 %2459 }
 0x760   : > { %v3154_v41 = vsub.f32 %v6226_v18, %v3095_v51  ;;  %v3155_v45 = vsub.f32 %v6229_v7, %v3095_v51  ;;  %v2519_v21 = vsub.f32 %v6219_v2, %v2460_v42  ;;  %4513 = vpow2.f32 %v3186_v8 }
 0x761   : > { %v2520_v9 = vsub.f32 %v6222_v1, %v2460_v42  ;;  %4515 = vpow2.f32 %v3184_v61 }
 0x762   : > { %v3188_v30 = vmul.f32 1.442695, %v3154_v41  ;;  %v3190_v59 = vmul.f32 1.442695, %v3155_v45  ;;  %4517 = vpow2.f32 %v2549_v50  ;;  %v2553_v0 = vmul.f32 1.442695, %v2519_v21 }
 0x763   : > { %v2555_v39 = vmul.f32 1.442695, %v2520_v9  ;;  %v3099_v25 = vpop.xlane.xlu1 %3098 }
 0x764   : > { %v3156_v54 = vsub.f32 %v6240_v44, %v3099_v25  ;;  %v3157_v17 = vsub.f32 %v6243_v47, %v3099_v25  ;;  %4519 = vpow2.f32 %v3190_v59 }
 0x765   : > { %4521 = vpow2.f32 %v3188_v30 }
 0x766   : > { %v3192_v18 = vmul.f32 1.442695, %v3156_v54  ;;  %v3194_v7 = vmul.f32 1.442695, %v3157_v17  ;;  %4523 = vpow2.f32 %v2555_v39 }
 0x767   : > { %v3103_v2 = vpop.xlane.xlu0 %3102  ;;  %v2464_v8 = vpop.xlane.xlu1 %2463  ;;  %4525 = vpow2.f32 %v2553_v0 }
 0x768   : > { %v3158_v1 = vsub.f32 %v6254_v23, %v3103_v2  ;;  %v3159_v42 = vsub.f32 %v6257_v37, %v3103_v2  ;;  %v2521_v51 = vsub.f32 %v6233_v38, %v2464_v8  ;;  %4527 = vpow2.f32 %v3194_v7  ;;  %v6444_v44 = vpop.eup %4511 }
 0x769   : > { %v2522_v50 = vsub.f32 %v6236_v56, %v2464_v8  ;;  %4529 = vpow2.f32 %v3192_v18  ;;  %v2613_v9 = vsel %vm1182_vm4, %v6444_v44, 0.0 }
 0x76a   : > { %v3196_v47 = vmul.f32 1.442695, %v3158_v1  ;;  %v3198_v12 = vmul.f32 1.442695, %v3159_v42  ;;  %v2557_v53 = vmul.f32 1.442695, %v2521_v51  ;;  %v6446_v52 = vpop.eup %4513 }
 0x76b   : > { %v2559_v5 = vmul.f32 1.442695, %v2522_v50  ;;  %v2468_v61 = vpop.xlane.xlu0 %2467  ;;  %v3107_v41 = vpop.xlane.xlu1 %3106  ;;  %v3248_v21 = vsel %vm1182_vm4, %v6446_v52, 0.0 }
 0x76c   : > { %v6448_v45 = vpop.eup %4515  ;;  %4531 = vpow2.f32 %v3196_v47  ;;  %v2523_v23 = vsub.f32 %v6247_v19, %v2468_v61  ;;  %v2524_v38 = vsub.f32 %v6250_v16, %v2468_v61  ;;  %v3160_v56 = vsub.f32 %v6268_v40, %v3107_v41 }
 0x76d   : > { %4533 = vpow2.f32 %v3198_v12  ;;  %v3161_v37 = vsub.f32 %v6271_v13, %v3107_v41  ;;  %v6458_v30 = vpop.eup %4517  ;;  %v3249_v40 = vadd.f32 %v6448_v45, %v3248_v21 }
 0x76e   : > { %4535 = vpow2.f32 %v2557_v53  ;;  %v2561_v59 = vmul.f32 1.442695, %v2523_v23  ;;  %v2563_v39 = vmul.f32 1.442695, %v2524_v38  ;;  %v3200_v25 = vmul.f32 1.442695, %v3160_v56  ;;  %v6460_v19 = vpop.eup %4519 }
 0x76f   : > { %4537 = vpow2.f32 %v2559_v5  ;;  %v3202_v16 = vmul.f32 1.442695, %v3161_v37  ;;  %v3111_v0 = vpop.xlane.xlu0 %3110  ;;  %v2472_v13 = vpop.xlane.xlu1 %2471  ;;  %3250 = vadd.xlane.f32.xlu1 %v3249_v40  ;;  %v3252_v1 = vsel %vm1182_vm4, %v6460_v19, 0.0  ;;  %v2614_v42 = vadd.f32 %v6458_v30, %v2613_v9 }
 0x770   : > { %v6463_v54 = vpop.eup %4521  ;;  %4539 = vpow2.f32 %v2561_v59  ;;  %v3162_v17 = vsub.f32 %v6282_v34, %v3111_v0  ;;  %v3163_v18 = vsub.f32 %v6285_v36, %v3111_v0  ;;  %v2525_v7 = vsub.f32 %v6261_v63, %v2472_v13 }
 0x771   : > { %v6468_v2 = vpop.eup %4523  ;;  %4541 = vpow2.f32 %v2563_v39  ;;  %v2526_v8 = vsub.f32 %v6264_v57, %v2472_v13  ;;  %v3253_v12 = vadd.f32 %v6463_v54, %v3252_v1 }
 0x772   : > { %v6474_v51 = vpop.eup %4525  ;;  %4543 = vpow2.f32 %v3200_v25  ;;  %v3204_v50 = vmul.f32 1.442695, %v3162_v17  ;;  %v3206_v34 = vmul.f32 1.442695, %v3163_v18  ;;  %v2565_v47 = vmul.f32 1.442695, %v2525_v7 }
 0x773   : > { %v6476_v36 = vpop.eup %4527  ;;  %4545 = vpow2.f32 %v3202_v16  ;;  %v2567_v63 = vmul.f32 1.442695, %v2526_v8  ;;  %v2476_v53 = vpop.xlane.xlu0 %2475  ;;  %v2617_v57 = vsel %vm1182_vm4, %v6468_v2, 0.0  ;;  %3254 = vadd.xlane.f32.xlu0 %v3253_v12  ;;  %2615 = vadd.xlane.f32.xlu1 %v2614_v42 }
 0x774   : > { %v3115_v5 = vpop.xlane.xlu1 %3114  ;;  %v6481_v61 = vpop.eup %4529  ;;  %4547 = vpow2.f32 %v3204_v50  ;;  %v2527_v41 = vsub.f32 %v6275_v4, %v2476_v53  ;;  %v2528_v23 = vsub.f32 %v6278_v49, %v2476_v53  ;;  %v3256_v37 = vsel %vm1182_vm4, %v6476_v36, 0.0 }
 0x775   : > { %v3164_v38 = vsub.f32 %v6296_v15, %v3115_v5  ;;  %4549 = vpow2.f32 %v3206_v34  ;;  %v3165_v56 = vsub.f32 %v6299_v33, %v3115_v5  ;;  %v2618_v49 = vadd.f32 %v6474_v51, %v2617_v57 }
 0x776   : > { %v6489_v21 = vpop.eup %4531  ;;  %4551 = vpow2.f32 %v2565_v47  ;;  %v2569_v9 = vmul.f32 1.442695, %v2527_v41  ;;  %v2571_v59 = vmul.f32 1.442695, %v2528_v23  ;;  %v3257_v15 = vadd.f32 %v6481_v61, %v3256_v37 }
 0x777   : > { %v3208_v39 = vmul.f32 1.442695, %v3164_v38  ;;  %v6491_v25 = vpop.eup %4533  ;;  %4553 = vpow2.f32 %v2567_v63  ;;  %v3210_v4 = vmul.f32 1.442695, %v3165_v56  ;;  %v3119_v16 = vpop.xlane.xlu0 %3118  ;;  %2619 = vadd.xlane.f32.xlu0 %v2618_v49 }
 0x778   : > { %v2480_v40 = vpop.xlane.xlu1 %2479  ;;  %v6495_v33 = vpop.eup %4535  ;;  %4555 = vpow2.f32 %v2569_v9  ;;  %v3166_v0 = vsub.f32 %v6310_v55, %v3119_v16  ;;  %v3167_v13 = vsub.f32 %v6313_v11, %v3119_v16  ;;  %3258 = vadd.xlane.f32.xlu1 %v3257_v15  ;;  %v3260_v8 = vsel %vm1182_vm4, %v6491_v25, 0.0 }
 0x779   : > { %v2529_v17 = vsub.f32 %v6289_v62, %v2480_v40  ;;  %v6500_v18 = vpop.eup %4537  ;;  %4557 = vpow2.f32 %v2571_v59  ;;  %v2530_v7 = vsub.f32 %v6292_v60, %v2480_v40  ;;  %v3261_v11 = vadd.f32 %v6489_v21, %v3260_v8 }
 0x77a   : > { %v6505_v1 = vpop.eup %4539  ;;  %4559 = vpow2.f32 %v3208_v39  ;;  %v3212_v42 = vmul.f32 1.442695, %v3166_v0  ;;  %v3214_v50 = vmul.f32 1.442695, %v3167_v13  ;;  %v2621_v47 = vsel %vm1182_vm4, %v6500_v18, 0.0 }
 0x77b   : > { %v2573_v55 = vmul.f32 1.442695, %v2529_v17  ;;  %v6507_v34 = vpop.eup %4541  ;;  %4561 = vpow2.f32 %v3210_v4  ;;  %v2575_v62 = vmul.f32 1.442695, %v2530_v7  ;;  %v2484_v63 = vpop.xlane.xlu0 %2483  ;;  %v2622_v53 = vadd.f32 %v6495_v33, %v2621_v47  ;;  %3262 = vadd.xlane.f32.xlu0 %v3261_v11 }
 0x77c   : > { %v3123_v60 = vpop.xlane.xlu1 %3122  ;;  %v6512_v12 = vpop.eup %4543  ;;  %4563 = vpow2.f32 %v3212_v42  ;;  %v2531_v5 = vsub.f32 %v6303_v27, %v2484_v63  ;;  %v2532_v57 = vsub.f32 %v6306_v10, %v2484_v63  ;;  %v2625_v56 = vsel %vm1182_vm4, %v6507_v34, 0.0 }
 0x77d   : > { %v6517_v41 = vpop.eup %4545  ;;  %4565 = vpow2.f32 %v3214_v50  ;;  %v3168_v23 = vsub.f32 %v6324_v26, %v3123_v60  ;;  %v3169_v38 = vsub.f32 %v6327_v58, %v3123_v60  ;;  %2623 = vadd.xlane.f32.xlu1 %v2622_v53  ;;  %v2626_v27 = vadd.f32 %v6505_v1, %v2625_v56 }
 0x77e   : > { %v6523_v37 = vpop.eup %4547  ;;  %4567 = vpow2.f32 %v2573_v55  ;;  %v2577_v9 = vmul.f32 1.442695, %v2531_v5  ;;  %v2579_v59 = vmul.f32 1.442695, %v2532_v57  ;;  %v3264_v26 = vsel %vm1182_vm4, %v6517_v41, 0.0 }
 0x77f   : > { %v6526_v10 = vpop.eup %4549  ;;  %4569 = vpow2.f32 %v2575_v62  ;;  %v3216_v39 = vmul.f32 1.442695, %v3168_v23  ;;  %v3218_v4 = vmul.f32 1.442695, %v3169_v38  ;;  %v3127_v58 = vpop.xlane.xlu0 %3126  ;;  %v3265_v16 = vadd.f32 %v6512_v12, %v3264_v26  ;;  %2627 = vadd.xlane.f32.xlu0 %v2626_v27 }
 0x780   : > { %v2488_v49 = vpop.xlane.xlu1 %2487  ;;  %v6530_v15 = vpop.eup %4551  ;;  %4571 = vpow2.f32 %v2577_v9  ;;  %v3170_v40 = vsub.f32 %v6338_v3, %v3127_v58  ;;  %v3171_v0 = vsub.f32 %v6341_v43, %v3127_v58  ;;  %v3268_v8 = vsel %vm1182_vm4, %v6526_v10, 0.0 }
 0x781   : > { %v6535_v13 = vpop.eup %4553  ;;  %4573 = vpow2.f32 %v2579_v59  ;;  %v2533_v17 = vsub.f32 %v6317_v14, %v2488_v49  ;;  %v2534_v7 = vsub.f32 %v6320_v28, %v2488_v49  ;;  %3266 = vadd.xlane.f32.xlu1 %v3265_v16  ;;  %v3269_v3 = vadd.f32 %v6523_v37, %v3268_v8 }
 0x782   : > { %v6541_v42 = vpop.eup %4555  ;;  %4575 = vpow2.f32 %v3216_v39  ;;  %v3220_v50 = vmul.f32 1.442695, %v3170_v40  ;;  %v3222_v55 = vmul.f32 1.442695, %v3171_v0  ;;  %v2629_v14 = vsel %vm1182_vm4, %v6535_v13, 0.0 }
 0x783   : > { %v6544_v43 = vpop.eup %4557  ;;  %4577 = vpow2.f32 %v3218_v4  ;;  %v2581_v62 = vmul.f32 1.442695, %v2533_v17  ;;  %v2583_v11 = vmul.f32 1.442695, %v2534_v7  ;;  %v2492_v28 = vpop.xlane.xlu0 %2491  ;;  %v2630_v60 = vadd.f32 %v6530_v15, %v2629_v14  ;;  %3270 = vadd.xlane.f32.xlu0 %v3269_v3 }
 0x784   : > { %v3131_v47 = vpop.xlane.xlu1 %3130  ;;  %v6548_v63 = vpop.eup %4559  ;;  %4579 = vpow2.f32 %v3220_v50  ;;  %v2535_v53 = vsub.f32 %v6331_v32, %v2492_v28  ;;  %v2536_v5 = vsub.f32 %v6334_v6, %v2492_v28  ;;  %v2633_v56 = vsel %vm1182_vm4, %v6544_v43, 0.0 }
 0x785   : > { %v6553_v57 = vpop.eup %4561  ;;  %4581 = vpow2.f32 %v3222_v55  ;;  %v3172_v23 = vsub.f32 %v6352_v31, %v3131_v47  ;;  %v3173_v38 = vsub.f32 %v6355_v24, %v3131_v47  ;;  %2631 = vadd.xlane.f32.xlu1 %v2630_v60  ;;  %v2634_v32 = vadd.f32 %v6541_v42, %v2633_v56 }
 0x786   : > { %v6559_v9 = vpop.eup %4563  ;;  %4583 = vpow2.f32 %v2581_v62  ;;  %v2585_v59 = vmul.f32 1.442695, %v2535_v53  ;;  %v2587_v27 = vmul.f32 1.442695, %v2536_v5  ;;  %v3272_v31 = vsel %vm1182_vm4, %v6553_v57, 0.0  ;;  %v7176_v53 = vld [vmem:[#allocation38_spill] sm:$0xff] }
 0x787   : > { %v6562_v6 = vpop.eup %4565  ;;  %4585 = vpow2.f32 %v2583_v11  ;;  %v3224_v39 = vmul.f32 1.442695, %v3172_v23  ;;  %v3226_v4 = vmul.f32 1.442695, %v3173_v38  ;;  %v3135_v24 = vpop.xlane.xlu0 %3134  ;;  %v3273_v49 = vadd.f32 %v6548_v63, %v3272_v31  ;;  %2635 = vadd.xlane.f32.xlu0 %v2634_v32  ;;  %v7177_v38 = vld [vmem:[#allocation31_spill] sm:$0xff] }
 0x788   : > { %v2496_v26 = vpop.xlane.xlu1 %2495  ;;  %v6566_v58 = vpop.eup %4567  ;;  %4587 = vpow2.f32 %v2585_v59  ;;  %v3174_v16 = vsub.f32 %v6366_v29, %v3135_v24  ;;  %v3175_v40 = vsub.f32 %v6369_v35, %v3135_v24  ;;  %v3276_v8 = vsel %vm1182_vm4, %v6562_v6, 0.0  ;;  %v7178_v59 = vld [vmem:[#allocation30_spill] sm:$0xff] }
 0x789   : > { %v6571_v0 = vpop.eup %4569  ;;  %4589 = vpow2.f32 %v2587_v27  ;;  %v2537_v17 = vsub.f32 %v6345_v48, %v2496_v26  ;;  %v2538_v7 = vsub.f32 %v6348_v20, %v2496_v26  ;;  %3274 = vadd.xlane.f32.xlu1 %v3273_v49  ;;  %v3277_v29 = vadd.f32 %v6559_v9, %v3276_v8 }
 0x78a   : > { %v6577_v50 = vpop.eup %4571  ;;  %4591 = vpow2.f32 %v3224_v39  ;;  %v3228_v55 = vmul.f32 1.442695, %v3174_v16  ;;  %v3230_v3 = vmul.f32 1.442695, %v3175_v40  ;;  %v2637_v48 = vsel %vm1182_vm4, %v6571_v0, 0.0 }
 0x78b   : > { %v6580_v35 = vpop.eup %4573  ;;  %4593 = vpow2.f32 %v3226_v4  ;;  %v2589_v62 = vmul.f32 1.442695, %v2537_v17  ;;  %v2591_v11 = vmul.f32 1.442695, %v2538_v7  ;;  %v2500_v20 = vpop.xlane.xlu0 %2499  ;;  %v2638_v47 = vadd.f32 %v6566_v58, %v2637_v48  ;;  %3278 = vadd.xlane.f32.xlu0 %v3277_v29  ;;  %v7180_v29 = vld [vmem:[#allocation33_spill] sm:$0xff] }
 0x78c   : > { %v3139_v14 = vpop.xlane.xlu1 %3138  ;;  %v6584_v28 = vpop.eup %4575  ;;  %4595 = vpow2.f32 %v3228_v55  ;;  %v2539_v60 = vsub.f32 %v6359_v22, %v2500_v20  ;;  %v2540_v5 = vsub.f32 %v7176_v53, %v2500_v20  ;;  %v2641_v32 = vsel %vm1182_vm4, %v6580_v35, 0.0  ;;  %v7179_v55 = vld [vmem:[#allocation42_spill] sm:$0xff] }
 0x78d   : > { %v6589_v23 = vpop.eup %4577  ;;  %4597 = vpow2.f32 %v3230_v3  ;;  %v3176_v56 = vsub.f32 %v7177_v38, %v3139_v14  ;;  %v3177_v27 = vsub.f32 %v7178_v59, %v3139_v14  ;;  %2639 = vadd.xlane.f32.xlu1 %v2638_v47  ;;  %v2642_v22 = vadd.f32 %v6577_v50, %v2641_v32  ;;  %v7182_v14 = vld [vmem:[#allocation40_spill] sm:$0xff] }
 0x78e   : > { %v6595_v39 = vpop.eup %4579  ;;  %4599 = vpow2.f32 %v2589_v62  ;;  %v2593_v4 = vmul.f32 1.442695, %v2539_v60  ;;  %v2595_v31 = vmul.f32 1.442695, %v2540_v5  ;;  %v3280_v16 = vsel %vm1182_vm4, %v6589_v23, 0.0 }
 0x78f   : > { %v6598_v24 = vpop.eup %4581  ;;  %4601 = vpow2.f32 %v2591_v11  ;;  %v3232_v26 = vmul.f32 1.442695, %v3176_v56  ;;  %v3234_v49 = vmul.f32 1.442695, %v3177_v27  ;;  %v3143_v40 = vpop.xlane.xlu0 %3142  ;;  %v3281_v8 = vadd.f32 %v6584_v28, %v3280_v16  ;;  %2643 = vadd.xlane.f32.xlu0 %v2642_v22  ;;  %v7181_v11 = vld [vmem:[#allocation39_spill] sm:$0xff] }
 0x790   : > { %v2504_v17 = vpop.xlane.xlu1 %2503  ;;  %v6602_v7 = vpop.eup %4583  ;;  %4603 = vpow2.f32 %v2593_v4  ;;  %v3178_v3 = vsub.f32 %v7179_v55, %v3143_v40  ;;  %v3179_v62 = vsub.f32 %v7180_v29, %v3143_v40  ;;  %v3284_v60 = vsel %vm1182_vm4, %v6598_v24, 0.0  ;;  %v7184_v40 = vld [vmem:[#allocation41_spill] sm:$0xff] }
 0x791   : > { %v6607_v48 = vpop.eup %4585  ;;  %4605 = vpow2.f32 %v2595_v31  ;;  %v2541_v20 = vsub.f32 %v7181_v11, %v2504_v17  ;;  %v2542_v47 = vsub.f32 %v7182_v14, %v2504_v17  ;;  %3282 = vadd.xlane.f32.xlu1 %v3281_v8  ;;  %v3285_v56 = vadd.f32 %v6595_v39, %v3284_v60  ;;  %v7185_v8 = vld [vmem:[#allocation32_spill] sm:$0xff] }
 0x792   : > { %v6613_v53 = vpop.eup %4587  ;;  %4607 = vpow2.f32 %v3232_v26  ;;  %v3236_v5 = vmul.f32 1.442695, %v3178_v3  ;;  %v3238_v38 = vmul.f32 1.442695, %v3179_v62  ;;  %v2645_v4 = vsel %vm1182_vm4, %v6607_v48, 0.0  ;;  %v7188_v62 = vld [vmem:[#allocation43_spill] sm:$0xff] }
 0x793   : > { %7183 = vst [vmem:[#allocation36_spill] sm:$0xff] %v6613_v53  ;;  %v6616_v59 = vpop.eup %4589  ;;  %4609 = vpow2.f32 %v3234_v49  ;;  %v2597_v27 = vmul.f32 1.442695, %v2541_v20  ;;  %v2599_v32 = vmul.f32 1.442695, %v2542_v47  ;;  %v2508_v31 = vpop.xlane.xlu0 %2507  ;;  %v2646_v26 = vadd.f32 %v6602_v7, %v2645_v4  ;;  %3286 = vadd.xlane.f32.xlu0 %v3285_v56  ;;  %v7187_v49 = vld [vmem:[#allocation45_spill] sm:$0xff] }
 0x794   : > { %v2512_v22 = vpop.xlane.xlu1 %2511  ;;  %v6620_v16 = vpop.eup %4591  ;;  %4611 = vpow2.f32 %v3236_v5  ;;  %v2543_v17 = vsub.f32 %v7184_v40, %v2508_v31  ;;  %v2544_v55 = vsub.f32 %v7185_v8, %v2508_v31  ;;  %v2649_v20 = vsel %vm1182_vm4, %v6616_v59, 0.0 }
 0x795   : > { %v6625_v3 = vpop.eup %4593  ;;  %4613 = vpow2.f32 %v3238_v38  ;;  %v2545_v29 = vsub.f32 %v7187_v49, %v2512_v22  ;;  %v2546_v11 = vsub.f32 %v7188_v62, %v2512_v22  ;;  %2647 = vadd.xlane.f32.xlu1 %v2646_v26  ;;  %v2650_v5 = vadd.f32 %v6613_v53, %v2649_v20  ;;  %v7189_v26 = vld [vmem:[#allocation34_spill] sm:$0xff] }
 0x796   : > { %7186 = vst [vmem:[#allocation47_spill] sm:$0xff] %v6625_v3  ;;  %v6631_v14 = vpop.eup %4595  ;;  %4615 = vpow2.f32 %v2597_v27  ;;  %v2601_v47 = vmul.f32 1.442695, %v2543_v17  ;;  %v2603_v60 = vmul.f32 1.442695, %v2544_v55  ;;  %v3288_v31 = vsel %vm1182_vm4, %v6625_v3, 0.0 }
 0x797   : > { %v6634_v4 = vpop.eup %4597  ;;  %4617 = vpow2.f32 %v2599_v32  ;;  %v2605_v38 = vmul.f32 1.442695, %v2545_v29  ;;  %v2607_v56 = vmul.f32 1.442695, %v2546_v11  ;;  %v2516_v22 = vpop.xlane.xlu0 %2515  ;;  %v3289_v27 = vadd.f32 %v6620_v16, %v3288_v31  ;;  %v7190_v55 = vld [vmem:[#allocation50_spill] sm:$0xff]  ;;  %2651 = vadd.xlane.f32.xlu0 %v2650_v5  ;;  %v7191_v32 = vld [vmem:[#allocation44_spill] sm:$0xff] }
 0x798   : > { %v3147_v40 = vpop.xlane.xlu1 %3146  ;;  %v6638_v8 = vpop.eup %4599  ;;  %4619 = vpow2.f32 %v2601_v47  ;;  %v2547_v17 = vsub.f32 %v7189_v26, %v2516_v22  ;;  %v2548_v49 = vsub.f32 %v7190_v55, %v2516_v22  ;;  %v7192_v11 = vld [vmem:[#allocation46_spill] sm:$0xff]  ;;  %v3292_v3 = vsel %vm1182_vm4, %v6634_v4, 0.0 }
 0x799   : > { %v6643_v62 = vpop.eup %4601  ;;  %4621 = vpow2.f32 %v2603_v60  ;;  %v3180_v29 = vsub.f32 %v7191_v32, %v3147_v40  ;;  %v3181_v20 = vsub.f32 %v7192_v11, %v3147_v40  ;;  %3290 = vadd.xlane.f32.xlu1 %v3289_v27  ;;  %v3293_v26 = vadd.f32 %v6631_v14, %v3292_v3  ;;  %v7193_v27 = vld [vmem:[#allocation35_spill] sm:$0xff] }
 0x79a   : > { %v6649_v53 = vpop.eup %4603  ;;  %4623 = vpow2.f32 %v2605_v38  ;;  %v2609_v47 = vmul.f32 1.442695, %v2547_v17  ;;  %v2611_v31 = vmul.f32 1.442695, %v2548_v49  ;;  %v2653_v55 = vsel %vm1182_vm4, %v6643_v62, 0.0 }
 0x79b   : > { %v6652_v22 = vpop.eup %4605  ;;  %4625 = vpow2.f32 %v2607_v56  ;;  %v3240_v60 = vmul.f32 1.442695, %v3180_v29  ;;  %v3242_v5 = vmul.f32 1.442695, %v3181_v20  ;;  %v3151_v40 = vpop.xlane.xlu0 %3150  ;;  %v2654_v11 = vadd.f32 %v6638_v8, %v2653_v55  ;;  %3294 = vadd.xlane.f32.xlu0 %v3293_v26 }
 0x79c   : > { %v6656_v32 = vpop.eup %4607  ;;  %4627 = vpow2.f32 %v2609_v47  ;;  %v3182_v38 = vsub.f32 %v6422_v46, %v3151_v40  ;;  %v3183_v17 = vsub.f32 %v7193_v27, %v3151_v40  ;;  %v2657_v3 = vsel %vm1182_vm4, %v6652_v22, 0.0 }
 0x79d   : > { %v6661_v49 = vpop.eup %4609  ;;  %4629 = vpow2.f32 %v2611_v31  ;;  %2655 = vadd.xlane.f32.xlu1 %v2654_v11  ;;  %v2658_v47 = vadd.f32 %v6649_v53, %v2657_v3 }
 0x79e   : > { %v6665_v56 = vpop.eup %4611  ;;  %4631 = vpow2.f32 %v3240_v60  ;;  %v3244_v29 = vmul.f32 1.442695, %v3182_v38  ;;  %v3246_v20 = vmul.f32 1.442695, %v3183_v17  ;;  %v3296_v46 = vsel %vm1182_vm4, %v6661_v49, 0.0 }
 0x79f   : > { %7194 = vst [vmem:[#allocation49_spill] sm:$0xff] %v6665_v56  ;;  %v6668_v55 = vpop.eup %4613  ;;  %4633 = vpow2.f32 %v3242_v5  ;;  %v3297_v31 = vadd.f32 %v6656_v32, %v3296_v46  ;;  %2659 = vadd.xlane.f32.xlu0 %v2658_v47 }
 0x7a0   : > { %v6672_v40 = vpop.eup %4615  ;;  %4635 = vpow2.f32 %v3244_v29  ;;  %v3300_v26 = vsel %vm1182_vm4, %v6668_v55, 0.0 }
 0x7a1   : > { %7195 = vst [vmem:[#allocation48_spill] sm:$0xff] %v6672_v40  ;;  %v6677_v60 = vpop.eup %4617  ;;  %4637 = vpow2.f32 %v3246_v20  ;;  %v3301_v11 = vadd.f32 %v6665_v56, %v3300_v26  ;;  %3298 = vadd.xlane.f32.xlu1 %v3297_v31 }
 0x7a2   : > { %7196 = vst [vmem:[#allocation51_spill] sm:$0xff] %v6677_v60  ;;  %v6680_v38 = vpop.eup %4619  ;;  %v2661_v5 = vsel %vm1182_vm4, %v6677_v60, 0.0 }
 0x7a3   : > { %7197 = vst [vmem:[#allocation38_spill] sm:$0xff] %v6680_v38  ;;  %v6684_v27 = vpop.eup %4621  ;;  %v2662_v17 = vadd.f32 %v6672_v40, %v2661_v5  ;;  %3302 = vadd.xlane.f32.xlu0 %v3301_v11 }
 0x7a4   : > { %7198 = vst [vmem:[#allocation31_spill] sm:$0xff] %v6684_v27  ;;  %v6687_v3 = vpop.eup %4623  ;;  %v2665_v29 = vsel %vm1182_vm4, %v6684_v27, 0.0 }
 0x7a5   : > { %7199 = vst [vmem:[#allocation30_spill] sm:$0xff] %v6687_v3  ;;  %v6691_v46 = vpop.eup %4625  ;;  %v2666_v20 = vadd.f32 %v6680_v38, %v2665_v29  ;;  %2663 = vadd.xlane.f32.xlu1 %v2662_v17 }
 0x7a6   : > { %7200 = vst [vmem:[#allocation42_spill] sm:$0xff] %v6691_v46  ;;  %v6694_v47 = vpop.eup %4627  ;;  %v2669_v31 = vsel %vm1182_vm4, %v6691_v46, 0.0 }
 0x7a7   : > { %7201 = vst [vmem:[#allocation33_spill] sm:$0xff] %v6694_v47  ;;  %v6698_v26 = vpop.eup %4629  ;;  %v2670_v5 = vadd.f32 %v6687_v3, %v2669_v31  ;;  %2667 = vadd.xlane.f32.xlu0 %v2666_v20  ;;  %v3492_v20 = vld [vmem:[%s7207_s12 + $0x10] sm:$0xff] }
 0x7a8   : > { %7202 = vst [vmem:[#allocation39_spill] sm:$0xff] %v6698_v26  ;;  %v6701_v40 = vpop.eup %4631  ;;  %v2673_v27 = vsel %vm1182_vm4, %v6698_v26, 0.0 }
 0x7a9   : > { %7203 = vst [vmem:[#allocation40_spill] sm:$0xff] %v6701_v40  ;;  %v6705_v60 = vpop.eup %4633  ;;  %v2674_v11 = vadd.f32 %v6694_v47, %v2673_v27  ;;  %2671 = vadd.xlane.f32.xlu1 %v2670_v5  ;;  %v3490_v27 = vld [vmem:[%s7207_s12] sm:$0xff]  ;;  %v3493_v5 = vld [vmem:[%s7207_s12 + $0x18] sm:$0xff] }
 0x7aa   : > { %7204 = vst [vmem:[#allocation41_spill] sm:$0xff] %v6705_v60  ;;  %v6708_v29 = vpop.eup %4635  ;;  %v3304_v17 = vsel %vm1182_vm4, %v6705_v60, 0.0 }
 0x7ab   : > { %7205 = vst [vmem:[#allocation32_spill] sm:$0xff] %v6708_v29  ;;  %v6712_v46 = vpop.eup %4637  ;;  %v3305_v31 = vadd.f32 %v6701_v40, %v3304_v17  ;;  %2675 = vadd.xlane.f32.xlu0 %v2674_v11  ;;  %v939_v11 = vld [vmem:[#allocation3 + $0x38] sm:$0xff] }
 0x7ac   : > { %7206 = vst [vmem:[#allocation45_spill] sm:$0xff] %v6712_v46  ;;  %v3308_v3 = vsel %vm1182_vm4, %v6712_v46, 0.0  ;;  %3929 = vmatprep.mubr.msk.f32.mxu0 %vm1182_vm4, %v939_v11 }
 0x7ad   : > { %v3309_v26 = vadd.f32 %v6708_v29, %v3308_v3  ;;  %3306 = vadd.xlane.f32.xlu1 %v3305_v31  ;;  %v3491_v3 = vld [vmem:[%s7207_s12 + $0x8] sm:$0xff] }
 0x7af   : > { %3310 = vadd.xlane.f32.xlu0 %v3309_v26  ;;  %v937_v26 = vld [vmem:[#allocation3 + $0x28] sm:$0xff] }
 0x7b0   : > { %3896 = vmatprep.mubr.msk.f32.mxu1 %vm1182_vm4, %v937_v26 }
 0x7be   : > { %3496 = vperm.xlu1 %4318, %v3490_v27  }
 0x7c2   : > { %3506 = vperm.xlu1 %4318, %v3492_v20  }
 0x7c5   : > { %3501 = vperm.xlu0 %4317, %v3491_v3  }
 0x7c6   : > { %3511 = vperm.xlu1 %4318, %v3493_v5  }
 0x7fc   : > { %v3251_v17 = vpop.xlane.xlu1 %3250 }
 0x7fd   : > { %4639 = vrcp.f32 %v3251_v17 }
 0x800   : > { %v3255_v31 = vpop.xlane.xlu0 %3254  ;;  %v2616_v27 = vpop.xlane.xlu1 %2615 }
 0x801   : > { %4641 = vrcp.f32 %v3255_v31 }
 0x802   : > { %4643 = vrcp.f32 %v2616_v27 }
 0x804   : > { %v2620_v20 = vpop.xlane.xlu0 %2619 }
 0x805   : > { %v3259_v29 = vpop.xlane.xlu1 %3258  ;;  %4645 = vrcp.f32 %v2620_v20 }
 0x806   : > { %4647 = vrcp.f32 %v3259_v29 }
 0x807   : > { %v4640_v46 = vpop.eup %4639 }
 0x808   : > { %v3263_v40 = vpop.xlane.xlu0 %3262  ;;  %v3329_v26 = vmul.f32 %v4640_v46, %v6446_v52  ;;  %v3328_v17 = vmul.f32 %v4640_v46, %v6448_v45 }
 0x809   : > { %4649 = vrcp.f32 %v3263_v40 }
 0x80a   : > { %v2624_v5 = vpop.xlane.xlu1 %2623 }
 0x80b   : > { %v4642_v3 = vpop.eup %4641  ;;  %4651 = vrcp.f32 %v2624_v5 }
 0x80c   : > { %v2628_v60 = vpop.xlane.xlu0 %2627  ;;  %v3331_v11 = vmul.f32 %v4642_v3, %v6460_v19  ;;  %v3330_v31 = vmul.f32 %v4642_v3, %v6463_v54  ;;  %v4644_v27 = vpop.eup %4643 }
 0x80d   : > { %4653 = vrcp.f32 %v2628_v60  ;;  %v2694_v5 = vmul.f32 %v4644_v27, %v6444_v44  ;;  %v2693_v19 = vmul.f32 %v4644_v27, %v6458_v30 }
 0x80e   : > { %v3267_v47 = vpop.xlane.xlu1 %3266  ;;  %v4128_v20 = vpack.c.bf16 %v3331_v11, %v3329_v26  ;;  %v4131_v29 = vpack.c.bf16 %v3330_v31, %v3328_v17 }
 0x80f   : > { %v4646_v38 = vpop.eup %4645  ;;  %4655 = vrcp.f32 %v3267_v47 }
 0x810   : > { %v3271_v40 = vpop.xlane.xlu0 %3270  ;;  %4130 = vmatprep.subr.msk.bf16.mxu0 %vm6044_vm5, %v4128_v20  ;;  %v2696_v52 = vmul.f32 %v4646_v38, %v6468_v2  ;;  %v2695_v45 = vmul.f32 %v4646_v38, %v6474_v51  ;;  %v4648_v54 = vpop.eup %4647 }
 0x811   : > { %4657 = vrcp.f32 %v3271_v40  ;;  %4132 = vmatpush1.bf16.xpose.msra.mxu0 %v4131_v29  ;;  %v3333_v44 = vmul.f32 %v4648_v54, %v6476_v36  ;;  %v3332_v30 = vmul.f32 %v4648_v54, %v6481_v61 }
 0x812   : > { %v2632_v60 = vpop.xlane.xlu1 %2631  ;;  %v4088_v46 = vpack.c.bf16 %v2696_v52, %v2694_v5  ;;  %v4091_v3 = vpack.c.bf16 %v2695_v45, %v2693_v19 }
 0x813   : > { %v4650_v26 = vpop.eup %4649  ;;  %4659 = vrcp.f32 %v2632_v60 }
 0x814   : > { %v2636_v47 = vpop.xlane.xlu0 %2635  ;;  %4090 = vmatprep.subr.msk.bf16.mxu1 %vm6044_vm5, %v4088_v46  ;;  %v3335_v2 = vmul.f32 %v4650_v26, %v6491_v25  ;;  %v3334_v51 = vmul.f32 %v4650_v26, %v6489_v21 }
 0x815   : > { %v4652_v38 = vpop.eup %4651  ;;  %4661 = vrcp.f32 %v2636_v47  ;;  %4092 = vmatpush1.bf16.xpose.msra.mxu1 %v4091_v3 }
 0x816   : > { %v3275_v11 = vpop.xlane.xlu1 %3274  ;;  %v4133_v17 = vpack.c.bf16 %v3335_v2, %v3333_v44  ;;  %v4136_v31 = vpack.c.bf16 %v3334_v51, %v3332_v30  ;;  %v2698_v36 = vmul.f32 %v4652_v38, %v6500_v18  ;;  %v2697_v61 = vmul.f32 %v4652_v38, %v6495_v33 }
 0x817   : > { %v4654_v27 = vpop.eup %4653  ;;  %4663 = vrcp.f32 %v3275_v11 }
 0x818   : > { %v3279_v20 = vpop.xlane.xlu0 %3278  ;;  %4135 = vmatprep.subr.msk.bf16.mxu0 %vm6044_vm5, %v4133_v17  ;;  %v2700_v25 = vmul.f32 %v4654_v27, %v6507_v34  ;;  %v2699_v21 = vmul.f32 %v4654_v27, %v6505_v1 }
 0x819   : > { %v4656_v29 = vpop.eup %4655  ;;  %4665 = vrcp.f32 %v3279_v20  ;;  %4137 = vmatpush1.bf16.xpose.msra.mxu0 %v4136_v31 }
 0x81a   : > { %v2640_v40 = vpop.xlane.xlu1 %2639  ;;  %v4093_v5 = vpack.c.bf16 %v2700_v25, %v2698_v36  ;;  %v4096_v52 = vpack.c.bf16 %v2699_v21, %v2697_v61  ;;  %v3337_v18 = vmul.f32 %v4656_v29, %v6517_v41  ;;  %v3336_v33 = vmul.f32 %v4656_v29, %v6512_v12 }
 0x81b   : > { %v4658_v19 = vpop.eup %4657  ;;  %4667 = vrcp.f32 %v2640_v40 }
 0x81c   : > { %v2644_v45 = vpop.xlane.xlu0 %2643  ;;  %4095 = vmatprep.subr.msk.bf16.mxu1 %vm6044_vm5, %v4093_v5  ;;  %v3339_v34 = vmul.f32 %v4658_v19, %v6526_v10  ;;  %v3338_v1 = vmul.f32 %v4658_v19, %v6523_v37 }
 0x81d   : > { %v4660_v54 = vpop.eup %4659  ;;  %4669 = vrcp.f32 %v2644_v45  ;;  %4097 = vmatpush1.bf16.xpose.msra.mxu1 %v4096_v52 }
 0x81e   : > { %v3283_v60 = vpop.xlane.xlu1 %3282  ;;  %v4138_v46 = vpack.c.bf16 %v3339_v34, %v3337_v18  ;;  %v4141_v3 = vpack.c.bf16 %v3338_v1, %v3336_v33  ;;  %v2702_v41 = vmul.f32 %v4660_v54, %v6535_v13  ;;  %v2701_v12 = vmul.f32 %v4660_v54, %v6530_v15  ;;  %v7209_v54 = vld [vmem:[#allocation36_spill] sm:$0xff] }
 0x81f   : > { %v4662_v26 = vpop.eup %4661  ;;  %4671 = vrcp.f32 %v3283_v60 }
 0x820   : > { %v3287_v47 = vpop.xlane.xlu0 %3286  ;;  %4140 = vmatprep.subr.msk.bf16.mxu0 %vm6044_vm5, %v4138_v46  ;;  %v2704_v10 = vmul.f32 %v4662_v26, %v6544_v43  ;;  %v2703_v37 = vmul.f32 %v4662_v26, %v6541_v42 }
 0x821   : > { %v4664_v44 = vpop.eup %4663  ;;  %4673 = vrcp.f32 %v3287_v47  ;;  %4142 = vmatpush1.bf16.xpose.msra.mxu0 %v4141_v3 }
 0x822   : > { %v2648_v2 = vpop.xlane.xlu1 %2647  ;;  %v4098_v30 = vpack.c.bf16 %v2704_v10, %v2702_v41  ;;  %v4101_v51 = vpack.c.bf16 %v2703_v37, %v2701_v12  ;;  %v3341_v13 = vmul.f32 %v4664_v44, %v6553_v57  ;;  %v3340_v15 = vmul.f32 %v4664_v44, %v6548_v63  ;;  %v7210_v10 = vld [vmem:[#allocation47_spill] sm:$0xff] }
 0x823   : > { %v4666_v38 = vpop.eup %4665  ;;  %4675 = vrcp.f32 %v2648_v2 }
 0x824   : > { %v2652_v11 = vpop.xlane.xlu0 %2651  ;;  %4100 = vmatprep.subr.msk.bf16.mxu1 %vm6044_vm5, %v4098_v30  ;;  %v3343_v43 = vmul.f32 %v4666_v38, %v6562_v6  ;;  %v3342_v42 = vmul.f32 %v4666_v38, %v6559_v9 }
 0x825   : > { %v4668_v17 = vpop.eup %4667  ;;  %4677 = vrcp.f32 %v2652_v11  ;;  %4102 = vmatpush1.bf16.xpose.msra.mxu1 %v4101_v51 }
 0x826   : > { %v3291_v31 = vpop.xlane.xlu1 %3290  ;;  %v4143_v27 = vpack.c.bf16 %v3343_v43, %v3341_v13  ;;  %v4146_v20 = vpack.c.bf16 %v3342_v42, %v3340_v15  ;;  %v2706_v57 = vmul.f32 %v4668_v17, %v6571_v0  ;;  %v2705_v63 = vmul.f32 %v4668_v17, %v6566_v58 }
 0x827   : > { %v4670_v36 = vpop.eup %4669  ;;  %4679 = vrcp.f32 %v3291_v31 }
 0x828   : > { %v3295_v25 = vpop.xlane.xlu0 %3294  ;;  %4145 = vmatprep.subr.msk.bf16.mxu0 %vm6044_vm5, %v4143_v27  ;;  %v2708_v6 = vmul.f32 %v4670_v36, %v6580_v35  ;;  %v2707_v9 = vmul.f32 %v4670_v36, %v6577_v50  ;;  %v7211_v27 = vld [vmem:[#allocation49_spill] sm:$0xff] }
 0x829   : > { %v4672_v61 = vpop.eup %4671  ;;  %4681 = vrcp.f32 %v3295_v25  ;;  %4147 = vmatpush1.bf16.xpose.msra.mxu0 %v4146_v20 }
 0x82a   : > { %v2656_v21 = vpop.xlane.xlu1 %2655  ;;  %v4103_v29 = vpack.c.bf16 %v2708_v6, %v2706_v57  ;;  %v4106_v40 = vpack.c.bf16 %v2707_v9, %v2705_v63  ;;  %v3345_v0 = vmul.f32 %v4672_v61, %v6589_v23  ;;  %v3344_v58 = vmul.f32 %v4672_v61, %v6584_v28  ;;  %v7212_v6 = vld [vmem:[#allocation51_spill] sm:$0xff] }
 0x82b   : > { %v4674_v5 = vpop.eup %4673  ;;  %4683 = vrcp.f32 %v2656_v21  ;;  %v7213_v9 = vld [vmem:[#allocation31_spill] sm:$0xff] }
 0x82c   : > { %v2660_v52 = vpop.xlane.xlu0 %2659  ;;  %4105 = vmatprep.subr.msk.bf16.mxu1 %vm6044_vm5, %v4103_v29  ;;  %v3347_v35 = vmul.f32 %v4674_v5, %v6598_v24  ;;  %v3346_v50 = vmul.f32 %v4674_v5, %v6595_v39 }
 0x82d   : > { %v4676_v19 = vpop.eup %4675  ;;  %4685 = vrcp.f32 %v2660_v52  ;;  %4107 = vmatpush1.bf16.xpose.msra.mxu1 %v4106_v40 }
 0x82e   : > { %v3299_v45 = vpop.xlane.xlu1 %3298  ;;  %v4148_v18 = vpack.c.bf16 %v3347_v35, %v3345_v0  ;;  %v4151_v34 = vpack.c.bf16 %v3346_v50, %v3344_v58  ;;  %v2710_v23 = vmul.f32 %v4676_v19, %v6607_v48  ;;  %v2709_v28 = vmul.f32 %v4676_v19, %v6602_v7  ;;  %v7216_v0 = vld [vmem:[#allocation42_spill] sm:$0xff]  ;;  %v7217_v58 = vld [vmem:[#allocation39_spill] sm:$0xff] }
 0x82f   : > { %v4678_v33 = vpop.eup %4677  ;;  %4687 = vrcp.f32 %v3299_v45 }
 0x830   : > { %v3303_v1 = vpop.xlane.xlu0 %3302  ;;  %4150 = vmatprep.subr.msk.bf16.mxu0 %vm6044_vm5, %v4148_v18  ;;  %v2712_v24 = vmul.f32 %v4678_v33, %v6616_v59  ;;  %v2711_v39 = vmul.f32 %v4678_v33, %v7209_v54  ;;  %v7221_v54 = vld [vmem:[#allocation40_spill] sm:$0xff] }
 0x831   : > { %v4680_v60 = vpop.eup %4679  ;;  %4689 = vrcp.f32 %v3303_v1  ;;  %4152 = vmatpush1.bf16.xpose.msra.mxu0 %v4151_v34  ;;  %v7218_v34 = vld [vmem:[#allocation33_spill] sm:$0xff] }
 0x832   : > { %v2664_v46 = vpop.xlane.xlu1 %2663  ;;  %v4108_v3 = vpack.c.bf16 %v2712_v24, %v2710_v23  ;;  %v4111_v26 = vpack.c.bf16 %v2711_v39, %v2709_v28  ;;  %v3349_v48 = vmul.f32 %v4680_v60, %v7210_v10  ;;  %v3348_v7 = vmul.f32 %v4680_v60, %v6620_v16  ;;  %v7219_v1 = vld [vmem:[#allocation41_spill] sm:$0xff]  ;;  %v7222_v60 = vld [vmem:[#allocation32_spill] sm:$0xff] }
 0x833   : > { %v4682_v47 = vpop.eup %4681  ;;  %4691 = vrcp.f32 %v2664_v46  ;;  %v7220_v24 = vld [vmem:[#allocation45_spill] sm:$0xff] }
 0x834   : > { %v2668_v41 = vpop.xlane.xlu0 %2667  ;;  %4110 = vmatprep.subr.msk.bf16.mxu1 %vm6044_vm5, %v4108_v3  ;;  %v3351_v59 = vmul.f32 %v4682_v47, %v6634_v4  ;;  %v3350_v12 = vmul.f32 %v4682_v47, %v6631_v14  ;;  %v7223_v3 = vld [vmem:[#allocation30_spill] sm:$0xff] }
 0x835   : > { %v4684_v37 = vpop.eup %4683  ;;  %4693 = vrcp.f32 %v2668_v41  ;;  %4112 = vmatpush1.bf16.xpose.msra.mxu1 %v4111_v26 }
 0x836   : > { %v2672_v44 = vpop.xlane.xlu1 %2671  ;;  %v4153_v2 = vpack.c.bf16 %v3351_v59, %v3349_v48  ;;  %v4156_v30 = vpack.c.bf16 %v3350_v12, %v3348_v7  ;;  %v2714_v11 = vmul.f32 %v4684_v37, %v6643_v62  ;;  %v2713_v16 = vmul.f32 %v4684_v37, %v6638_v8  ;;  %v7224_v48 = vld [vmem:[#allocation52_spill] sm:$0xff]  ;;  %v936_v59 = vld [vmem:[#allocation3 + $0x20] sm:$0xff] }
 0x837   : > { %v4686_v51 = vpop.eup %4685  ;;  %4695 = vrcp.f32 %v2672_v44  ;;  %v938_v7 = vld [vmem:[#allocation3 + $0x30] sm:$0xff]  ;;  %v3482_v12 = vld [vmem:[%s7225_s3] sm:$0xff] }
 0x838   : > { %v2676_v38 = vpop.xlane.xlu0 %2675  ;;  %4155 = vmatprep.subr.msk.bf16.mxu0 %vm6044_vm5, %v4153_v2  ;;  %v2716_v4 = vmul.f32 %v4686_v51, %v6652_v22  ;;  %v2715_v14 = vmul.f32 %v4686_v51, %v6649_v53  ;;  %v3483_v51 = vld [vmem:[%s7225_s3 + $0x8] sm:$0xff] }
 0x839   : > { %v4688_v13 = vpop.eup %4687  ;;  %4697 = vrcp.f32 %v2676_v38  ;;  %4157 = vmatpush1.bf16.xpose.msra.mxu0 %v4156_v30  ;;  %v3484_v38 = vld [vmem:[%s7225_s3 + $0x10] sm:$0xff] }
 0x83a   : > { %v3307_v43 = vpop.xlane.xlu1 %3306  ;;  %v4113_v15 = vpack.c.bf16 %v2716_v4, %v2714_v11  ;;  %v4116_v42 = vpack.c.bf16 %v2715_v14, %v2713_v16  ;;  %v3353_v62 = vmul.f32 %v4688_v13, %v6661_v49  ;;  %v3352_v8 = vmul.f32 %v4688_v13, %v6656_v32  ;;  %v7214_v49 = vld [vmem:[#allocation48_spill] sm:$0xff]  ;;  %v3485_v11 = vld [vmem:[%s7225_s3 + $0x18] sm:$0xff] }
 0x83b   : > { %v4690_v17 = vpop.eup %4689  ;;  %4699 = vrcp.f32 %v3307_v43 }
 0x83c   : > { %v3311_v31 = vpop.xlane.xlu0 %3310  ;;  %4115 = vmatprep.subr.msk.bf16.mxu1 %vm6044_vm5, %v4113_v15  ;;  %v3355_v22 = vmul.f32 %v4690_v17, %v6668_v55  ;;  %v3354_v53 = vmul.f32 %v4690_v17, %v7211_v27  ;;  %v7215_v55 = vld [vmem:[#allocation38_spill] sm:$0xff] }
 0x83d   : > { %v4692_v20 = vpop.eup %4691  ;;  %4701 = vrcp.f32 %v3311_v31  ;;  %4117 = vmatpush1.bf16.xpose.msra.mxu1 %v4116_v42 }
 0x83e   : > { %v4158_v36 = vpack.c.bf16 %v3355_v22, %v3353_v62  ;;  %v4161_v25 = vpack.c.bf16 %v3354_v53, %v3352_v8  ;;  %v2718_v63 = vmul.f32 %v4692_v20, %v7212_v6  ;;  %v2717_v21 = vmul.f32 %v4692_v20, %v7214_v49  ;;  %v3497_v4 = vpop.permute.xlu1 %3496 }
 0x83f   : > { %v4694_v57 = vpop.eup %4693 }
 0x840   : > { %4160 = vmatprep.subr.msk.bf16.mxu0 %vm6044_vm5, %v4158_v36  ;;  %v2720_v61 = vmul.f32 %v4694_v57, %v7213_v9  ;;  %v2719_v29 = vmul.f32 %v4694_v57, %v7215_v55 }
 0x841   : > { %v4696_v32 = vpop.eup %4695  ;;  %4162 = vmatpush1.bf16.xpose.msra.mxu0 %v4161_v25 }
 0x842   : > { %v4118_v40 = vpack.c.bf16 %v2720_v61, %v2718_v63  ;;  %v4121_v5 = vpack.c.bf16 %v2719_v29, %v2717_v21  ;;  %v2722_v35 = vmul.f32 %v4696_v32, %v7216_v0  ;;  %v2721_v26 = vmul.f32 %v4696_v32, %v7223_v3  ;;  %v3507_v16 = vpop.permute.xlu1 %3506 }
 0x843   : > { %v4698_v52 = vpop.eup %4697 }
 0x844   : > { %4120 = vmatprep.subr.msk.bf16.mxu1 %vm6044_vm5, %v4118_v40  ;;  %v2724_v50 = vmul.f32 %v4698_v52, %v7217_v58  ;;  %v2723_v33 = vmul.f32 %v4698_v52, %v7218_v34  ;;  %v3502_v14 = vpop.permute.xlu0 %3501 }
 0x845   : > { %v4700_v19 = vpop.eup %4699  ;;  %4122 = vmatpush1.bf16.xpose.msra.mxu1 %v4121_v5 }
 0x846   : > { %v4123_v45 = vpack.c.bf16 %v2724_v50, %v2722_v35  ;;  %v3357_v23 = vmul.f32 %v4700_v19, %v7219_v1  ;;  %v3356_v39 = vmul.f32 %v4700_v19, %v7221_v54  ;;  %v4126_v10 = vpack.c.bf16 %v2723_v33, %v2721_v26  ;;  %v3512_v17 = vpop.permute.xlu1 %3511 }
 0x847   : > { %v4702_v18 = vpop.eup %4701 }
 0x848   : > { %4125 = vmatprep.subr.msk.bf16.mxu1 %vm6044_vm5, %v4123_v45  ;;  %v3359_v28 = vmul.f32 %v4702_v18, %v7220_v24  ;;  %v3358_v46 = vmul.f32 %v4702_v18, %v7222_v60 }
 0x84a   : > { %v4163_v47 = vpack.c.bf16 %v3359_v28, %v3357_v23  ;;  %v4166_v41 = vpack.c.bf16 %v3358_v46, %v3356_v39 }
 0x84c   : > { %4165 = vmatprep.subr.msk.bf16.mxu0 %vm6044_vm5, %v4163_v47 }
 0x84d   : > { %4127 = vmatpush1.bf16.xpose.msra.mxu1 %v4126_v10  ;;  %4167 = vmatpush1.bf16.xpose.msra.mxu0 %v4166_v41 }
 0x84e   : > { %4169 = vmatprep.subr.bf16.mxu1 %v7224_v48 }
 0x854   : > { %2841 = vmatmul.mubr.f32.vlgmr.msra.gmra.mrb[66].mxu1 %v936_v59  ;;  %3476 = vmatmul.mubr.f32.vlgmr.msra.gmra.mrb[70].mxu0 %v938_v7 }
 0x855   : > { %4171 = vmatpush3.bf16.msra.mxu1 %v7224_v48  ;;  %3978 = vmatprep.mubr.msk.f32.mxu1 %vm826_vm2, %v3482_v12 }
 0x927   : > { %v2842_v37 = vpop.f32.mrb[66].mxu1  ;;  %v3477_v56 = vpop.f32.mrb[70].mxu0 }
 0x928   : > { %v4172_v44 = vpack.c.bf16 %v3477_v56, %v2842_v37  ;;  %v2844_v2 = vpop.f32.mrb[67].mxu1  ;;  %v3479_v30 = vpop.f32.mrb[71].mxu0 }
 0x92a   : > { %4173 = vmatprep.subr.bf16.mxu1 %v4172_v44 }
 0x92b   : > { %4175 = vmatpush3.bf16.msra.mxu1 %v4172_v44 }
 0x92e   : > { %3979 = vmatmul.mubr.msk.f32.vlgmr.msra.gmra.mrb[68].mxu1 %vm826_vm2, %v3483_v51 }
 0x92f   : > { %3981 = vmatprep.mubr.msk.f32.mxu1 %vm826_vm2, %v3484_v38 }
 0x932   : > { %3982 = vmatmul.mubr.msk.f32.gmra.mrb[70].mxu1 %vm826_vm2, %v3485_v11 }
 0xa01   : > { %v3980_v13 = vpop.f32.mrb[68].mxu1 }
 0xa02   : > { %v3598_v43 = vadd.f32 %v3980_v13, %v3502_v14  ;;  %v3592_v15 = vpop.f32.mrb[69].mxu1 }
 0xa03   : > { %v3593_v42 = vadd.f32 %v3592_v15, %v3497_v4 }
 0xa04   : > { %3612 = vst [vmem:[%s5301_s20 + $0x8] sm:$0xff] %v3598_v43 }
 0xa05   : > { %3611 = vst [vmem:[%s5301_s20] sm:$0xff] %v3593_v42  ;;  %v3983_v31 = vpop.f32.mrb[70].mxu1 }
 0xa06   : > { %v3608_v62 = vadd.f32 %v3983_v31, %v3512_v17  ;;  %v3602_v22 = vpop.f32.mrb[71].mxu1 }
 0xa07   : > { %v3603_v8 = vadd.f32 %v3602_v22, %v3507_v16 }
 0xa08   : > { %3614 = vst [vmem:[%s5301_s20 + $0x18] sm:$0xff] %v3608_v62 }
 0xa09   : > { %3613 = vst [vmem:[%s5301_s20 + $0x10] sm:$0xff] %v3603_v8 }
 0xa0a   : > { %4828 = shalt.err (!%p4825_p3)
}
 0xa0b   : > { %s4829_s28 = scalar_lea.hbm %s6854_s7, 512  ;;  %s4833_s11 = scalar_lea.hbm %s7230_s5, 2048 }
 0xa0c   : > { %p4830_p11 = scmp.ne.s32.totalorder %s6854_s7, %s4829_s28  ;;  %p4834_p4 = scmp.lt.u32.totalorder %s6854_s7, %s7230_s5 }
 0xa0d   : > { %p4835_p6 = scmp.lt.u32.totalorder %s4833_s11, %s4829_s28  ;;  %p4837_p10 = scmp.lt.u32.totalorder %s4829_s28, %s6854_s7 }
 0xa0e   : > { %p4831_p5 = pnand %p4830_p11, %p7231_p0 }
 0xa0f   : > { %p4836_p9 = por %p4835_p6, %p4834_p4 }
 0xa10   : > { %p4832_p1 = pneg %p4831_p5 }
 0xa11   : > { %p4838_p7 = por %p4837_p10, %p4836_p9 }
 0xa13   : > { %p4839_p8 = pnand %p4838_p7, %p4832_p1 }
 0xa15   : > { %4842 = shalt.err (!%p4839_p8)
}
 0xa16   : > { %s4960_s9 = smov 128   ;;  %s4961_s13 = smov 256  }
 0xa17   : > { %s4962_s29 = smov 8  }
 0xa18   : > { %4190 = dma.vmem_to_hbm [thread:$0]  (%p7231_p0), %s6856_s10, 512, %s6854_s7, %s6862_s25, %s4960_s9, %s4961_s13, %s4962_s29  }
 0xa19 PF: > { %s7232_s20 = sld [smem:[#allocation19_spill]]  ;;  %s7233_s24 = sld [smem:[#allocation29_spill]] }
 0xa1a   : > { %p4212_p12 = scmp.ge.s32.totalorder %s4945_s23, 2 }
 0xa1f   : > { %s3645_s11 = sand.u32 1, %s7232_s20   ;;  %p7234_p13 = scmp.ne.s32.totalorder %s7233_s24, 0 }
 0xa20   : > { %s3646_s28 = scalar_lea.sflag [#allocation8], %s3645_s11 }
 0xa21   : > { %p4203_p2 = pnand %p4212_p12, %p7234_p13 }
 0xa23   : > { %4900 = dma.done.wait (!%p4203_p2), %s3646_s28, 512  }
 0xa24   : > { %4902 = vsyncadd (!%p4203_p2), %s3646_s28, 4294966784  ;;  %s28_s23 = sadd.s32 1, %s4945_s23   ;;  %s7235_s19 = sld [smem:[#allocation26_spill]] }
 0xa25   : > { %p25_p3 = scmp.ge.s32.totalorder %s28_s23, 6   ;;  %s7236_s10 = sld [smem:[#allocation27_spill]] }
 0xa26   : > { %s7237_s7 = sld [smem:[#allocation22_spill]]  ;;  %s7238_s25 = sld [smem:[#allocation23_spill]] }
 0xa27   : > { %s7239_s13 = smov %s4921_s17  ;;  %s7240_s14 = smov %s4913_s15 }
 0xa28   : > { %s7241_s15 = smov %s4917_s16  ;;  %s7243_s17 = smov %s4925_s18 }
 0xa29   : > { %s7246_s20 = smov %s4941_s22  ;;  %27 = sbr.rel (!%p25_p3) target bundleno = 18 (0x12), region = 167 }
 0xa2a   : > { %s7242_s16 = smov %s7235_s19  ;;  %s7245_s19 = smov %s4937_s21 }
 0xa2b   : > { %s7244_s18 = smov %s7236_s10 }
 0xa2c   : > { %s7247_s21 = smov %s7237_s7  ;;  %s7248_s22 = smov %s7238_s25 }
 0xa30   :  { %3651 = vsyncpa [#allocation7], 1 }
 0xa31   :  { %3653 = vsyncpa [#allocation7 + $0x1], 1 }
 0xa32   :  { %3654 = vsyncpa [#allocation10], 1 }
 0xa33   :  { %3655 = vsyncpa [#allocation13], 1 }
 0xa34   :  { %3656 = vsyncpa [#allocation8], 1 }
 0xa35   :  { %3658 = vsyncpa [#allocation8 + $0x1], 1 }

</bundles_post_ra>
